<compile_context>
chip_gen: v6e
topology: v6e:2x2x1
jax: 0.10.0
libtpu: 0.0.40
codegen_flags: <defaults>
</compile_context>

<pallas_src>
import functools

import jax
import jax.numpy as jnp
from jax.experimental import pallas as pl
from jax.experimental.pallas import tpu as pltpu

GLOVE_DIM = 300
FEATURE_DIM_1 = 2048


def _round_up(x, m):
    return (x + m - 1) // m * m


def _osanet_kernel(pooled_ref, obj_ref, wfe_ref, bfe_ref, w1_ref, b1_ref,
                   wal_ref, batt_ref, blin_ref,
                   out_ref, wgp_ref, wobj_ref, *, batch, n_obj, c_pad):
    f32 = jnp.float32

    # TODO(synk): the pretrained resnet101 backbone cannot be reproduced in-script;
    # replaced by a deterministic global-average-pool (done in the wrapper) + linear
    # stand-in that yields the same (B, 2048) feature shape the network expects.
    g = (jnp.dot(pooled_ref[...], wfe_ref[...], preferred_element_type=f32)
         + bfe_ref[...])                                            # (B, 2048)

    # linear_1: (B, 2048) @ (2048, Dp) + b  -> g_prime (padded to Dp lanes).
    # w1 arrives as bf16 (half the HBM DMA); upcast in VMEM, accumulate in f32.
    gp = (jnp.dot(g, w1_ref[...].astype(f32), preferred_element_type=f32)
          + b1_ref[...])                                            # (B, Dp)

    # Stacked [w_att | w_lin] -> one matmul for the g_prime row and one for all
    # object rows. The concat([g_prime, obj], dim=1) never materializes.
    zt_gp = jnp.dot(gp, wal_ref[...], preferred_element_type=f32)   # (B, 2*Cp)
    zt_ob = jnp.dot(obj_ref[...], wal_ref[...],
                    preferred_element_type=f32)                     # (B*n_obj, 2*Cp)

    z_gp = zt_gp[:, :c_pad] + batt_ref[...]                         # (B, Cp)
    t_gp = zt_gp[:, c_pad:]                                         # (B, Cp)
    z_ob = (zt_ob[:, :c_pad] + batt_ref[...]).reshape(batch, n_obj, c_pad)
    t_ob = zt_ob[:, c_pad:].reshape(batch, n_obj, c_pad)            # (B, n_obj, Cp)

    # softmax over S = 1 + n_obj (torch dim=1), vectorized over batch and class.
    m = jnp.maximum(jnp.max(z_ob, axis=1), z_gp)                    # (B, Cp)
    p_gp = jnp.exp(z_gp - m)                                        # (B, Cp)
    p_ob = jnp.exp(z_ob - m[:, None, :])                            # (B, n_obj, Cp)
    inv = 1.0 / (p_gp + jnp.sum(p_ob, axis=1))                      # (B, Cp)
    w_gp = p_gp * inv
    w_ob = p_ob * inv[:, None, :]

    # out[b,c] = sum_s w[b,s,c] * (h[b,s,:] @ w_lin[:,c]) + b_lin[c]
    # (equal to lin_c(sum_s w*h) since dropout is identity in eval mode)
    out_ref[...] = w_gp * t_gp + jnp.sum(w_ob * t_ob, axis=1) + blin_ref[...]
    wgp_ref[...] = w_gp
    wobj_ref[...] = w_ob


def init_params(key, img_channels, num_classes):
    """Deterministic PyTorch-Linear-style init (uniform +-1/sqrt(fan_in))."""
    ks = jax.random.split(key, 8)

    def lin(k, fan_in, shape):
        bound = 1.0 / float(fan_in) ** 0.5
        return jax.random.uniform(k, shape, jnp.float32, -bound, bound)

    return {
        # feature-extractor stand-in
        "w_fe": lin(ks[0], img_channels, (img_channels, FEATURE_DIM_1)),
        "b_fe": lin(ks[1], img_channels, (1, FEATURE_DIM_1)),
        # linear_1 (2048 -> 300), weight stored transposed
        "w1": lin(ks[2], FEATURE_DIM_1, (FEATURE_DIM_1, GLOVE_DIM)),
        "b1": lin(ks[3], FEATURE_DIM_1, (1, GLOVE_DIM)),
        # att_list[i].W_1 (300 -> 1), stacked over classes -> (300, C)
        "w_att": lin(ks[4], GLOVE_DIM, (GLOVE_DIM, num_classes)),
        "b_att": lin(ks[5], GLOVE_DIM, (1, num_classes)),
        # lin_list[i] (300 -> 1), stacked over classes -> (300, C)
        "w_lin": lin(ks[6], GLOVE_DIM, (GLOVE_DIM, num_classes)),
        "b_lin": lin(ks[7], GLOVE_DIM, (1, num_classes)),
    }


def osanet_forward(img, obj, params, num_classes):
    B, _, _, _ = img.shape
    n_obj = obj.shape[1]
    D, Dp = GLOVE_DIM, _round_up(GLOVE_DIM, 128)          # 300 -> 384
    C, Cp = num_classes, _round_up(num_classes, 128)      # 4   -> 128

    f32 = jnp.float32
    # Backbone stand-in, spatial pooling done in XLA (no raw-image DMA into VMEM).
    pooled = jnp.mean(img.astype(f32), axis=(2, 3))                       # (B, C_img)

    # Wrapper-side padding / stacking (pure layout plumbing, zero-padded so the
    # padded lanes contribute nothing and padded class columns come out as 0).
    obj_p = jnp.pad(obj.reshape(B * n_obj, D).astype(f32),
                    ((0, 0), (0, Dp - D)))                                # (B*n, Dp)
    w1_p = jnp.pad(params["w1"], ((0, 0), (0, Dp - D))).astype(jnp.bfloat16)
    b1_p = jnp.pad(params["b1"], ((0, 0), (0, Dp - D)))
    w_al = jnp.concatenate(
        [jnp.pad(params["w_att"], ((0, Dp - D), (0, Cp - C))),
         jnp.pad(params["w_lin"], ((0, Dp - D), (0, Cp - C)))], axis=1)   # (Dp, 2Cp)
    b_att_p = jnp.pad(params["b_att"], ((0, 0), (0, Cp - C)))
    b_lin_p = jnp.pad(params["b_lin"], ((0, 0), (0, Cp - C)))

    # NOTE: at realistic backbone/feature sizes, add a grid over batch with
    # BlockSpec tiling + dimension_semantics=("parallel",) so v7x's 64 MiB VMEM
    # and second TensorCore are respected/used; at these toy sizes one program
    # with whole-array VMEM residency is the lowest-overhead choice.
    kernel = functools.partial(_osanet_kernel, batch=B, n_obj=n_obj, c_pad=Cp)
    out_p, w_gp, w_ob = pl.pallas_call(
        kernel,
        out_shape=(
            jax.ShapeDtypeStruct((B, Cp), f32),
            jax.ShapeDtypeStruct((B, Cp), f32),
            jax.ShapeDtypeStruct((B, n_obj, Cp), f32),
        ),
        in_specs=[pl.BlockSpec(memory_space=pltpu.MemorySpace.VMEM)] * 9,
        out_specs=(
            pl.BlockSpec(memory_space=pltpu.MemorySpace.VMEM),
            pl.BlockSpec(memory_space=pltpu.MemorySpace.VMEM),
            pl.BlockSpec(memory_space=pltpu.MemorySpace.VMEM),
        ),
    )(pooled, obj_p, params["w_fe"], params["b_fe"], w1_p, b1_p,
      w_al, b_att_p, b_lin_p)

    out = out_p[:, :C]
    wts = jnp.concatenate([w_gp[:, None, :C], w_ob[:, :, :C]], axis=1)   # (B, S, C)
    # weight_list mirrors torch: list of (B, S, 1) per class
    weight_list = [wts[:, :, i:i + 1] for i in range(C)]
    return out, weight_list


def reference(img, obj, params):
    """Pure-JAX reference of the same (eval-mode) forward, for validation.

    Uses the same bf16-cast linear_1 weight as the kernel so the comparison is tight.
    """
    hi = jax.lax.Precision.HIGHEST
    pooled = jnp.mean(img, axis=(2, 3))
    g = jnp.dot(pooled, params["w_fe"], precision=hi) + params["b_fe"]
    w1_eff = params["w1"].astype(jnp.bfloat16).astype(jnp.float32)
    gp = jnp.dot(g, w1_eff, precision=hi) + params["b1"]
    h = jnp.concatenate([gp[:, None, :], obj], axis=1)                    # (B, S, 300)
    z = jnp.einsum("bsd,dc->bsc", h, params["w_att"], precision=hi) + params["b_att"][0]
    w = jax.nn.softmax(z, axis=1)
    h_hat = jnp.einsum("bsc,bsd->bcd", w, h, precision=hi)
    out = jnp.einsum("bcd,dc->bc", h_hat, params["w_lin"], precision=hi) + params["b_lin"][0]
    return out, w


if __name__ == "__main__":
    num_classes = 4
    B, C_img, H, W = 2, 4, 16, 16
    n_obj = 8

    key = jax.random.PRNGKey(0)
    k_img, k_obj, k_p = jax.random.split(key, 3)
    img = jax.random.normal(k_img, (B, C_img, H, W), jnp.float32)
    obj = jax.random.normal(k_obj, (B, n_obj, GLOVE_DIM), jnp.float32)
    params = init_params(k_p, C_img, num_classes)

    out, weight_list = osanet_forward(img, obj, params, num_classes)
    jax.block_until_ready(out)

    ref_out, ref_w = reference(img, obj, params)
    assert out.shape == (B, num_classes)
    assert all(w.shape == (B, n_obj + 1, 1) for w in weight_list)
    assert jnp.allclose(out, ref_out, atol=1e-4, rtol=1e-4)
    wts_stacked = jnp.concatenate(weight_list, axis=-1)
    assert jnp.allclose(wts_stacked, ref_w, atol=1e-4, rtol=1e-4)

    print("KERNEL_OK")
</pallas_src>

<mosaic_0001>
module attributes {stable_mosaic.version = 11 : i64} {
  func.func @_osanet_kernel(%arg0: memref<2x4xf32, #tpu.memory_space<vmem>>, %arg1: memref<16x384xf32, #tpu.memory_space<vmem>>, %arg2: memref<4x2048xf32, #tpu.memory_space<vmem>>, %arg3: memref<1x2048xf32, #tpu.memory_space<vmem>>, %arg4: memref<2048x384xbf16, #tpu.memory_space<vmem>>, %arg5: memref<1x384xf32, #tpu.memory_space<vmem>>, %arg6: memref<384x256xf32, #tpu.memory_space<vmem>>, %arg7: memref<1x128xf32, #tpu.memory_space<vmem>>, %arg8: memref<1x128xf32, #tpu.memory_space<vmem>>, %arg9: memref<2x128xf32, #tpu.memory_space<vmem>>, %arg10: memref<2x128xf32, #tpu.memory_space<vmem>>, %arg11: memref<2x8x128xf32, #tpu.memory_space<vmem>>) attributes {dimension_semantics = [], scalar_prefetch = 0 : i64, scratch_operands = 0 : i64, tpu.core_type = #tpu.core_type<tc>} {
    %c0 = arith.constant 0 : index
    %c0_0 = arith.constant 0 : index
    %0 = vector.load %arg0[%c0, %c0_0] : memref<2x4xf32, #tpu.memory_space<vmem>>, vector<2x4xf32>
    %c0_1 = arith.constant 0 : index
    %c0_2 = arith.constant 0 : index
    %1 = vector.load %arg2[%c0_1, %c0_2] : memref<4x2048xf32, #tpu.memory_space<vmem>>, vector<4x2048xf32>
    %cst = arith.constant dense<0.000000e+00> : vector<2x2048xf32>
    %2 = tpu.matmul %0, %1, %cst {dimension_numbers = #tpu.dot_dimension_numbers<[1], [0], [0], [1], [0, 0, 1, 1], [], []>} : vector<2x4xf32>, vector<4x2048xf32>, vector<2x2048xf32> -> vector<2x2048xf32>
    %c0_3 = arith.constant 0 : index
    %c0_4 = arith.constant 0 : index
    %3 = vector.load %arg3[%c0_3, %c0_4] : memref<1x2048xf32, #tpu.memory_space<vmem>>, vector<1x2048xf32>
    %4 = vector.broadcast %3 : vector<1x2048xf32> to vector<2x2048xf32>
    %5 = arith.addf %2, %4 : vector<2x2048xf32>
    %c0_5 = arith.constant 0 : index
    %c0_6 = arith.constant 0 : index
    %6 = vector.load %arg4[%c0_5, %c0_6] : memref<2048x384xbf16, #tpu.memory_space<vmem>>, vector<2048x384xbf16>
    %7 = arith.extf %6 : vector<2048x384xbf16> to vector<2048x384xf32>
    %cst_7 = arith.constant dense<0.000000e+00> : vector<2x384xf32>
    %8 = tpu.matmul %5, %7, %cst_7 {dimension_numbers = #tpu.dot_dimension_numbers<[1], [0], [0], [1], [0, 0, 1, 1], [], []>} : vector<2x2048xf32>, vector<2048x384xf32>, vector<2x384xf32> -> vector<2x384xf32>
    %c0_8 = arith.constant 0 : index
    %c0_9 = arith.constant 0 : index
    %9 = vector.load %arg5[%c0_8, %c0_9] : memref<1x384xf32, #tpu.memory_space<vmem>>, vector<1x384xf32>
    %10 = vector.broadcast %9 : vector<1x384xf32> to vector<2x384xf32>
    %11 = arith.addf %8, %10 : vector<2x384xf32>
    %c0_10 = arith.constant 0 : index
    %c0_11 = arith.constant 0 : index
    %12 = vector.load %arg6[%c0_10, %c0_11] : memref<384x256xf32, #tpu.memory_space<vmem>>, vector<384x256xf32>
    %cst_12 = arith.constant dense<0.000000e+00> : vector<2x256xf32>
    %13 = tpu.matmul %11, %12, %cst_12 {dimension_numbers = #tpu.dot_dimension_numbers<[1], [0], [0], [1], [0, 0, 1, 1], [], []>} : vector<2x384xf32>, vector<384x256xf32>, vector<2x256xf32> -> vector<2x256xf32>
    %c0_13 = arith.constant 0 : index
    %c0_14 = arith.constant 0 : index
    %14 = vector.load %arg1[%c0_13, %c0_14] : memref<16x384xf32, #tpu.memory_space<vmem>>, vector<16x384xf32>
    %c0_15 = arith.constant 0 : index
    %c0_16 = arith.constant 0 : index
    %15 = vector.load %arg6[%c0_15, %c0_16] : memref<384x256xf32, #tpu.memory_space<vmem>>, vector<384x256xf32>
    %cst_17 = arith.constant dense<0.000000e+00> : vector<16x256xf32>
    %16 = tpu.matmul %14, %15, %cst_17 {dimension_numbers = #tpu.dot_dimension_numbers<[1], [0], [0], [1], [0, 0, 1, 1], [], []>} : vector<16x384xf32>, vector<384x256xf32>, vector<16x256xf32> -> vector<16x256xf32>
    %17 = vector.extract_strided_slice %13 {offsets = [0, 0], sizes = [2, 128], strides = [1, 1]} : vector<2x256xf32> to vector<2x128xf32>
    %c0_18 = arith.constant 0 : index
    %c0_19 = arith.constant 0 : index
    %18 = vector.load %arg7[%c0_18, %c0_19] : memref<1x128xf32, #tpu.memory_space<vmem>>, vector<1x128xf32>
    %19 = vector.broadcast %18 : vector<1x128xf32> to vector<2x128xf32>
    %20 = arith.addf %17, %19 : vector<2x128xf32>
    %21 = vector.extract_strided_slice %13 {offsets = [0, 128], sizes = [2, 128], strides = [1, 1]} : vector<2x256xf32> to vector<2x128xf32>
    %22 = vector.extract_strided_slice %16 {offsets = [0, 0], sizes = [16, 128], strides = [1, 1]} : vector<16x256xf32> to vector<16x128xf32>
    %c0_20 = arith.constant 0 : index
    %c0_21 = arith.constant 0 : index
    %23 = vector.load %arg7[%c0_20, %c0_21] : memref<1x128xf32, #tpu.memory_space<vmem>>, vector<1x128xf32>
    %24 = vector.broadcast %23 : vector<1x128xf32> to vector<16x128xf32>
    %25 = arith.addf %22, %24 : vector<16x128xf32>
    %26 = vector.shape_cast %25 : vector<16x128xf32> to vector<2x8x128xf32>
    %27 = vector.extract_strided_slice %16 {offsets = [0, 128], sizes = [16, 128], strides = [1, 1]} : vector<16x256xf32> to vector<16x128xf32>
    %28 = vector.shape_cast %27 : vector<16x128xf32> to vector<2x8x128xf32>
    %cst_22 = arith.constant dense<0xFF800000> : vector<2x128xf32>
    %29 = vector.multi_reduction <maximumf>, %26, %cst_22 [1] : vector<2x8x128xf32> to vector<2x128xf32>
    %30 = arith.maximumf %29, %20 : vector<2x128xf32>
    %31 = arith.subf %20, %30 : vector<2x128xf32>
    %32 = math.exp %31 : vector<2x128xf32>
    %33 = vector.shape_cast %30 : vector<2x128xf32> to vector<2x1x128xf32>
    %34 = vector.broadcast %33 : vector<2x1x128xf32> to vector<2x8x128xf32>
    %35 = arith.subf %26, %34 : vector<2x8x128xf32>
    %36 = math.exp %35 : vector<2x8x128xf32>
    %cst_23 = arith.constant dense<0.000000e+00> : vector<2x128xf32>
    %37 = vector.multi_reduction <add>, %36, %cst_23 [1] : vector<2x8x128xf32> to vector<2x128xf32>
    %38 = arith.addf %32, %37 : vector<2x128xf32>
    %cst_24 = arith.constant 1.000000e+00 : f32
    %39 = vector.broadcast %cst_24 : f32 to vector<2x128xf32>
    %40 = arith.divf %39, %38 : vector<2x128xf32>
    %41 = arith.mulf %32, %40 : vector<2x128xf32>
    %42 = vector.shape_cast %40 : vector<2x128xf32> to vector<2x1x128xf32>
    %43 = vector.broadcast %42 : vector<2x1x128xf32> to vector<2x8x128xf32>
    %44 = arith.mulf %36, %43 : vector<2x8x128xf32>
    %45 = arith.mulf %41, %21 : vector<2x128xf32>
    %46 = arith.mulf %44, %28 : vector<2x8x128xf32>
    %cst_25 = arith.constant dense<0.000000e+00> : vector<2x128xf32>
    %47 = vector.multi_reduction <add>, %46, %cst_25 [1] : vector<2x8x128xf32> to vector<2x128xf32>
    %48 = arith.addf %45, %47 : vector<2x128xf32>
    %c0_26 = arith.constant 0 : index
    %c0_27 = arith.constant 0 : index
    %49 = vector.load %arg8[%c0_26, %c0_27] : memref<1x128xf32, #tpu.memory_space<vmem>>, vector<1x128xf32>
    %50 = vector.broadcast %49 : vector<1x128xf32> to vector<2x128xf32>
    %51 = arith.addf %48, %50 : vector<2x128xf32>
    %c0_28 = arith.constant 0 : index
    %c0_29 = arith.constant 0 : index
    %52 = vector.load %arg9[%c0_28, %c0_29] : memref<2x128xf32, #tpu.memory_space<vmem>>, vector<2x128xf32>
    tpu.vector_store %arg9[%c0_28, %c0_29], %51 {strides = array<i32>} : memref<2x128xf32, #tpu.memory_space<vmem>>, vector<2x128xf32>,
    %c0_30 = arith.constant 0 : index
    %c0_31 = arith.constant 0 : index
    %53 = vector.load %arg10[%c0_30, %c0_31] : memref<2x128xf32, #tpu.memory_space<vmem>>, vector<2x128xf32>
    tpu.vector_store %arg10[%c0_30, %c0_31], %41 {strides = array<i32>} : memref<2x128xf32, #tpu.memory_space<vmem>>, vector<2x128xf32>,
    %c0_32 = arith.constant 0 : index
    %c0_33 = arith.constant 0 : index
    %c0_34 = arith.constant 0 : index
    %54 = vector.load %arg11[%c0_32, %c0_33, %c0_34] : memref<2x8x128xf32, #tpu.memory_space<vmem>>, vector<2x8x128xf32>
    tpu.vector_store %arg11[%c0_32, %c0_33, %c0_34], %44 {strides = array<i32>} : memref<2x8x128xf32, #tpu.memory_space<vmem>>, vector<2x8x128xf32>,
    return
  }
}

</mosaic_0001>

<bundles_post_ra>
// kernel: tpu_custom_call.1
= control target key start
LH: loop header
LB: loop body
LE: loop exit
PB: predicated region body
PF: predicated region fallthrough
CT: control target
= control target key end

     0   :  { %17 = vsyncpa [#allocation3], 0  ;;  %s5135_s0 = inlined_call_operand.hbm [shape: f32[2,4], index: 0, kind: input, shape index: {}]   ;;  %s5136_s1 = inlined_call_operand.hbm [shape: f32[16,384], index: 1, kind: input, shape index: {}]   ;;  %s5137_s2 = inlined_call_operand.hbm [shape: f32[4,2048], index: 2, kind: input, shape index: {}]   ;;  %s5138_s3 = inlined_call_operand.hbm [shape: f32[1,2048], index: 3, kind: input, shape index: {}]   ;;  %s5139_s4 = inlined_call_operand.hbm [shape: bf16[2048,384], index: 4, kind: input, shape index: {}]   ;;  %s5140_s5 = inlined_call_operand.hbm [shape: f32[1,384], index: 5, kind: input, shape index: {}]   ;;  %s5141_s6 = inlined_call_operand.hbm [shape: f32[384,256], index: 6, kind: input, shape index: {}]   ;;  %s5142_s7 = inlined_call_operand.hbm [shape: f32[1,128], index: 7, kind: input, shape index: {}]   ;;  %s5143_s8 = inlined_call_operand.hbm [shape: f32[1,128], index: 8, kind: input, shape index: {}]   ;;  %s5144_s9 = inlined_call_operand.hbm [shape: f32[2,128], index: 9, kind: output, shape index: {0}]   ;;  %s5145_s10 = inlined_call_operand.hbm [shape: f32[2,128], index: 10, kind: output, shape index: {1}]   ;;  %s5146_s11 = inlined_call_operand.hbm [shape: f32[2,8,128], index: 11, kind: output, shape index: {2}]  }
   0x1   :  { %18 = vsyncpa [#allocation6], 0 }
   0x2   :  { %19 = vsyncpa [#allocation9], 0 }
   0x3   :  { %20 = vsyncpa [#allocation12], 0 }
   0x4   :  { %21 = vsyncpa [#allocation15], 0 }
   0x5   :  { %22 = vsyncpa [#allocation4], 0 }
   0x6   :  { %23 = vsyncpa [#allocation19], 0  ;;  %s4468_s17 = smov [#allocation5]  }
   0x7   :  { %s39_s18 = sshll.u32 %s4468_s17, 4  ;;  %s40_s18 = int_to_ptr.vmem [resolvable:$true] %s39_s18 }
   0x8   :  { %s4222_s19 = scalar_lea.vmem %s40_s18, 768  ;;  %p4227_p1 = scmp.lt.s32.totalorder %s40_s18, %s40_s18 }
   0x9   :  { %p4223_p0 = scmp.ne.s32.totalorder %s40_s18, %s4222_s19  ;;  %p4228_p2 = scmp.lt.s32.totalorder %s4222_s19, %s4222_s19 }
   0xb   :  { %p4229_p3 = por %p4228_p2, %p4227_p1 }
   0xd   :  { %p4230_p4 = pnand %p4229_p3, %p4223_p0 }
   0xf   :  { %4233 = shalt.err (!%p4230_p4)
}
  0x10   :  { %s4469_s20 = smov 384   ;;  %s4470_s21 = smov 24  }
  0x11   :  { %45 = dma.hbm_to_vmem [thread:$0]  %s5136_s1, 768, %s40_s18, [#allocation6], %s4469_s20, %s4469_s20, %s4470_s21  }
  0x12   :  { %s4471_s24 = smov [#allocation8]   ;;  %s4472_s26 = smov [#allocation11]  }
  0x13   :  { %s62_s25 = sshll.u32 %s4471_s24, 4  ;;  %s84_s27 = sshll.u32 %s4472_s26, 4  ;;  %s63_s25 = int_to_ptr.vmem [resolvable:$true] %s62_s25  ;;  %s85_s27 = int_to_ptr.vmem [resolvable:$true] %s84_s27 }
  0x14   :  { %s4242_s28 = scalar_lea.vmem %s63_s25, 256  ;;  %p4247_p6 = scmp.lt.s32.totalorder %s63_s25, %s63_s25 }
  0x15   :  { %p4243_p5 = scmp.ne.s32.totalorder %s63_s25, %s4242_s28  ;;  %p4248_p7 = scmp.lt.s32.totalorder %s4242_s28, %s4242_s28 }
  0x17   :  { %p4249_p8 = por %p4248_p7, %p4247_p6 }
  0x19   :  { %p4250_p9 = pnand %p4249_p8, %p4243_p5 }
  0x1b   :  { %4253 = shalt.err (!%p4250_p9)
}
  0x1c   :  { %65 = dma.hbm_to_vmem [thread:$0]  %s5138_s3, 256, %s63_s25, [#allocation9]  }
  0x1d   :  { %s4262_s12 = scalar_lea.vmem %s85_s27, 48  ;;  %s4266_s1 = scalar_lea.vmem %s85_s27, 64 }
  0x1e   :  { %p4263_p10 = scmp.ne.s32.totalorder %s85_s27, %s4262_s12  ;;  %p4267_p11 = scmp.lt.s32.totalorder %s85_s27, %s85_s27 }
  0x1f   :  { %p4268_p12 = scmp.lt.s32.totalorder %s4266_s1, %s4262_s12 }
  0x21   :  { %p4269_p13 = por %p4268_p12, %p4267_p11 }
  0x23   :  { %p4270_p0 = pnand %p4269_p13, %p4263_p10 }
  0x25   :  { %4273 = shalt.err (!%p4270_p0)
}
  0x26   :  { %87 = dma.hbm_to_vmem [thread:$0]  %s5140_s5, 48, %s85_s27, [#allocation12]  }
  0x27   :  { %s4473_s15 = smov [#allocation14]   ;;  %s4474_s17 = smov [#allocation2]  }
  0x28   :  { %s106_s16 = sshll.u32 %s4473_s15, 4  ;;  %s30_s18 = sshll.u32 %s4474_s17, 4  ;;  %s107_s16 = int_to_ptr.vmem [resolvable:$true] %s106_s16  ;;  %s31_s18 = int_to_ptr.vmem [resolvable:$true] %s30_s18 }
  0x29   :  { %s4282_s19 = scalar_lea.vmem %s107_s16, 16  ;;  %s4286_s3 = scalar_lea.vmem %s107_s16, 32 }
  0x2a   :  { %p4283_p1 = scmp.ne.s32.totalorder %s107_s16, %s4282_s19  ;;  %p4287_p2 = scmp.lt.s32.totalorder %s107_s16, %s107_s16 }
  0x2b   :  { %p4288_p3 = scmp.lt.s32.totalorder %s4286_s3, %s4282_s19 }
  0x2d   :  { %p4289_p4 = por %p4288_p3, %p4287_p2 }
  0x2f   :  { %p4290_p5 = pnand %p4289_p4, %p4283_p1 }
  0x31   :  { %4293 = shalt.err (!%p4290_p5)
}
  0x32   :  { %109 = dma.hbm_to_vmem [thread:$0]  %s5142_s7, 16, %s107_s16, [#allocation15]  }
  0x33   :  { %s4302_s22 = scalar_lea.vmem %s31_s18, 32  ;;  %p4307_p7 = scmp.lt.s32.totalorder %s31_s18, %s31_s18 }
  0x34   :  { %p4303_p6 = scmp.ne.s32.totalorder %s31_s18, %s4302_s22  ;;  %p4308_p8 = scmp.lt.s32.totalorder %s4302_s22, %s4302_s22 }
  0x36   :  { %p4309_p9 = por %p4308_p8, %p4307_p7 }
  0x38   :  { %p4310_p10 = pnand %p4309_p9, %p4303_p6 }
  0x3a   :  { %4313 = shalt.err (!%p4310_p10)
}
  0x3b   :  { %33 = dma.hbm_to_vmem [thread:$0]  %s5135_s0, 32, %s31_s18, [#allocation3]  }
  0x3c   :  { %s4475_s24 = smov [#allocation7]   ;;  %s4476_s26 = smov [#allocation10]  }
  0x3d   :  { %s52_s25 = sshll.u32 %s4475_s24, 4  ;;  %s71_s27 = sshll.u32 %s4476_s26, 4  ;;  %s53_s25 = int_to_ptr.vmem [resolvable:$true] %s52_s25  ;;  %s72_s27 = int_to_ptr.vmem [resolvable:$true] %s71_s27 }
  0x3e   :  { %s4322_s28 = scalar_lea.vmem %s53_s25, 1024  ;;  %p4327_p12 = scmp.lt.s32.totalorder %s53_s25, %s53_s25 }
  0x3f   :  { %p4323_p11 = scmp.ne.s32.totalorder %s53_s25, %s4322_s28  ;;  %p4328_p13 = scmp.lt.s32.totalorder %s4322_s28, %s4322_s28 }
  0x41   :  { %p4329_p0 = por %p4328_p13, %p4327_p12 }
  0x43   :  { %p4330_p1 = pnand %p4329_p0, %p4323_p11 }
  0x45   :  { %4333 = shalt.err (!%p4330_p1)
}
  0x46   :  { %55 = dma.hbm_to_vmem [thread:$0]  %s5137_s2, 1024, %s53_s25, [#allocation6]  }
  0x47   :  { %s4342_s30 = scalar_lea.vmem %s72_s27, 49152  ;;  %p4347_p3 = scmp.lt.s32.totalorder %s72_s27, %s72_s27 }
  0x48   :  { %p4343_p2 = scmp.ne.s32.totalorder %s72_s27, %s4342_s30  ;;  %p4348_p4 = scmp.lt.s32.totalorder %s4342_s30, %s4342_s30 }
  0x4a   :  { %p4349_p5 = por %p4348_p4, %p4347_p3 }
  0x4c   :  { %p4350_p6 = pnand %p4349_p5, %p4343_p2 }
  0x4e   :  { %4353 = shalt.err (!%p4350_p6)
}
  0x4f   :  { %s4477_s0 = smov 192   ;;  %s4478_s12 = smov 12  }
  0x50   :  { %77 = dma.hbm_to_vmem [thread:$0]  %s5139_s4, 49152, %s72_s27, [#allocation9], %s4477_s0, %s4477_s0, %s4478_s12  }
  0x51   :  { %s4479_s14 = smov [#allocation13]  }
  0x52   :  { %s93_s15 = sshll.u32 %s4479_s14, 4  ;;  %s94_s15 = int_to_ptr.vmem [resolvable:$true] %s93_s15 }
  0x53   :  { %s4362_s16 = scalar_lea.vmem %s94_s15, 12288  ;;  %p4367_p8 = scmp.lt.s32.totalorder %s94_s15, %s94_s15 }
  0x54   :  { %p4363_p7 = scmp.ne.s32.totalorder %s94_s15, %s4362_s16  ;;  %p4368_p9 = scmp.lt.s32.totalorder %s4362_s16, %s4362_s16 }
  0x56   :  { %p4369_p10 = por %p4368_p9, %p4367_p8 }
  0x58   :  { %p4370_p11 = pnand %p4369_p10, %p4363_p7 }
  0x5a   :  { %4373 = shalt.err (!%p4370_p11)
}
  0x5b   :  { %s4480_s2 = smov 256   ;;  %s4481_s17 = smov 16  }
  0x5c   :  { %99 = dma.hbm_to_vmem [thread:$0]  %s5141_s6, 12288, %s94_s15, [#allocation12], %s4480_s2, %s4480_s2, %s4481_s17  }
  0x5d   :  { %s4482_s3 = smov [#allocation16]  }
  0x5e   :  { %s116_s20 = sshll.u32 %s4482_s3, 4  ;;  %s117_s20 = int_to_ptr.vmem [resolvable:$true] %s116_s20 }
  0x5f   :  { %s4382_s4 = scalar_lea.vmem %s117_s20, 16  ;;  %s4386_s21 = scalar_lea.vmem %s117_s20, 32 }
  0x60   :  { %p4383_p12 = scmp.ne.s32.totalorder %s117_s20, %s4382_s4  ;;  %p4387_p13 = scmp.lt.s32.totalorder %s117_s20, %s117_s20 }
  0x61   :  { %p4388_p0 = scmp.lt.s32.totalorder %s4386_s21, %s4382_s4 }
  0x63   :  { %p4389_p1 = por %p4388_p0, %p4387_p13 }
  0x65   :  { %p4390_p2 = pnand %p4389_p1, %p4383_p12 }
  0x67   :  { %4393 = shalt.err (!%p4390_p2)
}
  0x68   :  { %119 = dma.hbm_to_vmem [thread:$0]  %s5143_s8, 16, %s117_s20, [#allocation15]  }
  0x69   :  { %4454 = dma.done.wait [#allocation3], 32  }
  0x6a   :  { %4455 = vsyncadd [#allocation3], 4294967264 }
  0x6b   :  { %4456 = dma.done.wait [#allocation6], 1792  }
  0x6c   :  { %4457 = vsyncadd [#allocation6], 4294965504 }
  0x6d   :  { %4458 = dma.done.wait [#allocation9], 49408  }
  0x6e   :  { %4459 = vsyncadd [#allocation9], 4294917888 }
  0x6f   :  { %4460 = dma.done.wait [#allocation12], 12336  }
  0x70   :  { %4461 = vsyncadd [#allocation12], 4294954960 }
  0x71   :  { %4462 = dma.done.wait [#allocation15], 32  }
  0x72   :  { %4463 = vsyncadd [#allocation15], 4294967264  ;;  %v5147_v0 = vmov 0.0   ;;  %v148_v1 = vld [vmem:[#allocation7] sm:$0xff]  ;;  %vm260_vm0 = vcmask 1043456   ;;  %v149_v2 = vld [vmem:[#allocation7 + $0x8] sm:$0xff] }
  0x73   :  { %357 = vmatprep.mubr.f32.mxu0 %v5147_v0  ;;  %428 = vmatprep.mubr.f32.mxu1 %v5147_v0  ;;  %v248_v3 = vcombine.high %v148_v1, %v148_v1  ;;  %v249_v4 = vcombine.high %v149_v2, %v149_v2  ;;  %v150_v5 = vld [vmem:[#allocation7 + $0x10] sm:$0xff]  ;;  %v151_v6 = vld [vmem:[#allocation7 + $0x18] sm:$0xff]  ;;  %v147_v7 = vld [vmem:[#allocation2] sm:$0x3]  ;;  %vm256_vm1 = vcmask 31744   ;;  %vm3715_vm2 = vcmask 1041409  }
  0x74   :  { %v250_v8 = vcombine.high %v150_v5, %v150_v5  ;;  %v251_v9 = vcombine.high %v151_v6, %v151_v6  ;;  %v152_v10 = vld [vmem:[#allocation7 + $0x20] sm:$0xff]  ;;  %v153_v11 = vld [vmem:[#allocation7 + $0x28] sm:$0xff]  ;;  %v154_v14 = vld [vmem:[#allocation7 + $0x30] sm:$0xff]  ;;  %s4485_s6 = smov [#allocation18]  }
  0x75   :  { %3870 = vmatprep.subr.msk.mxu0 %vm260_vm0, %v248_v3  ;;  %3873 = vmatprep.subr.msk.mxu1 %vm260_vm0, %v249_v4  ;;  %v252_v12 = vcombine.high %v152_v10, %v152_v10  ;;  %v253_v13 = vcombine.high %v153_v11, %v153_v11  ;;  %v155_v15 = vld [vmem:[#allocation7 + $0x38] sm:$0xff]  ;;  %v254_v16 = vcombine.high %v154_v14, %v154_v14  ;;  %v891_v17 = vld [vmem:[#allocation10 + $0xb4] sm:$0xff]  ;;  %v887_v26 = vld [vmem:[#allocation10 + $0x9c] sm:$0xff]  ;;  %s3838_s8 = sshll.u32 %s4485_s6, 4  ;;  %s3839_s8 = int_to_ptr.vmem [resolvable:$true] %s3838_s8 }
  0x76   :  { %3871 = vmatpush1.msk.msra.mxu0 %vm260_vm0, %v148_v1  ;;  %3874 = vmatpush1.msk.msra.mxu1 %vm260_vm0, %v149_v2  ;;  %v255_v18 = vcombine.high %v155_v15, %v155_v15  ;;  %v955_v19 = vld [vmem:[#allocation10 + $0x234] sm:$0xff]  ;;  %v1419_v20 = vunpack.c.h.bf16 %v891_v17  ;;  %v889_v21 = vld [vmem:[#allocation10 + $0xa8] sm:$0xff]  ;;  %v1418_v24 = vunpack.c.l.bf16 %v891_v17  ;;  %v951_v27 = vld [vmem:[#allocation10 + $0x21c] sm:$0xff]  ;;  %v1413_v34 = vunpack.c.h.bf16 %v887_v26  ;;  %s4394_s23 = scalar_lea.vmem %s3839_s8, 32  ;;  %p4399_p4 = scmp.lt.s32.totalorder %s3839_s8, %s3839_s8 }
  0x77   :  { %3872 = vmatmul.mubr.msk.f32.vlgmr.msra.gmra.mxu0 %vm256_vm1, %v147_v7  ;;  %3875 = vmatmul.mubr.msk.f32.vlgmr.msra.gmra.mxu1 %vm256_vm1, %v147_v7  ;;  %v953_v22 = vld [vmem:[#allocation10 + $0x228] sm:$0xff]  ;;  %v1515_v23 = vunpack.c.h.bf16 %v955_v19  ;;  %v1514_v25 = vunpack.c.l.bf16 %v955_v19  ;;  %v1416_v28 = vunpack.c.h.bf16 %v889_v21  ;;  %v1415_v30 = vunpack.c.l.bf16 %v889_v21  ;;  %v885_v32 = vld [vmem:[#allocation10 + $0x90] sm:$0xff]  ;;  %v881_v44 = vld [vmem:[#allocation10 + $0x78] sm:$0xff]  ;;  %p4395_p3 = scmp.ne.s32.totalorder %s3839_s8, %s4394_s23  ;;  %p4400_p5 = scmp.lt.s32.totalorder %s4394_s23, %s4394_s23 }
  0x78   :  { %3876 = vmatprep.subr.msk.mxu0 %vm260_vm0, %v250_v8  ;;  %499 = vmatprep.mubr.f32.mxu0 %v5147_v0  ;;  %v1512_v29 = vunpack.c.h.bf16 %v953_v22  ;;  %v1511_v31 = vunpack.c.l.bf16 %v953_v22  ;;  %v949_v33 = vld [vmem:[#allocation10 + $0x210] sm:$0xff]  ;;  %v1509_v35 = vunpack.c.h.bf16 %v951_v27  ;;  %v1412_v36 = vunpack.c.l.bf16 %v887_v26  ;;  %v883_v38 = vld [vmem:[#allocation10 + $0x84] sm:$0xff]  ;;  %v945_v45 = vld [vmem:[#allocation10 + $0x1f8] sm:$0xff] }
  0x79   :  { %3877 = vmatpush1.msk.msra.mxu0 %vm260_vm0, %v150_v5  ;;  %3879 = vmatprep.subr.msk.mxu1 %vm260_vm0, %v251_v9  ;;  %v1508_v37 = vunpack.c.l.bf16 %v951_v27  ;;  %v947_v39 = vld [vmem:[#allocation10 + $0x204] sm:$0xff]  ;;  %v1410_v40 = vunpack.c.h.bf16 %v885_v32  ;;  %v1506_v41 = vunpack.c.h.bf16 %v949_v33  ;;  %v1409_v42 = vunpack.c.l.bf16 %v885_v32  ;;  %v879_v50 = vld [vmem:[#allocation10 + $0x6c] sm:$0xff]  ;;  %v875_v62 = vld [vmem:[#allocation10 + $0x54] sm:$0xff]  ;;  %p4401_p6 = por %p4400_p5, %p4399_p4 }
  0x7a   :  { %3880 = vmatpush1.msk.msra.mxu1 %vm260_vm0, %v151_v6  ;;  %570 = vmatprep.mubr.f32.mxu1 %v5147_v0  ;;  %v1505_v43 = vunpack.c.l.bf16 %v949_v33  ;;  %v1407_v46 = vunpack.c.h.bf16 %v883_v38  ;;  %v1503_v47 = vunpack.c.h.bf16 %v947_v39  ;;  %v1406_v48 = vunpack.c.l.bf16 %v883_v38  ;;  %v943_v51 = vld [vmem:[#allocation10 + $0x1ec] sm:$0xff]  ;;  %v877_v56 = vld [vmem:[#allocation10 + $0x60] sm:$0xff]  ;;  %v939_v63 = vld [vmem:[#allocation10 + $0x1d4] sm:$0xff] }
  0x7b   :  { %3878 = vmatmul.mubr.msk.f32.vlgmr.msra.gmra.mxu0 %vm256_vm1, %v147_v7  ;;  %3881 = vmatmul.mubr.msk.f32.vlgmr.msra.gmra.mxu1 %vm256_vm1, %v147_v7  ;;  %v1502_v49 = vunpack.c.l.bf16 %v947_v39  ;;  %v1404_v52 = vunpack.c.h.bf16 %v881_v44  ;;  %v1500_v53 = vunpack.c.h.bf16 %v945_v45  ;;  %v1403_v54 = vunpack.c.l.bf16 %v881_v44  ;;  %v941_v57 = vld [vmem:[#allocation10 + $0x1e0] sm:$0xff]  ;;  %v873_v5 = vld [vmem:[#allocation10 + $0x48] sm:$0xff]  ;;  %v869_v17 = vld [vmem:[#allocation10 + $0x30] sm:$0xff]  ;;  %p4402_p7 = pnand %p4401_p6, %p4395_p3 }
  0x7c   :  { %3882 = vmatprep.subr.msk.mxu0 %vm260_vm0, %v252_v12  ;;  %641 = vmatprep.mubr.f32.mxu0 %v5147_v0  ;;  %v1499_v55 = vunpack.c.l.bf16 %v945_v45  ;;  %v1401_v58 = vunpack.c.h.bf16 %v879_v50  ;;  %v1497_v59 = vunpack.c.h.bf16 %v943_v51  ;;  %v1400_v60 = vunpack.c.l.bf16 %v879_v50  ;;  %v937_v6 = vld [vmem:[#allocation10 + $0x1c8] sm:$0xff]  ;;  %v935_v12 = vld [vmem:[#allocation10 + $0x1bc] sm:$0xff] }
  0x7d   :  { %3883 = vmatpush1.msk.msra.mxu0 %vm260_vm0, %v152_v10  ;;  %3885 = vmatprep.subr.msk.mxu1 %vm260_vm0, %v253_v13  ;;  %v1496_v61 = vunpack.c.l.bf16 %v943_v51  ;;  %v1398_v1 = vunpack.c.h.bf16 %v877_v56  ;;  %v1494_v2 = vunpack.c.h.bf16 %v941_v57  ;;  %v1397_v3 = vunpack.c.l.bf16 %v877_v56 }
  0x7e   :  { %3886 = vmatpush1.msk.msra.mxu1 %vm260_vm0, %v153_v11  ;;  %712 = vmatprep.mubr.f32.mxu1 %v5147_v0  ;;  %v1493_v4 = vunpack.c.l.bf16 %v941_v57  ;;  %v1491_v8 = vunpack.c.h.bf16 %v939_v63  ;;  %v1394_v9 = vunpack.c.l.bf16 %v875_v62  ;;  %v1490_v10 = vunpack.c.l.bf16 %v939_v63  ;;  %v871_v11 = vld [vmem:[#allocation10 + $0x3c] sm:$0xff] }
  0x7f   :  { %3884 = vmatmul.mubr.msk.f32.vlgmr.msra.gmra.mxu0 %vm256_vm1, %v147_v7  ;;  %3887 = vmatmul.mubr.msk.f32.vlgmr.msra.gmra.mxu1 %vm256_vm1, %v147_v7  ;;  %v1392_v13 = vunpack.c.h.bf16 %v873_v5  ;;  %v1389_v19 = vunpack.c.h.bf16 %v871_v11  ;;  %v1388_v21 = vunpack.c.l.bf16 %v871_v11  ;;  %v1484_v22 = vunpack.c.l.bf16 %v935_v12 }
  0x80   :  { %3888 = vmatprep.subr.msk.mxu0 %vm260_vm0, %v254_v16  ;;  %783 = vmatprep.mubr.f32.mxu0 %v5147_v0  ;;  %v1487_v16 = vunpack.c.l.bf16 %v937_v6  ;;  %v1385_v27 = vunpack.c.l.bf16 %v869_v17 }
  0x81   :  { %3889 = vmatpush1.msk.msra.mxu0 %vm260_vm0, %v154_v14  ;;  %3891 = vmatprep.subr.msk.mxu1 %vm260_vm0, %v255_v18  ;;  %v1488_v14 = vunpack.c.h.bf16 %v937_v6  ;;  %v933_v18 = vld [vmem:[#allocation10 + $0x1b0] sm:$0xff] }
  0x82   :  { %3892 = vmatpush1.msk.msra.mxu1 %vm260_vm0, %v155_v15  ;;  %854 = vmatprep.mubr.f32.mxu1 %v5147_v0  ;;  %v1391_v15 = vunpack.c.l.bf16 %v873_v5  ;;  %v1482_v26 = vunpack.c.h.bf16 %v933_v18 }
  0x83   :  { %3890 = vmatmul.mubr.msk.f32.vlgmr.msra.gmra.mxu0 %vm256_vm1, %v147_v7  ;;  %2158 = vmatprep.subr.mxu0 %v1419_v20  ;;  %v1485_v20 = vunpack.c.h.bf16 %v935_v12 }
  0x84   :  { %2229 = vmatprep.subr.mxu1 %v1515_v23  ;;  %3893 = vmatmul.mubr.msk.f32.vlgmr.msra.gmra.mxu1 %vm256_vm1, %v147_v7  ;;  %v1395_v7 = vunpack.c.h.bf16 %v875_v62  ;;  %v867_v23 = vld [vmem:[#allocation10 + $0x24] sm:$0xff] }
  0x85   :  { %2159 = vmatpush1.msra.mxu0 %v1418_v24  ;;  %2230 = vmatpush1.msra.mxu1 %v1514_v25  ;;  %v931_v24 = vld [vmem:[#allocation10 + $0x1a4] sm:$0xff]  ;;  %v1386_v25 = vunpack.c.h.bf16 %v869_v17  ;;  %v1382_v33 = vunpack.c.l.bf16 %v867_v23 }
  0x86   :  { %2160 = vmatprep.subr.mxu0 %v1416_v28  ;;  %2231 = vmatprep.subr.mxu1 %v1512_v29  ;;  %v1481_v28 = vunpack.c.l.bf16 %v933_v18  ;;  %v865_v29 = vld [vmem:[#allocation10 + $0x18] sm:$0xff]  ;;  %v1479_v32 = vunpack.c.h.bf16 %v931_v24 }
  0x87   :  { %2161 = vmatpush1.msra.mxu0 %v1415_v30  ;;  %2232 = vmatpush1.msra.mxu1 %v1511_v31  ;;  %v929_v30 = vld [vmem:[#allocation10 + $0x198] sm:$0xff]  ;;  %v1383_v31 = vunpack.c.h.bf16 %v867_v23  ;;  %v1379_v39 = vunpack.c.l.bf16 %v865_v29 }
  0x88   :  { %2162 = vmatprep.subr.mxu0 %v1413_v34  ;;  %2233 = vmatprep.subr.mxu1 %v1509_v35  ;;  %v1478_v34 = vunpack.c.l.bf16 %v931_v24  ;;  %v863_v35 = vld [vmem:[#allocation10 + $0xc] sm:$0xff]  ;;  %v1476_v38 = vunpack.c.h.bf16 %v929_v30 }
  0x89   :  { %2163 = vmatpush1.msra.mxu0 %v1412_v36  ;;  %2234 = vmatpush1.msra.mxu1 %v1508_v37  ;;  %v927_v36 = vld [vmem:[#allocation10 + $0x18c] sm:$0xff]  ;;  %v1380_v37 = vunpack.c.h.bf16 %v865_v29  ;;  %v1376_v45 = vunpack.c.l.bf16 %v863_v35 }
  0x8a   :  { %2164 = vmatprep.subr.mxu0 %v1410_v40  ;;  %2235 = vmatprep.subr.mxu1 %v1506_v41  ;;  %v1475_v40 = vunpack.c.l.bf16 %v929_v30  ;;  %v861_v41 = vld [vmem:[#allocation10] sm:$0xff]  ;;  %v1473_v44 = vunpack.c.h.bf16 %v927_v36 }
  0x8b   :  { %2165 = vmatpush1.msra.mxu0 %v1409_v42  ;;  %2236 = vmatpush1.msra.mxu1 %v1505_v43  ;;  %v925_v42 = vld [vmem:[#allocation10 + $0x180] sm:$0xff]  ;;  %v1377_v43 = vunpack.c.h.bf16 %v863_v35  ;;  %v1373_v51 = vunpack.c.l.bf16 %v861_v41 }
  0x8c   :  { %2166 = vmatprep.subr.mxu0 %v1407_v46  ;;  %2237 = vmatprep.subr.mxu1 %v1503_v47  ;;  %v1472_v46 = vunpack.c.l.bf16 %v927_v36  ;;  %v923_v47 = vld [vmem:[#allocation10 + $0x174] sm:$0xff]  ;;  %v1470_v50 = vunpack.c.h.bf16 %v925_v42 }
  0x8d   :  { %2167 = vmatpush1.msra.mxu0 %v1406_v48  ;;  %2238 = vmatpush1.msra.mxu1 %v1502_v49  ;;  %v987_v48 = vld [vmem:[#allocation10 + $0x2f4] sm:$0xff]  ;;  %v1374_v49 = vunpack.c.h.bf16 %v861_v41  ;;  %v1466_v57 = vunpack.c.l.bf16 %v923_v47 }
  0x8e   :  { %2168 = vmatprep.subr.mxu0 %v1404_v52  ;;  %2239 = vmatprep.subr.mxu1 %v1500_v53  ;;  %v1469_v52 = vunpack.c.l.bf16 %v925_v42  ;;  %v921_v53 = vld [vmem:[#allocation10 + $0x168] sm:$0xff]  ;;  %v1563_v56 = vunpack.c.h.bf16 %v987_v48 }
  0x8f   :  { %2169 = vmatpush1.msra.mxu0 %v1403_v54  ;;  %2240 = vmatpush1.msra.mxu1 %v1499_v55  ;;  %v985_v54 = vld [vmem:[#allocation10 + $0x2e8] sm:$0xff]  ;;  %v1467_v55 = vunpack.c.h.bf16 %v923_v47  ;;  %v1463_v63 = vunpack.c.l.bf16 %v921_v53 }
  0x90   :  { %2170 = vmatprep.subr.mxu0 %v1401_v58  ;;  %2241 = vmatprep.subr.mxu1 %v1497_v59  ;;  %v1562_v58 = vunpack.c.l.bf16 %v987_v48  ;;  %v919_v59 = vld [vmem:[#allocation10 + $0x15c] sm:$0xff]  ;;  %v1560_v62 = vunpack.c.h.bf16 %v985_v54 }
  0x91   :  { %2171 = vmatpush1.msra.mxu0 %v1400_v60  ;;  %2242 = vmatpush1.msra.mxu1 %v1496_v61  ;;  %v983_v60 = vld [vmem:[#allocation10 + $0x2dc] sm:$0xff]  ;;  %v1464_v61 = vunpack.c.h.bf16 %v921_v53  ;;  %v1460_v6 = vunpack.c.l.bf16 %v919_v59 }
  0x92   :  { %2172 = vmatprep.subr.mxu0 %v1398_v1  ;;  %2243 = vmatprep.subr.mxu1 %v1494_v2  ;;  %v1559_v1 = vunpack.c.l.bf16 %v985_v54  ;;  %v917_v2 = vld [vmem:[#allocation10 + $0x150] sm:$0xff]  ;;  %v1557_v5 = vunpack.c.h.bf16 %v983_v60 }
  0x93   :  { %2173 = vmatpush1.msra.mxu0 %v1397_v3  ;;  %2244 = vmatpush1.msra.mxu1 %v1493_v4  ;;  %v981_v3 = vld [vmem:[#allocation10 + $0x2d0] sm:$0xff]  ;;  %v1461_v4 = vunpack.c.h.bf16 %v919_v59  ;;  %v1457_v12 = vunpack.c.l.bf16 %v917_v2 }
  0x94   :  { %2174 = vmatprep.subr.mxu0 %v1395_v7  ;;  %2245 = vmatprep.subr.mxu1 %v1491_v8  ;;  %v1556_v7 = vunpack.c.l.bf16 %v983_v60  ;;  %v915_v8 = vld [vmem:[#allocation10 + $0x144] sm:$0xff]  ;;  %v1554_v11 = vunpack.c.h.bf16 %v981_v3 }
  0x95   :  { %2175 = vmatpush1.msra.mxu0 %v1394_v9  ;;  %2246 = vmatpush1.msra.mxu1 %v1490_v10  ;;  %v979_v9 = vld [vmem:[#allocation10 + $0x2c4] sm:$0xff]  ;;  %v1458_v10 = vunpack.c.h.bf16 %v917_v2  ;;  %v1454_v18 = vunpack.c.l.bf16 %v915_v8 }
  0x96   :  { %2176 = vmatprep.subr.mxu0 %v1392_v13  ;;  %2247 = vmatprep.subr.mxu1 %v1488_v14  ;;  %v1553_v13 = vunpack.c.l.bf16 %v981_v3  ;;  %v913_v14 = vld [vmem:[#allocation10 + $0x138] sm:$0xff]  ;;  %v1551_v17 = vunpack.c.h.bf16 %v979_v9 }
  0x97   :  { %2177 = vmatpush1.msra.mxu0 %v1391_v15  ;;  %2248 = vmatpush1.msra.mxu1 %v1487_v16  ;;  %v977_v15 = vld [vmem:[#allocation10 + $0x2b8] sm:$0xff]  ;;  %v1455_v16 = vunpack.c.h.bf16 %v915_v8  ;;  %v1451_v24 = vunpack.c.l.bf16 %v913_v14 }
  0x98   :  { %2178 = vmatprep.subr.mxu0 %v1389_v19  ;;  %2249 = vmatprep.subr.mxu1 %v1485_v20  ;;  %v1550_v19 = vunpack.c.l.bf16 %v979_v9  ;;  %v911_v20 = vld [vmem:[#allocation10 + $0x12c] sm:$0xff]  ;;  %v1548_v23 = vunpack.c.h.bf16 %v977_v15 }
  0x99   :  { %2179 = vmatpush1.msra.mxu0 %v1388_v21  ;;  %2250 = vmatpush1.msra.mxu1 %v1484_v22  ;;  %v975_v21 = vld [vmem:[#allocation10 + $0x2ac] sm:$0xff]  ;;  %v1452_v22 = vunpack.c.h.bf16 %v913_v14  ;;  %v1448_v30 = vunpack.c.l.bf16 %v911_v20 }
  0x9a   :  { %2180 = vmatprep.subr.mxu0 %v1386_v25  ;;  %2251 = vmatprep.subr.mxu1 %v1482_v26  ;;  %v1547_v25 = vunpack.c.l.bf16 %v977_v15  ;;  %v909_v26 = vld [vmem:[#allocation10 + $0x120] sm:$0xff]  ;;  %v1545_v29 = vunpack.c.h.bf16 %v975_v21 }
  0x9b   :  { %2181 = vmatpush1.msra.mxu0 %v1385_v27  ;;  %2252 = vmatpush1.msra.mxu1 %v1481_v28  ;;  %v973_v27 = vld [vmem:[#allocation10 + $0x2a0] sm:$0xff]  ;;  %v1449_v28 = vunpack.c.h.bf16 %v911_v20  ;;  %v1445_v36 = vunpack.c.l.bf16 %v909_v26 }
  0x9c   :  { %2182 = vmatprep.subr.mxu0 %v1383_v31  ;;  %2253 = vmatprep.subr.mxu1 %v1479_v32  ;;  %v1544_v31 = vunpack.c.l.bf16 %v975_v21  ;;  %v907_v32 = vld [vmem:[#allocation10 + $0x114] sm:$0xff]  ;;  %v1542_v35 = vunpack.c.h.bf16 %v973_v27 }
  0x9d   :  { %2183 = vmatpush1.msra.mxu0 %v1382_v33  ;;  %2254 = vmatpush1.msra.mxu1 %v1478_v34  ;;  %v971_v33 = vld [vmem:[#allocation10 + $0x294] sm:$0xff]  ;;  %v1446_v34 = vunpack.c.h.bf16 %v909_v26  ;;  %v1442_v42 = vunpack.c.l.bf16 %v907_v32 }
  0x9e   :  { %2184 = vmatprep.subr.mxu0 %v1380_v37  ;;  %2255 = vmatprep.subr.mxu1 %v1476_v38  ;;  %v1541_v37 = vunpack.c.l.bf16 %v973_v27  ;;  %v905_v38 = vld [vmem:[#allocation10 + $0x108] sm:$0xff]  ;;  %v1539_v41 = vunpack.c.h.bf16 %v971_v33 }
  0x9f   :  { %2185 = vmatpush1.msra.mxu0 %v1379_v39  ;;  %2256 = vmatpush1.msra.mxu1 %v1475_v40  ;;  %v969_v39 = vld [vmem:[#allocation10 + $0x288] sm:$0xff]  ;;  %v1443_v40 = vunpack.c.h.bf16 %v907_v32  ;;  %v1439_v48 = vunpack.c.l.bf16 %v905_v38 }
  0xa0   :  { %2186 = vmatprep.subr.mxu0 %v1377_v43  ;;  %2257 = vmatprep.subr.mxu1 %v1473_v44  ;;  %v1538_v43 = vunpack.c.l.bf16 %v971_v33  ;;  %v903_v44 = vld [vmem:[#allocation10 + $0xfc] sm:$0xff]  ;;  %v1536_v47 = vunpack.c.h.bf16 %v969_v39 }
  0xa1   :  { %2187 = vmatpush1.msra.mxu0 %v1376_v45  ;;  %2258 = vmatpush1.msra.mxu1 %v1472_v46  ;;  %v967_v45 = vld [vmem:[#allocation10 + $0x27c] sm:$0xff]  ;;  %v1440_v46 = vunpack.c.h.bf16 %v905_v38  ;;  %v1436_v54 = vunpack.c.l.bf16 %v903_v44  ;;  %v1017_v38 = vld [vmem:[#allocation10 + $0x3a8] sm:$0xff] }
  0xa2   :  { %2188 = vmatprep.subr.mxu0 %v1374_v49  ;;  %2259 = vmatprep.subr.mxu1 %v1470_v50  ;;  %v1535_v49 = vunpack.c.l.bf16 %v969_v39  ;;  %v901_v50 = vld [vmem:[#allocation10 + $0xf0] sm:$0xff]  ;;  %v1533_v53 = vunpack.c.h.bf16 %v967_v45  ;;  %v1081_v39 = vld [vmem:[#allocation10 + $0x528] sm:$0xff] }
  0xa3   :  { %2189 = vmatpush1.msra.mxu0 %v1373_v51  ;;  %2260 = vmatpush1.msra.mxu1 %v1469_v52  ;;  %v965_v51 = vld [vmem:[#allocation10 + $0x270] sm:$0xff]  ;;  %v1437_v52 = vunpack.c.h.bf16 %v903_v44  ;;  %v1433_v60 = vunpack.c.l.bf16 %v901_v50 }
  0xa4   :  { %2190 = vmatprep.subr.mxu0 %v1467_v55  ;;  %2261 = vmatprep.subr.mxu1 %v1563_v56  ;;  %v1532_v55 = vunpack.c.l.bf16 %v967_v45  ;;  %v899_v56 = vld [vmem:[#allocation10 + $0xe4] sm:$0xff]  ;;  %v1530_v59 = vunpack.c.h.bf16 %v965_v51 }
  0xa5   :  { %2191 = vmatpush2.msra.mxu0 %v1466_v57  ;;  %2262 = vmatpush2.msra.mxu1 %v1562_v58  ;;  %v963_v57 = vld [vmem:[#allocation10 + $0x264] sm:$0xff]  ;;  %v1434_v58 = vunpack.c.h.bf16 %v901_v50  ;;  %v1430_v3 = vunpack.c.l.bf16 %v899_v56  ;;  %v1608_v50 = vunpack.c.h.bf16 %v1017_v38 }
  0xa6   :  { %2192 = vmatprep.subr.mxu0 %v1464_v61  ;;  %2263 = vmatprep.subr.mxu1 %v1560_v62  ;;  %v1529_v61 = vunpack.c.l.bf16 %v965_v51  ;;  %v897_v62 = vld [vmem:[#allocation10 + $0xd8] sm:$0xff]  ;;  %v1527_v2 = vunpack.c.h.bf16 %v963_v57  ;;  %v1704_v51 = vunpack.c.h.bf16 %v1081_v39 }
  0xa7   :  { %2193 = vmatpush2.msra.mxu0 %v1463_v63  ;;  %2264 = vmatpush2.msra.mxu1 %v1559_v1  ;;  %v961_v63 = vld [vmem:[#allocation10 + $0x258] sm:$0xff]  ;;  %v1431_v1 = vunpack.c.h.bf16 %v899_v56  ;;  %v1427_v9 = vunpack.c.l.bf16 %v897_v62 }
  0xa8   :  { %2194 = vmatprep.subr.mxu0 %v1461_v4  ;;  %2265 = vmatprep.subr.mxu1 %v1557_v5  ;;  %v1526_v4 = vunpack.c.l.bf16 %v963_v57  ;;  %v895_v5 = vld [vmem:[#allocation10 + $0xcc] sm:$0xff]  ;;  %v1524_v8 = vunpack.c.h.bf16 %v961_v63 }
  0xa9   :  { %2195 = vmatpush2.msra.mxu0 %v1460_v6  ;;  %2266 = vmatpush2.msra.mxu1 %v1556_v7  ;;  %v959_v6 = vld [vmem:[#allocation10 + $0x24c] sm:$0xff]  ;;  %v1428_v7 = vunpack.c.h.bf16 %v897_v62  ;;  %v1424_v15 = vunpack.c.l.bf16 %v895_v5 }
  0xaa   :  { %2196 = vmatprep.subr.mxu0 %v1458_v10  ;;  %2267 = vmatprep.subr.mxu1 %v1554_v11  ;;  %v1523_v10 = vunpack.c.l.bf16 %v961_v63  ;;  %v893_v11 = vld [vmem:[#allocation10 + $0xc0] sm:$0xff]  ;;  %v1521_v14 = vunpack.c.h.bf16 %v959_v6 }
  0xab   :  { %2197 = vmatpush2.msra.mxu0 %v1457_v12  ;;  %2268 = vmatpush2.msra.mxu1 %v1553_v13  ;;  %v957_v12 = vld [vmem:[#allocation10 + $0x240] sm:$0xff]  ;;  %v1425_v13 = vunpack.c.h.bf16 %v895_v5  ;;  %v1421_v21 = vunpack.c.l.bf16 %v893_v11 }
  0xac   :  { %2198 = vmatprep.subr.mxu0 %v1455_v16  ;;  %2269 = vmatprep.subr.mxu1 %v1551_v17  ;;  %v1520_v16 = vunpack.c.l.bf16 %v959_v6  ;;  %v1019_v17 = vld [vmem:[#allocation10 + $0x3b4] sm:$0xff]  ;;  %v1518_v20 = vunpack.c.h.bf16 %v957_v12 }
  0xad   :  { %2199 = vmatpush2.msra.mxu0 %v1454_v18  ;;  %2270 = vmatpush2.msra.mxu1 %v1550_v19  ;;  %v1083_v18 = vld [vmem:[#allocation10 + $0x534] sm:$0xff]  ;;  %v1422_v19 = vunpack.c.h.bf16 %v893_v11  ;;  %v1610_v45 = vunpack.c.l.bf16 %v1019_v17 }
  0xae   :  { %2200 = vmatprep.subr.mxu0 %v1452_v22  ;;  %2271 = vmatprep.subr.mxu1 %v1548_v23  ;;  %v1517_v22 = vunpack.c.l.bf16 %v957_v12  ;;  %v1611_v23 = vunpack.c.h.bf16 %v1019_v17 }
  0xaf   :  { %2201 = vmatpush2.msra.mxu0 %v1451_v24  ;;  %2272 = vmatpush2.msra.mxu1 %v1547_v25  ;;  %v1707_v24 = vunpack.c.h.bf16 %v1083_v18  ;;  %v160_v25 = vlaneseq }
  0xb0   :  { %2202 = vmatprep.subr.mxu0 %v1449_v28  ;;  %2273 = vmatprep.subr.mxu1 %v1545_v29 }
  0xb1   :  { %2203 = vmatpush2.msra.mxu0 %v1448_v30  ;;  %2274 = vmatpush2.msra.mxu1 %v1544_v31  ;;  %v4609_v26 = vshrl.u32 %v160_v25, 7  ;;  %v4621_v31 = vld [vmem:[#allocation8] sm:$0xff] }
  0xb2   :  { %2204 = vmatprep.subr.mxu0 %v1446_v34  ;;  %2275 = vmatprep.subr.mxu1 %v1542_v35 }
  0xb3   :  { %2205 = vmatpush2.msra.mxu0 %v1445_v36  ;;  %2276 = vmatpush2.msra.mxu1 %v1541_v37  ;;  %5187 = vst [vmem:[#allocation28_spill] sm:$0xff] %v4609_v26  ;;  %v4612_v27 = vsub.s32 2, %v4609_v26  ;;  %v4615_v28 = vsub.s32 1, %v4609_v26  ;;  %v174_v29 = vsub.s32 3, %v4609_v26  ;;  %v4619_v30 = vsub.s32 0, %v4609_v26 }
  0xb4   :  { %2206 = vmatprep.subr.mxu0 %v1443_v40  ;;  %2277 = vmatprep.subr.mxu1 %v1539_v41 }
  0xb5   :  { %2207 = vmatpush2.msra.mxu0 %v1442_v42  ;;  %2278 = vmatpush2.msra.mxu1 %v1538_v43  ;;  %5188 = vst [vmem:[#allocation29_spill] sm:$0xff] %v4619_v30  ;;  %v171_v32 = vrot.slane %v4621_v31, %v4612_v27  ;;  %v167_v33 = vrot.slane %v4621_v31, %v4615_v28 }
  0xb6   :  { %2208 = vmatprep.subr.mxu0 %v1440_v46  ;;  %2279 = vmatprep.subr.mxu1 %v1536_v47  ;;  %v175_v34 = vrot.slane %v4621_v31, %v174_v29  ;;  %v163_v35 = vrot.slane %v4621_v31, %v4619_v30  ;;  %v1706_v46 = vunpack.c.l.bf16 %v1083_v18  ;;  %v1015_v47 = vld [vmem:[#allocation10 + $0x39c] sm:$0xff] }
  0xb7   :  { %2209 = vmatpush2.msra.mxu0 %v1439_v48  ;;  %2280 = vmatpush2.msra.mxu1 %v1535_v49  ;;  %v1079_v48 = vld [vmem:[#allocation10 + $0x51c] sm:$0xff]  ;;  %v1605_v56 = vunpack.c.h.bf16 %v1015_v47 }
  0xb8   :  { %2210 = vmatprep.subr.mxu0 %v1437_v52  ;;  %2281 = vmatprep.subr.mxu1 %v1533_v53  ;;  %v1607_v52 = vunpack.c.l.bf16 %v1017_v38  ;;  %v1703_v53 = vunpack.c.l.bf16 %v1081_v39  ;;  %v1701_v57 = vunpack.c.h.bf16 %v1079_v48  ;;  %v999_v39 = vld [vmem:[#allocation10 + $0x33c] sm:$0xff] }
  0xb9   :  { %2211 = vmatpush2.msra.mxu0 %v1436_v54  ;;  %2282 = vmatpush2.msra.mxu1 %v1532_v55  ;;  %v1013_v54 = vld [vmem:[#allocation10 + $0x390] sm:$0xff] }
  0xba   :  { %2212 = vmatprep.subr.mxu0 %v1434_v58  ;;  %2283 = vmatprep.subr.mxu1 %v1530_v59  ;;  %v1077_v55 = vld [vmem:[#allocation10 + $0x510] sm:$0xff]  ;;  %v1604_v58 = vunpack.c.l.bf16 %v1015_v47  ;;  %v1700_v59 = vunpack.c.l.bf16 %v1079_v48  ;;  %v1602_v62 = vunpack.c.h.bf16 %v1013_v54 }
  0xbb   :  { %2213 = vmatpush2.msra.mxu0 %v1433_v60  ;;  %2284 = vmatpush2.msra.mxu1 %v1529_v61  ;;  %v1011_v60 = vld [vmem:[#allocation10 + $0x384] sm:$0xff]  ;;  %v1698_v63 = vunpack.c.h.bf16 %v1077_v55  ;;  %v997_v48 = vld [vmem:[#allocation10 + $0x330] sm:$0xff] }
  0xbc   :  { %2214 = vmatprep.subr.mxu0 %v1431_v1  ;;  %2285 = vmatprep.subr.mxu1 %v1527_v2  ;;  %v1075_v61 = vld [vmem:[#allocation10 + $0x504] sm:$0xff]  ;;  %v1601_v1 = vunpack.c.l.bf16 %v1013_v54  ;;  %v1697_v2 = vunpack.c.l.bf16 %v1077_v55  ;;  %v1599_v5 = vunpack.c.h.bf16 %v1011_v60 }
  0xbd   :  { %2215 = vmatpush2.msra.mxu0 %v1430_v3  ;;  %2286 = vmatpush2.msra.mxu1 %v1526_v4  ;;  %v1009_v3 = vld [vmem:[#allocation10 + $0x378] sm:$0xff]  ;;  %v1695_v6 = vunpack.c.h.bf16 %v1075_v61  ;;  %v995_v55 = vld [vmem:[#allocation10 + $0x324] sm:$0xff] }
  0xbe   :  { %2216 = vmatprep.subr.mxu0 %v1428_v7  ;;  %2287 = vmatprep.subr.mxu1 %v1524_v8  ;;  %v1073_v4 = vld [vmem:[#allocation10 + $0x4f8] sm:$0xff]  ;;  %v1598_v7 = vunpack.c.l.bf16 %v1011_v60  ;;  %v1694_v8 = vunpack.c.l.bf16 %v1075_v61  ;;  %v1596_v11 = vunpack.c.h.bf16 %v1009_v3 }
  0xbf   :  { %2217 = vmatpush2.msra.mxu0 %v1427_v9  ;;  %2288 = vmatpush2.msra.mxu1 %v1523_v10  ;;  %v1007_v9 = vld [vmem:[#allocation10 + $0x36c] sm:$0xff]  ;;  %v1692_v12 = vunpack.c.h.bf16 %v1073_v4  ;;  %v993_v61 = vld [vmem:[#allocation10 + $0x318] sm:$0xff] }
  0xc0   :  { %2218 = vmatprep.subr.mxu0 %v1425_v13  ;;  %2289 = vmatprep.subr.mxu1 %v1521_v14  ;;  %v1071_v10 = vld [vmem:[#allocation10 + $0x4ec] sm:$0xff]  ;;  %v1595_v13 = vunpack.c.l.bf16 %v1009_v3  ;;  %v1691_v14 = vunpack.c.l.bf16 %v1073_v4  ;;  %v1593_v17 = vunpack.c.h.bf16 %v1007_v9 }
  0xc1   :  { %2219 = vmatpush2.msra.mxu0 %v1424_v15  ;;  %2290 = vmatpush2.msra.mxu1 %v1520_v16  ;;  %v1005_v15 = vld [vmem:[#allocation10 + $0x360] sm:$0xff]  ;;  %v1689_v18 = vunpack.c.h.bf16 %v1071_v10  ;;  %v991_v4 = vld [vmem:[#allocation10 + $0x30c] sm:$0xff] }
  0xc2   :  { %2220 = vmatprep.subr.mxu0 %v1422_v19  ;;  %2291 = vmatprep.subr.mxu1 %v1518_v20  ;;  %v1069_v16 = vld [vmem:[#allocation10 + $0x4e0] sm:$0xff]  ;;  %v1592_v19 = vunpack.c.l.bf16 %v1007_v9  ;;  %v1688_v20 = vunpack.c.l.bf16 %v1071_v10  ;;  %v1589_v25 = vunpack.c.l.bf16 %v1005_v15 }
  0xc3   :  { %2221 = vmatpush2.msra.mxu0 %v1421_v21  ;;  %2292 = vmatpush2.msra.mxu1 %v1517_v22  ;;  %v1003_v21 = vld [vmem:[#allocation10 + $0x354] sm:$0xff]  ;;  %v989_v10 = vld [vmem:[#allocation10 + $0x300] sm:$0xff] }
  0xc4   :  { %2300 = vmatprep.subr.mxu0 %v1611_v23  ;;  %2371 = vmatprep.subr.mxu1 %v1707_v24  ;;  %v1067_v22 = vld [vmem:[#allocation10 + $0x4d4] sm:$0xff]  ;;  %v1590_v23 = vunpack.c.h.bf16 %v1005_v15  ;;  %v1686_v24 = vunpack.c.h.bf16 %v1069_v16 }
  0xc5   :  { %v1682_v38 = vunpack.c.l.bf16 %v1067_v22 }
 0x137   :  { %v359_v36 = vpop.f32.mrf.mxu0  ;;  %v430_v37 = vpop.f32.mrf.mxu1 }
 0x138   :  { %v4632_v40 = vadd.f32 %v430_v37, %v171_v32  ;;  %v4638_v49 = vadd.f32 %v359_v36, %v163_v35  ;;  %v1685_v32 = vunpack.c.l.bf16 %v1069_v16  ;;  %v1587_v35 = vunpack.c.h.bf16 %v1003_v21  ;;  %v1051_v16 = vld [vmem:[#allocation10 + $0x474] sm:$0xff] }
 0x139   :  { %v361_v41 = vpop.f32.mrf.mxu0  ;;  %v432_v42 = vpop.f32.mrf.mxu1  ;;  %v1683_v36 = vunpack.c.h.bf16 %v1067_v22  ;;  %v1586_v37 = vunpack.c.l.bf16 %v1003_v21  ;;  %v1049_v22 = vld [vmem:[#allocation10 + $0x468] sm:$0xff] }
 0x13a   :  { %v4634_v43 = vadd.f32 %v361_v41, %v167_v33  ;;  %v4636_v44 = vadd.f32 %v432_v42, %v175_v34  ;;  %v1001_v33 = vld [vmem:[#allocation10 + $0x348] sm:$0xff]  ;;  %v1063_v41 = vld [vmem:[#allocation10 + $0x4bc] sm:$0xff] }
 0x13b   :  { %v1065_v34 = vld [vmem:[#allocation10 + $0x4c8] sm:$0xff]  ;;  %v1584_v42 = vunpack.c.h.bf16 %v1001_v33  ;;  %v1676_v54 = vunpack.c.l.bf16 %v1063_v41 }
 0x13c   :  { %2222 = vmatprep.mubr.f32.mxu0 %v4634_v43  ;;  %2293 = vmatprep.mubr.f32.mxu1 %v4636_v44  ;;  %v1679_v47 = vunpack.c.l.bf16 %v1065_v34 }
 0x13d   :  { %2223 = vmatmul.mubr.f32.vlgmr.msra.gmra.mxu0 %v4638_v49  ;;  %2294 = vmatmul.mubr.f32.vlgmr.msra.gmra.mxu1 %v4632_v40 }
 0x13e   :  { %2301 = vmatpush1.msra.mxu0 %v1610_v45  ;;  %2372 = vmatpush1.msra.mxu1 %v1706_v46  ;;  %v1680_v45 = vunpack.c.h.bf16 %v1065_v34  ;;  %v1583_v46 = vunpack.c.l.bf16 %v1001_v33  ;;  %v1047_v34 = vld [vmem:[#allocation10 + $0x45c] sm:$0xff] }
 0x13f   :  { %2302 = vmatprep.subr.mxu0 %v1608_v50  ;;  %2373 = vmatprep.subr.mxu1 %v1704_v51  ;;  %v1061_v50 = vld [vmem:[#allocation10 + $0x4b0] sm:$0xff]  ;;  %v1581_v51 = vunpack.c.h.bf16 %v999_v39 }
 0x140   :  { %2303 = vmatpush1.msra.mxu0 %v1607_v52  ;;  %2374 = vmatpush1.msra.mxu1 %v1703_v53  ;;  %v1677_v52 = vunpack.c.h.bf16 %v1063_v41  ;;  %v1580_v53 = vunpack.c.l.bf16 %v999_v39  ;;  %v1673_v60 = vunpack.c.l.bf16 %v1061_v50  ;;  %v1045_v41 = vld [vmem:[#allocation10 + $0x450] sm:$0xff] }
 0x141   :  { %2304 = vmatprep.subr.mxu0 %v1605_v56  ;;  %2375 = vmatprep.subr.mxu1 %v1701_v57  ;;  %v1059_v56 = vld [vmem:[#allocation10 + $0x4a4] sm:$0xff]  ;;  %v1578_v57 = vunpack.c.h.bf16 %v997_v48 }
 0x142   :  { %2305 = vmatpush1.msra.mxu0 %v1604_v58  ;;  %2376 = vmatpush1.msra.mxu1 %v1700_v59  ;;  %v1674_v58 = vunpack.c.h.bf16 %v1061_v50  ;;  %v1577_v59 = vunpack.c.l.bf16 %v997_v48  ;;  %v1670_v3 = vunpack.c.l.bf16 %v1059_v56  ;;  %v1043_v50 = vld [vmem:[#allocation10 + $0x444] sm:$0xff] }
 0x143   :  { %2306 = vmatprep.subr.mxu0 %v1602_v62  ;;  %2377 = vmatprep.subr.mxu1 %v1698_v63  ;;  %v1057_v62 = vld [vmem:[#allocation10 + $0x498] sm:$0xff]  ;;  %v1575_v63 = vunpack.c.h.bf16 %v995_v55 }
 0x144   :  { %2307 = vmatpush1.msra.mxu0 %v1601_v1  ;;  %2378 = vmatpush1.msra.mxu1 %v1697_v2  ;;  %v1671_v1 = vunpack.c.h.bf16 %v1059_v56  ;;  %v1574_v2 = vunpack.c.l.bf16 %v995_v55  ;;  %v1667_v9 = vunpack.c.l.bf16 %v1057_v62  ;;  %v1041_v56 = vld [vmem:[#allocation10 + $0x438] sm:$0xff] }
 0x145   :  { %2308 = vmatprep.subr.mxu0 %v1599_v5  ;;  %2379 = vmatprep.subr.mxu1 %v1695_v6  ;;  %v1055_v5 = vld [vmem:[#allocation10 + $0x48c] sm:$0xff]  ;;  %v1572_v6 = vunpack.c.h.bf16 %v993_v61 }
 0x146   :  { %2309 = vmatpush1.msra.mxu0 %v1598_v7  ;;  %2380 = vmatpush1.msra.mxu1 %v1694_v8  ;;  %v1668_v7 = vunpack.c.h.bf16 %v1057_v62  ;;  %v1571_v8 = vunpack.c.l.bf16 %v993_v61  ;;  %v1664_v15 = vunpack.c.l.bf16 %v1055_v5  ;;  %v1039_v62 = vld [vmem:[#allocation10 + $0x42c] sm:$0xff] }
 0x147   :  { %2310 = vmatprep.subr.mxu0 %v1596_v11  ;;  %2381 = vmatprep.subr.mxu1 %v1692_v12  ;;  %v1053_v11 = vld [vmem:[#allocation10 + $0x480] sm:$0xff]  ;;  %v1569_v12 = vunpack.c.h.bf16 %v991_v4 }
 0x148   :  { %2311 = vmatpush1.msra.mxu0 %v1595_v13  ;;  %2382 = vmatpush1.msra.mxu1 %v1691_v14  ;;  %v1665_v13 = vunpack.c.h.bf16 %v1055_v5  ;;  %v1568_v14 = vunpack.c.l.bf16 %v991_v4  ;;  %v1661_v21 = vunpack.c.l.bf16 %v1053_v11  ;;  %v1037_v5 = vld [vmem:[#allocation10 + $0x420] sm:$0xff] }
 0x149   :  { %2312 = vmatprep.subr.mxu0 %v1593_v17  ;;  %2383 = vmatprep.subr.mxu1 %v1689_v18  ;;  %v1115_v17 = vld [vmem:[#allocation10 + $0x5f4] sm:$0xff]  ;;  %v1566_v18 = vunpack.c.h.bf16 %v989_v10 }
 0x14a   :  { %2313 = vmatpush1.msra.mxu0 %v1592_v19  ;;  %2384 = vmatpush1.msra.mxu1 %v1688_v20  ;;  %v1662_v19 = vunpack.c.h.bf16 %v1053_v11  ;;  %v1565_v20 = vunpack.c.l.bf16 %v989_v10  ;;  %v1754_v33 = vunpack.c.l.bf16 %v1115_v17  ;;  %v1035_v11 = vld [vmem:[#allocation10 + $0x414] sm:$0xff] }
 0x14b   :  { %2314 = vmatprep.subr.mxu0 %v1590_v23  ;;  %2385 = vmatprep.subr.mxu1 %v1686_v24  ;;  %v1113_v23 = vld [vmem:[#allocation10 + $0x5e8] sm:$0xff]  ;;  %v1659_v24 = vunpack.c.h.bf16 %v1051_v16 }
 0x14c   :  { %2315 = vmatpush1.msra.mxu0 %v1589_v25  ;;  %2386 = vmatpush1.msra.mxu1 %v1685_v32  ;;  %v1755_v25 = vunpack.c.h.bf16 %v1115_v17  ;;  %v1658_v32 = vunpack.c.l.bf16 %v1051_v16  ;;  %v1751_v39 = vunpack.c.l.bf16 %v1113_v23  ;;  %v1033_v17 = vld [vmem:[#allocation10 + $0x408] sm:$0xff] }
 0x14d   :  { %2316 = vmatprep.subr.mxu0 %v1587_v35  ;;  %2387 = vmatprep.subr.mxu1 %v1683_v36  ;;  %v1111_v35 = vld [vmem:[#allocation10 + $0x5dc] sm:$0xff]  ;;  %v1656_v36 = vunpack.c.h.bf16 %v1049_v22 }
 0x14e   :  { %2317 = vmatpush1.msra.mxu0 %v1586_v37  ;;  %2388 = vmatpush1.msra.mxu1 %v1682_v38  ;;  %v1752_v37 = vunpack.c.h.bf16 %v1113_v23  ;;  %v1655_v38 = vunpack.c.l.bf16 %v1049_v22  ;;  %v1748_v48 = vunpack.c.l.bf16 %v1111_v35  ;;  %v1031_v23 = vld [vmem:[#allocation10 + $0x3fc] sm:$0xff] }
 0x14f   :  { %2318 = vmatprep.subr.mxu0 %v1584_v42  ;;  %2389 = vmatprep.subr.mxu1 %v1680_v45  ;;  %v1109_v42 = vld [vmem:[#allocation10 + $0x5d0] sm:$0xff]  ;;  %v1653_v45 = vunpack.c.h.bf16 %v1047_v34 }
 0x150   :  { %2319 = vmatpush1.msra.mxu0 %v1583_v46  ;;  %2390 = vmatpush1.msra.mxu1 %v1679_v47  ;;  %v1749_v46 = vunpack.c.h.bf16 %v1111_v35  ;;  %v1652_v47 = vunpack.c.l.bf16 %v1047_v34  ;;  %v1745_v55 = vunpack.c.l.bf16 %v1109_v42  ;;  %v1029_v35 = vld [vmem:[#allocation10 + $0x3f0] sm:$0xff] }
 0x151   :  { %2320 = vmatprep.subr.mxu0 %v1581_v51  ;;  %2391 = vmatprep.subr.mxu1 %v1677_v52  ;;  %v1107_v51 = vld [vmem:[#allocation10 + $0x5c4] sm:$0xff]  ;;  %v1650_v52 = vunpack.c.h.bf16 %v1045_v41 }
 0x152   :  { %2321 = vmatpush1.msra.mxu0 %v1580_v53  ;;  %2392 = vmatpush1.msra.mxu1 %v1676_v54  ;;  %v1746_v53 = vunpack.c.h.bf16 %v1109_v42  ;;  %v1649_v54 = vunpack.c.l.bf16 %v1045_v41  ;;  %v1742_v61 = vunpack.c.l.bf16 %v1107_v51  ;;  %v1027_v42 = vld [vmem:[#allocation10 + $0x3e4] sm:$0xff] }
 0x153   :  { %2322 = vmatprep.subr.mxu0 %v1578_v57  ;;  %2393 = vmatprep.subr.mxu1 %v1674_v58  ;;  %v1105_v57 = vld [vmem:[#allocation10 + $0x5b8] sm:$0xff]  ;;  %v1647_v58 = vunpack.c.h.bf16 %v1043_v50 }
 0x154   :  { %2323 = vmatpush1.msra.mxu0 %v1577_v59  ;;  %2394 = vmatpush1.msra.mxu1 %v1673_v60  ;;  %v1743_v59 = vunpack.c.h.bf16 %v1107_v51  ;;  %v1646_v60 = vunpack.c.l.bf16 %v1043_v50  ;;  %v1739_v4 = vunpack.c.l.bf16 %v1105_v57  ;;  %v1625_v50 = vunpack.c.l.bf16 %v1029_v35 }
 0x155   :  { %2324 = vmatprep.subr.mxu0 %v1575_v63  ;;  %2395 = vmatprep.subr.mxu1 %v1671_v1  ;;  %v1103_v63 = vld [vmem:[#allocation10 + $0x5ac] sm:$0xff]  ;;  %v1644_v1 = vunpack.c.h.bf16 %v1041_v56 }
 0x156   :  { %2325 = vmatpush1.msra.mxu0 %v1574_v2  ;;  %2396 = vmatpush1.msra.mxu1 %v1670_v3  ;;  %v1740_v2 = vunpack.c.h.bf16 %v1105_v57  ;;  %v1643_v3 = vunpack.c.l.bf16 %v1041_v56  ;;  %v1736_v10 = vunpack.c.l.bf16 %v1103_v63  ;;  %v190_v57 = vsub.s32 7, %v4609_v26 }
 0x157   :  { %2326 = vmatprep.subr.mxu0 %v1572_v6  ;;  %2397 = vmatprep.subr.mxu1 %v1668_v7  ;;  %v1101_v6 = vld [vmem:[#allocation10 + $0x5a0] sm:$0xff]  ;;  %v1641_v7 = vunpack.c.h.bf16 %v1039_v62 }
 0x158   :  { %2327 = vmatpush1.msra.mxu0 %v1571_v8  ;;  %2398 = vmatpush1.msra.mxu1 %v1667_v9  ;;  %v1737_v8 = vunpack.c.h.bf16 %v1103_v63  ;;  %v1640_v9 = vunpack.c.l.bf16 %v1039_v62  ;;  %v1733_v16 = vunpack.c.l.bf16 %v1101_v6  ;;  %v1023_v62 = vld [vmem:[#allocation10 + $0x3cc] sm:$0xff] }
 0x159   :  { %2328 = vmatprep.subr.mxu0 %v1569_v12  ;;  %2399 = vmatprep.subr.mxu1 %v1665_v13  ;;  %v1099_v12 = vld [vmem:[#allocation10 + $0x594] sm:$0xff]  ;;  %v1638_v13 = vunpack.c.h.bf16 %v1037_v5  ;;  %v1087_v63 = vld [vmem:[#allocation10 + $0x54c] sm:$0xff] }
 0x15a   :  { %2329 = vmatpush1.msra.mxu0 %v1568_v14  ;;  %2400 = vmatpush1.msra.mxu1 %v1664_v15  ;;  %v1734_v14 = vunpack.c.h.bf16 %v1101_v6  ;;  %v1637_v15 = vunpack.c.l.bf16 %v1037_v5  ;;  %v1730_v22 = vunpack.c.l.bf16 %v1099_v12 }
 0x15b   :  { %2330 = vmatprep.subr.mxu0 %v1566_v18  ;;  %2401 = vmatprep.subr.mxu1 %v1662_v19  ;;  %v1097_v18 = vld [vmem:[#allocation10 + $0x588] sm:$0xff]  ;;  %v1635_v19 = vunpack.c.h.bf16 %v1035_v11 }
 0x15c   :  { %2331 = vmatpush1.msra.mxu0 %v1565_v20  ;;  %2402 = vmatpush1.msra.mxu1 %v1661_v21  ;;  %v1731_v20 = vunpack.c.h.bf16 %v1099_v12  ;;  %v1634_v21 = vunpack.c.l.bf16 %v1035_v11  ;;  %v1727_v34 = vunpack.c.l.bf16 %v1097_v18  ;;  %v1713_v11 = vunpack.c.h.bf16 %v1087_v63  ;;  %v1085_v12 = vld [vmem:[#allocation10 + $0x540] sm:$0xff] }
 0x15d   :  { %2332 = vmatprep.subr.mxu0 %v1659_v24  ;;  %2403 = vmatprep.subr.mxu1 %v1755_v25  ;;  %v1095_v24 = vld [vmem:[#allocation10 + $0x57c] sm:$0xff]  ;;  %v1632_v25 = vunpack.c.h.bf16 %v1033_v17 }
 0x15e   :  { %2333 = vmatpush2.msra.mxu0 %v1658_v32  ;;  %2404 = vmatpush2.msra.mxu1 %v1754_v33  ;;  %v1728_v32 = vunpack.c.h.bf16 %v1097_v18  ;;  %v1631_v33 = vunpack.c.l.bf16 %v1033_v17  ;;  %v1724_v41 = vunpack.c.l.bf16 %v1095_v24 }
 0x15f   :  { %2334 = vmatprep.subr.mxu0 %v1656_v36  ;;  %2405 = vmatprep.subr.mxu1 %v1752_v37  ;;  %v1093_v36 = vld [vmem:[#allocation10 + $0x570] sm:$0xff]  ;;  %v1629_v37 = vunpack.c.h.bf16 %v1031_v23 }
 0x160   :  { %2335 = vmatpush2.msra.mxu0 %v1655_v38  ;;  %2406 = vmatpush2.msra.mxu1 %v1751_v39  ;;  %v1725_v38 = vunpack.c.h.bf16 %v1095_v24  ;;  %v1628_v39 = vunpack.c.l.bf16 %v1031_v23  ;;  %v1721_v51 = vunpack.c.l.bf16 %v1093_v36  ;;  %v1211_v23 = vld [vmem:[#allocation10 + $0x834] sm:$0xff] }
 0x161   :  { %2336 = vmatprep.subr.mxu0 %v1653_v45  ;;  %2407 = vmatprep.subr.mxu1 %v1749_v46  ;;  %v1091_v45 = vld [vmem:[#allocation10 + $0x564] sm:$0xff]  ;;  %v1626_v46 = vunpack.c.h.bf16 %v1029_v35  ;;  %v1899_v35 = vunpack.c.h.bf16 %v1211_v23 }
 0x162   :  { %2337 = vmatpush2.msra.mxu0 %v1652_v47  ;;  %2408 = vmatpush2.msra.mxu1 %v1748_v48  ;;  %v1722_v47 = vunpack.c.h.bf16 %v1093_v36  ;;  %v182_v48 = vsub.s32 5, %v4609_v26  ;;  %v1719_v56 = vunpack.c.h.bf16 %v1091_v45 }
 0x163   :  { %2338 = vmatprep.subr.mxu0 %v1650_v52  ;;  %2409 = vmatprep.subr.mxu1 %v1746_v53  ;;  %v4645_v52 = vpop.f32.mrf.mxu0  ;;  %v1025_v53 = vld [vmem:[#allocation10 + $0x3d8] sm:$0xff] }
 0x164   :  { %2339 = vmatpush2.msra.mxu0 %v1649_v54  ;;  %2410 = vmatpush2.msra.mxu1 %v1745_v55  ;;  %v1089_v54 = vld [vmem:[#allocation10 + $0x558] sm:$0xff]  ;;  %v1623_v55 = vunpack.c.h.bf16 %v1027_v42  ;;  %v1619_v5 = vunpack.c.l.bf16 %v1025_v53 }
 0x165   :  { %2340 = vmatprep.subr.mxu0 %v1647_v58  ;;  %2411 = vmatprep.subr.mxu1 %v1743_v59  ;;  %v1622_v58 = vunpack.c.l.bf16 %v1027_v42  ;;  %v1718_v59 = vunpack.c.l.bf16 %v1091_v45  ;;  %v1715_v6 = vunpack.c.l.bf16 %v1089_v54 }
 0x166   :  { %2341 = vmatpush2.msra.mxu0 %v1646_v60  ;;  %2412 = vmatpush2.msra.mxu1 %v1742_v61  ;;  %v186_v60 = vsub.s32 6, %v4609_v26  ;;  %v572_v61 = vpop.f32.mrf.mxu1 }
 0x167   :  { %2342 = vmatprep.subr.mxu0 %v1644_v1  ;;  %2413 = vmatprep.subr.mxu1 %v1740_v2  ;;  %v1620_v1 = vunpack.c.h.bf16 %v1025_v53  ;;  %v1716_v2 = vunpack.c.h.bf16 %v1089_v54 }
 0x168   :  { %2343 = vmatpush2.msra.mxu0 %v1643_v3  ;;  %2414 = vmatpush2.msra.mxu1 %v1739_v4  ;;  %v183_v3 = vrot.slane %v4621_v31, %v182_v48  ;;  %v178_v4 = vsub.s32 4, %v4609_v26  ;;  %v4902_v26 = vld [vmem:[#allocation13 + $0x198] sm:$0xff] }
 0x169   :  { %2344 = vmatprep.subr.mxu0 %v1641_v7  ;;  %2415 = vmatprep.subr.mxu1 %v1737_v8  ;;  %v503_v7 = vpop.f32.mrf.mxu0  ;;  %v1021_v8 = vld [vmem:[#allocation10 + $0x3c0] sm:$0xff]  ;;  %5211 = vst [vmem:[#allocation52_spill] sm:$0xff] %v4902_v26 }
 0x16a   :  { %2345 = vmatpush2.msra.mxu0 %v1640_v9  ;;  %2416 = vmatpush2.msra.mxu1 %v1736_v10  ;;  %v191_v9 = vrot.slane %v4621_v31, %v190_v57  ;;  %v1617_v10 = vunpack.c.h.bf16 %v1023_v62  ;;  %v4659_v17 = vadd.f32 %v503_v7, %v183_v3  ;;  %v1614_v18 = vunpack.c.h.bf16 %v1021_v8 }
 0x16b   :  { %2346 = vmatprep.subr.mxu0 %v1638_v13  ;;  %2417 = vmatprep.subr.mxu1 %v1734_v14  ;;  %v187_v13 = vrot.slane %v4621_v31, %v186_v60  ;;  %v574_v14 = vpop.f32.mrf.mxu1 }
 0x16c   :  { %2347 = vmatpush2.msra.mxu0 %v1637_v15  ;;  %2418 = vmatpush2.msra.mxu1 %v1733_v16  ;;  %v1616_v15 = vunpack.c.l.bf16 %v1023_v62  ;;  %v1712_v16 = vunpack.c.l.bf16 %v1087_v63  ;;  %v4664_v24 = vadd.f32 %v574_v14, %v191_v9  ;;  %v1199_v9 = vld [vmem:[#allocation10 + $0x7ec] sm:$0xff]  ;;  %v1133_v14 = vld [vmem:[#allocation10 + $0x660] sm:$0xff] }
 0x16d   :  { %2348 = vmatprep.subr.mxu0 %v1635_v19  ;;  %2419 = vmatprep.subr.mxu1 %v1731_v20  ;;  %v179_v19 = vrot.slane %v4621_v31, %v178_v4  ;;  %v1613_v20 = vunpack.c.l.bf16 %v1021_v8  ;;  %v1135_v8 = vld [vmem:[#allocation10 + $0x66c] sm:$0xff] }
 0x16e   :  { %2349 = vmatpush2.msra.mxu0 %v1634_v21  ;;  %2420 = vmatpush2.msra.mxu1 %v1730_v22  ;;  %v1710_v21 = vunpack.c.h.bf16 %v1085_v12  ;;  %v1147_v22 = vld [vmem:[#allocation10 + $0x6b4] sm:$0xff] }
 0x16f   :  { %2350 = vmatprep.subr.mxu0 %v1632_v25  ;;  %2421 = vmatprep.subr.mxu1 %v1728_v32  ;;  %v1709_v25 = vunpack.c.l.bf16 %v1085_v12  ;;  %v4666_v32 = vadd.f32 %v572_v61, %v187_v13  ;;  %v1803_v31 = vunpack.c.h.bf16 %v1147_v22  ;;  %v4670_v36 = vadd.f32 %v4645_v52, %v179_v19 }
 0x170   :  { %2351 = vmatpush2.msra.mxu0 %v1631_v33  ;;  %2422 = vmatpush2.msra.mxu1 %v1727_v34  ;;  %v1145_v33 = vld [vmem:[#allocation10 + $0x6a8] sm:$0xff]  ;;  %v1784_v19 = vunpack.c.l.bf16 %v1135_v8 }
 0x171   :  { %2352 = vmatprep.subr.mxu0 %v1629_v37  ;;  %2423 = vmatprep.subr.mxu1 %v1725_v38  ;;  %v1209_v34 = vld [vmem:[#allocation10 + $0x828] sm:$0xff]  ;;  %v1802_v37 = vunpack.c.l.bf16 %v1147_v22  ;;  %v1898_v38 = vunpack.c.l.bf16 %v1211_v23  ;;  %v1800_v42 = vunpack.c.h.bf16 %v1145_v33  ;;  %v1195_v22 = vld [vmem:[#allocation10 + $0x7d4] sm:$0xff]  ;;  %v1782_v23 = vunpack.c.h.bf16 %v1133_v14 }
 0x172   :  { %2353 = vmatpush2.msra.mxu0 %v1628_v39  ;;  %2424 = vmatpush2.msra.mxu1 %v1724_v41  ;;  %v1143_v39 = vld [vmem:[#allocation10 + $0x69c] sm:$0xff]  ;;  %v1896_v45 = vunpack.c.h.bf16 %v1209_v34 }
 0x173   :  { %2354 = vmatprep.subr.mxu0 %v1626_v46  ;;  %2425 = vmatprep.subr.mxu1 %v1722_v47  ;;  %v1207_v41 = vld [vmem:[#allocation10 + $0x81c] sm:$0xff]  ;;  %v1799_v46 = vunpack.c.l.bf16 %v1145_v33  ;;  %v1895_v47 = vunpack.c.l.bf16 %v1209_v34  ;;  %v1797_v52 = vunpack.c.h.bf16 %v1143_v39  ;;  %v1796_v54 = vunpack.c.l.bf16 %v1143_v39 }
 0x174   :  { %2355 = vmatpush2.msra.mxu0 %v1625_v50  ;;  %2426 = vmatpush2.msra.mxu1 %v1721_v51  ;;  %v1141_v50 = vld [vmem:[#allocation10 + $0x690] sm:$0xff]  ;;  %v1893_v53 = vunpack.c.h.bf16 %v1207_v41  ;;  %v1781_v33 = vunpack.c.l.bf16 %v1133_v14 }
 0x175   :  { %2356 = vmatprep.subr.mxu0 %v1623_v55  ;;  %2427 = vmatprep.subr.mxu1 %v1719_v56  ;;  %v1205_v51 = vld [vmem:[#allocation10 + $0x810] sm:$0xff]  ;;  %v1892_v55 = vunpack.c.l.bf16 %v1207_v41  ;;  %v1139_v56 = vld [vmem:[#allocation10 + $0x684] sm:$0xff]  ;;  %v1793_v62 = vunpack.c.l.bf16 %v1141_v50  ;;  %v1874_v41 = vunpack.c.l.bf16 %v1195_v22 }
 0x176   :  { %2357 = vmatpush2.msra.mxu0 %v1622_v58  ;;  %2428 = vmatpush2.msra.mxu1 %v1718_v59  ;;  %v1203_v58 = vld [vmem:[#allocation10 + $0x804] sm:$0xff]  ;;  %v1794_v59 = vunpack.c.h.bf16 %v1141_v50  ;;  %v1890_v61 = vunpack.c.h.bf16 %v1205_v51  ;;  %v1889_v63 = vunpack.c.l.bf16 %v1205_v51  ;;  %v1791_v3 = vunpack.c.h.bf16 %v1139_v56 }
 0x177   :  { %2358 = vmatprep.subr.mxu0 %v1620_v1  ;;  %2429 = vmatprep.subr.mxu1 %v1716_v2  ;;  %v1137_v1 = vld [vmem:[#allocation10 + $0x678] sm:$0xff]  ;;  %v1886_v7 = vunpack.c.l.bf16 %v1203_v58 }
 0x178   :  { %2359 = vmatpush2.msra.mxu0 %v1619_v5  ;;  %2430 = vmatpush2.msra.mxu1 %v1715_v6  ;;  %v1201_v2 = vld [vmem:[#allocation10 + $0x7f8] sm:$0xff]  ;;  %v1887_v5 = vunpack.c.h.bf16 %v1203_v58  ;;  %v1790_v6 = vunpack.c.l.bf16 %v1139_v56  ;;  %v1787_v12 = vunpack.c.l.bf16 %v1137_v1 }
 0x179   :  { %2360 = vmatprep.subr.mxu0 %v1617_v10  ;;  %2431 = vmatprep.subr.mxu1 %v1713_v11  ;;  %v1788_v10 = vunpack.c.h.bf16 %v1137_v1  ;;  %v1884_v11 = vunpack.c.h.bf16 %v1201_v2  ;;  %v1883_v13 = vunpack.c.l.bf16 %v1201_v2 }
 0x17a   :  { %2361 = vmatpush2.msra.mxu0 %v1616_v15  ;;  %2432 = vmatpush2.msra.mxu1 %v1712_v16  ;;  %v1197_v15 = vld [vmem:[#allocation10 + $0x7e0] sm:$0xff]  ;;  %v1785_v16 = vunpack.c.h.bf16 %v1135_v8 }
 0x17b   :  { %2362 = vmatprep.subr.mxu0 %v1614_v18  ;;  %2364 = vmatprep.mubr.f32.mxu0 %v4659_v17  ;;  %v1881_v18 = vunpack.c.h.bf16 %v1199_v9  ;;  %v1877_v34 = vunpack.c.l.bf16 %v1197_v15 }
 0x17c   :  { %2433 = vmatprep.subr.mxu1 %v1710_v21  ;;  %2363 = vmatpush2.msra.mxu0 %v1613_v20  ;;  %v1880_v20 = vunpack.c.l.bf16 %v1199_v9  ;;  %v1131_v21 = vld [vmem:[#allocation10 + $0x654] sm:$0xff] }
 0x17d   :  { %2434 = vmatpush2.msra.mxu1 %v1709_v25  ;;  %2435 = vmatprep.mubr.f32.mxu1 %v4664_v24  ;;  %v1878_v25 = vunpack.c.h.bf16 %v1197_v15  ;;  %v1778_v39 = vunpack.c.l.bf16 %v1131_v21 }
 0x17e   :  { %2365 = vmatmul.mubr.f32.vlgmr.msra.gmra.mxu0 %v4670_v36  ;;  %2436 = vmatmul.mubr.f32.vlgmr.msra.gmra.mxu1 %v4666_v32 }
 0x17f   :  { %2442 = vmatprep.subr.mxu0 %v1803_v31  ;;  %2513 = vmatprep.subr.mxu1 %v1899_v35  ;;  %v1129_v31 = vld [vmem:[#allocation10 + $0x648] sm:$0xff] }
 0x180   :  { %2443 = vmatpush1.msra.mxu0 %v1802_v37  ;;  %2514 = vmatpush1.msra.mxu1 %v1898_v38  ;;  %v1193_v35 = vld [vmem:[#allocation10 + $0x7c8] sm:$0xff]  ;;  %v1779_v37 = vunpack.c.h.bf16 %v1131_v21  ;;  %v1875_v38 = vunpack.c.h.bf16 %v1195_v22  ;;  %v1775_v50 = vunpack.c.l.bf16 %v1129_v31 }
 0x181   :  { %2444 = vmatprep.subr.mxu0 %v1800_v42  ;;  %2515 = vmatprep.subr.mxu1 %v1896_v45  ;;  %v1127_v42 = vld [vmem:[#allocation10 + $0x63c] sm:$0xff]  ;;  %v1871_v51 = vunpack.c.l.bf16 %v1193_v35 }
 0x182   :  { %2445 = vmatpush1.msra.mxu0 %v1799_v46  ;;  %2516 = vmatpush1.msra.mxu1 %v1895_v47  ;;  %v1191_v45 = vld [vmem:[#allocation10 + $0x7bc] sm:$0xff]  ;;  %v1776_v46 = vunpack.c.h.bf16 %v1129_v31  ;;  %v1872_v47 = vunpack.c.h.bf16 %v1193_v35  ;;  %v1772_v56 = vunpack.c.l.bf16 %v1127_v42 }
 0x183   :  { %2446 = vmatprep.subr.mxu0 %v1797_v52  ;;  %2517 = vmatprep.subr.mxu1 %v1893_v53  ;;  %v1125_v52 = vld [vmem:[#allocation10 + $0x630] sm:$0xff]  ;;  %v1868_v58 = vunpack.c.l.bf16 %v1191_v45 }
 0x184   :  { %2447 = vmatpush1.msra.mxu0 %v1796_v54  ;;  %2518 = vmatpush1.msra.mxu1 %v1892_v55  ;;  %v1189_v53 = vld [vmem:[#allocation10 + $0x7b0] sm:$0xff]  ;;  %v1773_v54 = vunpack.c.h.bf16 %v1127_v42  ;;  %v1869_v55 = vunpack.c.h.bf16 %v1191_v45  ;;  %v1769_v1 = vunpack.c.l.bf16 %v1125_v52 }
 0x185   :  { %2448 = vmatprep.subr.mxu0 %v1794_v59  ;;  %2519 = vmatprep.subr.mxu1 %v1890_v61  ;;  %v1123_v59 = vld [vmem:[#allocation10 + $0x624] sm:$0xff]  ;;  %v1865_v2 = vunpack.c.l.bf16 %v1189_v53 }
 0x186   :  { %2449 = vmatpush1.msra.mxu0 %v1793_v62  ;;  %2520 = vmatpush1.msra.mxu1 %v1889_v63  ;;  %v1187_v61 = vld [vmem:[#allocation10 + $0x7a4] sm:$0xff]  ;;  %v1770_v62 = vunpack.c.h.bf16 %v1125_v52  ;;  %v1866_v63 = vunpack.c.h.bf16 %v1189_v53  ;;  %v1766_v8 = vunpack.c.l.bf16 %v1123_v59 }
 0x187   :  { %2450 = vmatprep.subr.mxu0 %v1791_v3  ;;  %2521 = vmatprep.subr.mxu1 %v1887_v5  ;;  %v1121_v3 = vld [vmem:[#allocation10 + $0x618] sm:$0xff]  ;;  %v1862_v9 = vunpack.c.l.bf16 %v1187_v61 }
 0x188   :  { %2451 = vmatpush1.msra.mxu0 %v1790_v6  ;;  %2522 = vmatpush1.msra.mxu1 %v1886_v7  ;;  %v1185_v5 = vld [vmem:[#allocation10 + $0x798] sm:$0xff]  ;;  %v1767_v6 = vunpack.c.h.bf16 %v1123_v59  ;;  %v1863_v7 = vunpack.c.h.bf16 %v1187_v61  ;;  %v1763_v14 = vunpack.c.l.bf16 %v1121_v3 }
 0x189   :  { %2452 = vmatprep.subr.mxu0 %v1788_v10  ;;  %2523 = vmatprep.subr.mxu1 %v1884_v11  ;;  %v1119_v10 = vld [vmem:[#allocation10 + $0x60c] sm:$0xff]  ;;  %v1859_v15 = vunpack.c.l.bf16 %v1185_v5 }
 0x18a   :  { %2453 = vmatpush1.msra.mxu0 %v1787_v12  ;;  %2524 = vmatpush1.msra.mxu1 %v1883_v13  ;;  %v1183_v11 = vld [vmem:[#allocation10 + $0x78c] sm:$0xff]  ;;  %v1764_v12 = vunpack.c.h.bf16 %v1121_v3  ;;  %v1860_v13 = vunpack.c.h.bf16 %v1185_v5  ;;  %v1760_v21 = vunpack.c.l.bf16 %v1119_v10 }
 0x18b   :  { %2454 = vmatprep.subr.mxu0 %v1785_v16  ;;  %2525 = vmatprep.subr.mxu1 %v1881_v18  ;;  %v1117_v16 = vld [vmem:[#allocation10 + $0x600] sm:$0xff]  ;;  %v1856_v22 = vunpack.c.l.bf16 %v1183_v11 }
 0x18c   :  { %2455 = vmatpush1.msra.mxu0 %v1784_v19  ;;  %2526 = vmatpush1.msra.mxu1 %v1880_v20  ;;  %v1181_v18 = vld [vmem:[#allocation10 + $0x780] sm:$0xff]  ;;  %v1761_v19 = vunpack.c.h.bf16 %v1119_v10  ;;  %v1857_v20 = vunpack.c.h.bf16 %v1183_v11  ;;  %v1757_v31 = vunpack.c.l.bf16 %v1117_v16 }
 0x18d   :  { %2456 = vmatprep.subr.mxu0 %v1782_v23  ;;  %2527 = vmatprep.subr.mxu1 %v1878_v25  ;;  %v1179_v23 = vld [vmem:[#allocation10 + $0x774] sm:$0xff]  ;;  %v1853_v35 = vunpack.c.l.bf16 %v1181_v18 }
 0x18e   :  { %2457 = vmatpush1.msra.mxu0 %v1781_v33  ;;  %2528 = vmatpush1.msra.mxu1 %v1877_v34  ;;  %v1243_v25 = vld [vmem:[#allocation10 + $0x8f4] sm:$0xff]  ;;  %v1758_v33 = vunpack.c.h.bf16 %v1117_v16  ;;  %v1854_v34 = vunpack.c.h.bf16 %v1181_v18  ;;  %v1850_v42 = vunpack.c.l.bf16 %v1179_v23 }
 0x18f   :  { %2458 = vmatprep.subr.mxu0 %v1779_v37  ;;  %2529 = vmatprep.subr.mxu1 %v1875_v38  ;;  %v1177_v37 = vld [vmem:[#allocation10 + $0x768] sm:$0xff]  ;;  %v1946_v45 = vunpack.c.l.bf16 %v1243_v25 }
 0x190   :  { %2459 = vmatpush1.msra.mxu0 %v1778_v39  ;;  %2530 = vmatpush1.msra.mxu1 %v1874_v41  ;;  %v1241_v38 = vld [vmem:[#allocation10 + $0x8e8] sm:$0xff]  ;;  %v1851_v39 = vunpack.c.h.bf16 %v1179_v23  ;;  %v1947_v41 = vunpack.c.h.bf16 %v1243_v25  ;;  %v1847_v52 = vunpack.c.l.bf16 %v1177_v37 }
 0x191   :  { %2460 = vmatprep.subr.mxu0 %v1776_v46  ;;  %2531 = vmatprep.subr.mxu1 %v1872_v47  ;;  %v1175_v46 = vld [vmem:[#allocation10 + $0x75c] sm:$0xff]  ;;  %v1943_v53 = vunpack.c.l.bf16 %v1241_v38 }
 0x192   :  { %2461 = vmatpush1.msra.mxu0 %v1775_v50  ;;  %2532 = vmatpush1.msra.mxu1 %v1871_v51  ;;  %v1239_v47 = vld [vmem:[#allocation10 + $0x8dc] sm:$0xff]  ;;  %v1848_v50 = vunpack.c.h.bf16 %v1177_v37  ;;  %v1944_v51 = vunpack.c.h.bf16 %v1241_v38  ;;  %v1844_v59 = vunpack.c.l.bf16 %v1175_v46 }
 0x193   :  { %2462 = vmatprep.subr.mxu0 %v1773_v54  ;;  %2533 = vmatprep.subr.mxu1 %v1869_v55  ;;  %v1173_v54 = vld [vmem:[#allocation10 + $0x750] sm:$0xff]  ;;  %v1940_v61 = vunpack.c.l.bf16 %v1239_v47 }
 0x194   :  { %2463 = vmatpush1.msra.mxu0 %v1772_v56  ;;  %2534 = vmatpush1.msra.mxu1 %v1868_v58  ;;  %v1237_v55 = vld [vmem:[#allocation10 + $0x8d0] sm:$0xff]  ;;  %v1845_v56 = vunpack.c.h.bf16 %v1175_v46  ;;  %v1941_v58 = vunpack.c.h.bf16 %v1239_v47  ;;  %v1841_v3 = vunpack.c.l.bf16 %v1173_v54 }
 0x195   :  { %2464 = vmatprep.subr.mxu0 %v1770_v62  ;;  %2535 = vmatprep.subr.mxu1 %v1866_v63  ;;  %v1171_v62 = vld [vmem:[#allocation10 + $0x744] sm:$0xff]  ;;  %v1937_v5 = vunpack.c.l.bf16 %v1237_v55 }
 0x196   :  { %2465 = vmatpush1.msra.mxu0 %v1769_v1  ;;  %2536 = vmatpush1.msra.mxu1 %v1865_v2  ;;  %v1235_v63 = vld [vmem:[#allocation10 + $0x8c4] sm:$0xff]  ;;  %v1842_v1 = vunpack.c.h.bf16 %v1173_v54  ;;  %v1938_v2 = vunpack.c.h.bf16 %v1237_v55  ;;  %v1838_v10 = vunpack.c.l.bf16 %v1171_v62 }
 0x197   :  { %2466 = vmatprep.subr.mxu0 %v1767_v6  ;;  %2537 = vmatprep.subr.mxu1 %v1863_v7  ;;  %v1169_v6 = vld [vmem:[#allocation10 + $0x738] sm:$0xff]  ;;  %v1934_v11 = vunpack.c.l.bf16 %v1235_v63 }
 0x198   :  { %2467 = vmatpush1.msra.mxu0 %v1766_v8  ;;  %2538 = vmatpush1.msra.mxu1 %v1862_v9  ;;  %v1233_v7 = vld [vmem:[#allocation10 + $0x8b8] sm:$0xff]  ;;  %v1839_v8 = vunpack.c.h.bf16 %v1171_v62  ;;  %v1935_v9 = vunpack.c.h.bf16 %v1235_v63  ;;  %v1835_v16 = vunpack.c.l.bf16 %v1169_v6 }
 0x199   :  { %2468 = vmatprep.subr.mxu0 %v1764_v12  ;;  %2539 = vmatprep.subr.mxu1 %v1860_v13  ;;  %v1167_v12 = vld [vmem:[#allocation10 + $0x72c] sm:$0xff]  ;;  %v1931_v18 = vunpack.c.l.bf16 %v1233_v7 }
 0x19a   :  { %2469 = vmatpush1.msra.mxu0 %v1763_v14  ;;  %2540 = vmatpush1.msra.mxu1 %v1859_v15  ;;  %v1231_v13 = vld [vmem:[#allocation10 + $0x8ac] sm:$0xff]  ;;  %v1836_v14 = vunpack.c.h.bf16 %v1169_v6  ;;  %v1932_v15 = vunpack.c.h.bf16 %v1233_v7  ;;  %v1832_v23 = vunpack.c.l.bf16 %v1167_v12 }
 0x19b   :  { %2470 = vmatprep.subr.mxu0 %v1761_v19  ;;  %2541 = vmatprep.subr.mxu1 %v1857_v20  ;;  %v1165_v19 = vld [vmem:[#allocation10 + $0x720] sm:$0xff]  ;;  %v1928_v25 = vunpack.c.l.bf16 %v1231_v13 }
 0x19c   :  { %2471 = vmatpush1.msra.mxu0 %v1760_v21  ;;  %2542 = vmatpush1.msra.mxu1 %v1856_v22  ;;  %v1229_v20 = vld [vmem:[#allocation10 + $0x8a0] sm:$0xff]  ;;  %v1833_v21 = vunpack.c.h.bf16 %v1167_v12  ;;  %v1929_v22 = vunpack.c.h.bf16 %v1231_v13  ;;  %v1829_v37 = vunpack.c.l.bf16 %v1165_v19 }
 0x19d   :  { %2472 = vmatprep.subr.mxu0 %v1758_v33  ;;  %2543 = vmatprep.subr.mxu1 %v1854_v34  ;;  %v1163_v33 = vld [vmem:[#allocation10 + $0x714] sm:$0xff]  ;;  %v1925_v38 = vunpack.c.l.bf16 %v1229_v20 }
 0x19e   :  { %2473 = vmatpush1.msra.mxu0 %v1757_v31  ;;  %2544 = vmatpush1.msra.mxu1 %v1853_v35  ;;  %v1227_v34 = vld [vmem:[#allocation10 + $0x894] sm:$0xff]  ;;  %v1830_v31 = vunpack.c.h.bf16 %v1165_v19  ;;  %v1926_v35 = vunpack.c.h.bf16 %v1229_v20  ;;  %v1826_v46 = vunpack.c.l.bf16 %v1163_v33  ;;  %v1215_v19 = vld [vmem:[#allocation10 + $0x84c] sm:$0xff] }
 0x19f   :  { %2474 = vmatprep.subr.mxu0 %v1851_v39  ;;  %2545 = vmatprep.subr.mxu1 %v1947_v41  ;;  %v1161_v39 = vld [vmem:[#allocation10 + $0x708] sm:$0xff]  ;;  %v1922_v47 = vunpack.c.l.bf16 %v1227_v34 }
 0x1a0   :  { %2475 = vmatpush2.msra.mxu0 %v1850_v42  ;;  %2546 = vmatpush2.msra.mxu1 %v1946_v45  ;;  %v1225_v41 = vld [vmem:[#allocation10 + $0x888] sm:$0xff]  ;;  %v1827_v42 = vunpack.c.h.bf16 %v1163_v33  ;;  %v1923_v45 = vunpack.c.h.bf16 %v1227_v34  ;;  %v1823_v54 = vunpack.c.l.bf16 %v1161_v39  ;;  %v1149_v34 = vld [vmem:[#allocation10 + $0x6c0] sm:$0xff] }
 0x1a1   :  { %2476 = vmatprep.subr.mxu0 %v1848_v50  ;;  %2547 = vmatprep.subr.mxu1 %v1944_v51  ;;  %v1159_v50 = vld [vmem:[#allocation10 + $0x6fc] sm:$0xff]  ;;  %v1919_v55 = vunpack.c.l.bf16 %v1225_v41 }
 0x1a2   :  { %2477 = vmatpush2.msra.mxu0 %v1847_v52  ;;  %2548 = vmatpush2.msra.mxu1 %v1943_v53  ;;  %v1223_v51 = vld [vmem:[#allocation10 + $0x87c] sm:$0xff]  ;;  %v1824_v52 = vunpack.c.h.bf16 %v1161_v39  ;;  %v1920_v53 = vunpack.c.h.bf16 %v1225_v41  ;;  %v1820_v62 = vunpack.c.l.bf16 %v1159_v50 }
 0x1a3   :  { %2478 = vmatprep.subr.mxu0 %v1845_v56  ;;  %2549 = vmatprep.subr.mxu1 %v1941_v58  ;;  %v1157_v56 = vld [vmem:[#allocation10 + $0x6f0] sm:$0xff]  ;;  %v1916_v63 = vunpack.c.l.bf16 %v1223_v51 }
 0x1a4   :  { %2479 = vmatpush2.msra.mxu0 %v1844_v59  ;;  %2550 = vmatpush2.msra.mxu1 %v1940_v61  ;;  %v1221_v58 = vld [vmem:[#allocation10 + $0x870] sm:$0xff]  ;;  %v1821_v59 = vunpack.c.h.bf16 %v1159_v50  ;;  %v1917_v61 = vunpack.c.h.bf16 %v1223_v51  ;;  %v1817_v6 = vunpack.c.l.bf16 %v1157_v56 }
 0x1a5   :  { %2480 = vmatprep.subr.mxu0 %v1842_v1  ;;  %2551 = vmatprep.subr.mxu1 %v1938_v2  ;;  %v1155_v1 = vld [vmem:[#allocation10 + $0x6e4] sm:$0xff]  ;;  %v1913_v7 = vunpack.c.l.bf16 %v1221_v58 }
 0x1a6   :  { %2481 = vmatpush2.msra.mxu0 %v1841_v3  ;;  %2552 = vmatpush2.msra.mxu1 %v1937_v5  ;;  %v1219_v2 = vld [vmem:[#allocation10 + $0x864] sm:$0xff]  ;;  %v1818_v3 = vunpack.c.h.bf16 %v1157_v56  ;;  %v1914_v5 = vunpack.c.h.bf16 %v1221_v58  ;;  %v1815_v12 = vunpack.c.h.bf16 %v1155_v1 }
 0x1a7   :  { %2482 = vmatprep.subr.mxu0 %v1839_v8  ;;  %2553 = vmatprep.subr.mxu1 %v1935_v9  ;;  %v4675_v8 = vld [vmem:[#allocation8 + $0x8] sm:$0xff]  ;;  %v4677_v9 = vpop.f32.mrf.mxu0  ;;  %v1911_v13 = vunpack.c.h.bf16 %v1219_v2 }
 0x1a8   :  { %2483 = vmatpush2.msra.mxu0 %v1838_v10  ;;  %2554 = vmatpush2.msra.mxu1 %v1934_v11  ;;  %v1153_v10 = vld [vmem:[#allocation10 + $0x6d8] sm:$0xff]  ;;  %v203_v39 = vrot.slane %v4675_v8, %v4612_v27  ;;  %v195_v50 = vrot.slane %v4675_v8, %v4619_v30 }
 0x1a9   :  { %2484 = vmatprep.subr.mxu0 %v1836_v14  ;;  %2555 = vmatprep.subr.mxu1 %v1932_v15  ;;  %v1217_v11 = vld [vmem:[#allocation10 + $0x858] sm:$0xff]  ;;  %v1814_v14 = vunpack.c.l.bf16 %v1155_v1  ;;  %v1910_v15 = vunpack.c.l.bf16 %v1219_v2  ;;  %v1812_v20 = vunpack.c.h.bf16 %v1153_v10  ;;  %v645_v33 = vpop.f32.mrf.mxu0  ;;  %v215_v1 = vrot.slane %v4675_v8, %v182_v48 }
 0x1aa   :  { %2485 = vmatpush2.msra.mxu0 %v1835_v16  ;;  %2556 = vmatpush2.msra.mxu1 %v1931_v18  ;;  %v714_v16 = vpop.f32.mrf.mxu1  ;;  %v1151_v18 = vld [vmem:[#allocation10 + $0x6cc] sm:$0xff] }
 0x1ab   :  { %2486 = vmatprep.subr.mxu0 %v1833_v21  ;;  %2557 = vmatprep.subr.mxu1 %v1929_v22  ;;  %v1908_v21 = vunpack.c.h.bf16 %v1217_v11  ;;  %v199_v22 = vrot.slane %v4675_v8, %v4615_v28  ;;  %v4694_v58 = vadd.f32 %v714_v16, %v203_v39  ;;  %v1329_v39 = vld [vmem:[#allocation10 + $0xaf8] sm:$0xff] }
 0x1ac   :  { %2487 = vmatpush2.msra.mxu0 %v1832_v23  ;;  %2558 = vmatpush2.msra.mxu1 %v1928_v25  ;;  %v1811_v23 = vunpack.c.l.bf16 %v1153_v10  ;;  %v1907_v25 = vunpack.c.l.bf16 %v1217_v11  ;;  %v716_v41 = vpop.f32.mrf.mxu1  ;;  %v1271_v10 = vld [vmem:[#allocation10 + $0x99c] sm:$0xff] }
 0x1ad   :  { %2488 = vmatprep.subr.mxu0 %v1830_v31  ;;  %2559 = vmatprep.subr.mxu1 %v1926_v35  ;;  %v207_v31 = vrot.slane %v4675_v8, %v174_v29  ;;  %v1809_v35 = vunpack.c.h.bf16 %v1151_v18  ;;  %v1805_v29 = vunpack.c.l.bf16 %v1149_v34 }
 0x1ae   :  { %2489 = vmatpush2.msra.mxu0 %v1829_v37  ;;  %2560 = vmatpush2.msra.mxu1 %v1925_v38  ;;  %v1905_v37 = vunpack.c.h.bf16 %v1215_v19  ;;  %v1213_v38 = vld [vmem:[#allocation10 + $0x840] sm:$0xff]  ;;  %v4700_v2 = vpop.f32.mrf.mxu1 }
 0x1af   :  { %2490 = vmatprep.subr.mxu0 %v1827_v42  ;;  %2561 = vmatprep.subr.mxu1 %v1923_v45  ;;  %v1808_v42 = vunpack.c.l.bf16 %v1151_v18  ;;  %v1904_v45 = vunpack.c.l.bf16 %v1215_v19  ;;  %v1902_v51 = vunpack.c.h.bf16 %v1213_v38  ;;  %v1901_v56 = vunpack.c.l.bf16 %v1213_v38  ;;  %v1265_v38 = vld [vmem:[#allocation10 + $0x978] sm:$0xff] }
 0x1b0   :  { %2491 = vmatpush2.msra.mxu0 %v1826_v46  ;;  %2562 = vmatpush2.msra.mxu1 %v1922_v47  ;;  %v4686_v46 = vadd.f32 %v645_v33, %v199_v22  ;;  %v1806_v47 = vunpack.c.h.bf16 %v1149_v34  ;;  %v858_v18 = vpop.f32.mrf.mxu1  ;;  %v1989_v19 = vunpack.c.h.bf16 %v1271_v10  ;;  %v1267_v33 = vld [vmem:[#allocation10 + $0x984] sm:$0xff] }
 0x1b1   :  { %2492 = vmatprep.subr.mxu0 %v1824_v52  ;;  %2563 = vmatprep.subr.mxu1 %v1920_v53  ;;  %v4690_v52 = vpop.f32.mrf.mxu0  ;;  %v1275_v53 = vld [vmem:[#allocation10 + $0x9b4] sm:$0xff]  ;;  %v1331_v34 = vld [vmem:[#allocation10 + $0xb04] sm:$0xff] }
 0x1b2   :  { %2493 = vmatpush2.msra.mxu0 %v1823_v54  ;;  %2564 = vmatpush2.msra.mxu1 %v1919_v55  ;;  %v1339_v54 = vld [vmem:[#allocation10 + $0xb34] sm:$0xff]  ;;  %v4692_v55 = vadd.f32 %v716_v41, %v207_v31  ;;  %v1983_v41 = vunpack.c.h.bf16 %v1267_v33 }
 0x1b3   :  { %2494 = vmatprep.subr.mxu0 %v1821_v59  ;;  %2565 = vmatprep.subr.mxu1 %v1917_v61  ;;  %v1273_v59 = vld [vmem:[#allocation10 + $0x9a8] sm:$0xff] }
 0x1b4   :  { %2495 = vmatpush2.msra.mxu0 %v1820_v62  ;;  %2566 = vmatpush2.msra.mxu1 %v1916_v63  ;;  %v1337_v61 = vld [vmem:[#allocation10 + $0xb28] sm:$0xff]  ;;  %v1995_v62 = vunpack.c.h.bf16 %v1275_v53  ;;  %v2091_v63 = vunpack.c.h.bf16 %v1339_v54  ;;  %v1992_v11 = vunpack.c.h.bf16 %v1273_v59  ;;  %v1991_v48 = vunpack.c.l.bf16 %v1273_v59  ;;  %v1261_v59 = vld [vmem:[#allocation10 + $0x960] sm:$0xff] }
 0x1b5   :  { %2496 = vmatprep.subr.mxu0 %v1818_v3  ;;  %2567 = vmatprep.subr.mxu1 %v1914_v5  ;;  %v4703_v3 = vadd.f32 %v4677_v9, %v195_v50  ;;  %v1994_v5 = vunpack.c.l.bf16 %v1275_v53  ;;  %v223_v9 = vrot.slane %v4675_v8, %v190_v57  ;;  %v1263_v50 = vld [vmem:[#allocation10 + $0x96c] sm:$0xff]  ;;  %v2076_v53 = vunpack.c.h.bf16 %v1329_v39 }
 0x1b6   :  { %2497 = vmatpush2.msra.mxu0 %v1817_v6  ;;  %2568 = vmatpush2.msra.mxu1 %v1913_v7  ;;  %v2090_v6 = vunpack.c.l.bf16 %v1339_v54  ;;  %v787_v7 = vpop.f32.mrf.mxu0  ;;  %v1979_v54 = vunpack.c.l.bf16 %v1265_v38 }
 0x1b7   :  { %2498 = vmatprep.subr.mxu0 %v1815_v12  ;;  %2569 = vmatprep.subr.mxu1 %v1911_v13  ;;  %v2088_v12 = vunpack.c.h.bf16 %v1337_v61  ;;  %v1335_v13 = vld [vmem:[#allocation10 + $0xb1c] sm:$0xff]  ;;  %v4711_v16 = vadd.f32 %v787_v7, %v215_v1  ;;  %v4713_v31 = vadd.f32 %v858_v18, %v223_v9  ;;  %v1976_v1 = vunpack.c.l.bf16 %v1263_v50  ;;  %v1323_v7 = vld [vmem:[#allocation10 + $0xad4] sm:$0xff] }
 0x1b8   :  { %2499 = vmatpush2.msra.mxu0 %v1814_v14  ;;  %2570 = vmatpush2.msra.mxu1 %v1910_v15  ;;  %v2087_v14 = vunpack.c.l.bf16 %v1337_v61  ;;  %v1269_v15 = vld [vmem:[#allocation10 + $0x990] sm:$0xff]  ;;  %v2085_v22 = vunpack.c.h.bf16 %v1335_v13  ;;  %v1325_v61 = vld [vmem:[#allocation10 + $0xae0] sm:$0xff] }
 0x1b9   :  { %2500 = vmatprep.subr.mxu0 %v1812_v20  ;;  %2571 = vmatprep.subr.mxu1 %v1908_v21  ;;  %v1333_v20 = vld [vmem:[#allocation10 + $0xb10] sm:$0xff]  ;;  %v1988_v21 = vunpack.c.l.bf16 %v1271_v10  ;;  %v1974_v10 = vunpack.c.h.bf16 %v1261_v59 }
 0x1ba   :  { %2501 = vmatpush2.msra.mxu0 %v1811_v23  ;;  %2572 = vmatpush2.msra.mxu1 %v1907_v25  ;;  %v2084_v23 = vunpack.c.l.bf16 %v1335_v13  ;;  %v1986_v25 = vunpack.c.h.bf16 %v1269_v15  ;;  %v2082_v57 = vunpack.c.h.bf16 %v1333_v20  ;;  %v2069_v13 = vunpack.c.l.bf16 %v1325_v61 }
 0x1bb   :  { %2502 = vmatprep.subr.mxu0 %v1809_v35  ;;  %2573 = vmatprep.subr.mxu1 %v1905_v37  ;;  %v1985_v35 = vunpack.c.l.bf16 %v1269_v15  ;;  %v2081_v37 = vunpack.c.l.bf16 %v1333_v20  ;;  %v2067_v15 = vunpack.c.h.bf16 %v1323_v7  ;;  %v1255_v20 = vld [vmem:[#allocation10 + $0x93c] sm:$0xff] }
 0x1bc   :  { %2503 = vmatpush2.msra.mxu0 %v1808_v42  ;;  %2574 = vmatpush2.msra.mxu1 %v1904_v45  ;;  %v2079_v42 = vunpack.c.h.bf16 %v1331_v34  ;;  %v1982_v45 = vunpack.c.l.bf16 %v1267_v33 }
 0x1bd   :  { %2504 = vmatprep.subr.mxu0 %v1806_v47  ;;  %2506 = vmatprep.mubr.f32.mxu0 %v4686_v46  ;;  %v2078_v47 = vunpack.c.l.bf16 %v1331_v34  ;;  %v1253_v34 = vld [vmem:[#allocation10 + $0x930] sm:$0xff] }
 0x1be   :  { %2575 = vmatprep.subr.mxu1 %v1902_v51  ;;  %2505 = vmatpush2.msra.mxu0 %v1805_v29  ;;  %v1327_v29 = vld [vmem:[#allocation10 + $0xaec] sm:$0xff]  ;;  %v1980_v51 = vunpack.c.h.bf16 %v1265_v38  ;;  %v1964_v38 = vunpack.c.l.bf16 %v1255_v20 }
 0x1bf   :  { %2576 = vmatpush2.msra.mxu1 %v1901_v56  ;;  %2577 = vmatprep.mubr.f32.mxu1 %v4692_v55  ;;  %v2075_v56 = vunpack.c.l.bf16 %v1329_v39 }
 0x1c0   :  { %2507 = vmatmul.mubr.f32.vlgmr.msra.gmra.mxu0 %v4703_v3  ;;  %2578 = vmatmul.mubr.f32.vlgmr.msra.gmra.mxu1 %v4694_v58 }
 0x1c1   :  { %2584 = vmatprep.subr.mxu0 %v1995_v62  ;;  %2655 = vmatprep.subr.mxu1 %v2091_v63  ;;  %v1977_v62 = vunpack.c.h.bf16 %v1263_v50  ;;  %v2073_v63 = vunpack.c.h.bf16 %v1327_v29  ;;  %v1961_v50 = vunpack.c.l.bf16 %v1253_v34 }
 0x1c2   :  { %2585 = vmatpush1.msra.mxu0 %v1994_v5  ;;  %2656 = vmatpush1.msra.mxu1 %v2090_v6  ;;  %v2072_v5 = vunpack.c.l.bf16 %v1327_v29  ;;  %v1259_v6 = vld [vmem:[#allocation10 + $0x954] sm:$0xff] }
 0x1c3   :  { %2586 = vmatprep.subr.mxu0 %v1992_v11  ;;  %2657 = vmatprep.subr.mxu1 %v2088_v12  ;;  %v2070_v11 = vunpack.c.h.bf16 %v1325_v61  ;;  %v1973_v12 = vunpack.c.l.bf16 %v1261_v59  ;;  %v1971_v9 = vunpack.c.h.bf16 %v1259_v6  ;;  %v1970_v18 = vunpack.c.l.bf16 %v1259_v6 }
 0x1c4   :  { %2587 = vmatpush1.msra.mxu0 %v1991_v48  ;;  %2658 = vmatpush1.msra.mxu1 %v2087_v14  ;;  %v1257_v48 = vld [vmem:[#allocation10 + $0x948] sm:$0xff] }
 0x1c5   :  { %2588 = vmatprep.subr.mxu0 %v1989_v19  ;;  %2648 = vmatprep.mubr.f32.mxu0 %v4711_v16  ;;  %v1321_v14 = vld [vmem:[#allocation10 + $0xac8] sm:$0xff]  ;;  %v2066_v19 = vunpack.c.l.bf16 %v1323_v7 }
 0x1c6   :  { %2659 = vmatprep.subr.mxu1 %v2085_v22  ;;  %2589 = vmatpush1.msra.mxu0 %v1988_v21  ;;  %v1319_v21 = vld [vmem:[#allocation10 + $0xabc] sm:$0xff]  ;;  %v1968_v22 = vunpack.c.h.bf16 %v1257_v48  ;;  %v2063_v33 = vunpack.c.l.bf16 %v1321_v14 }
 0x1c7   :  { %2660 = vmatpush1.msra.mxu1 %v2084_v23  ;;  %2590 = vmatprep.subr.mxu0 %v1986_v25  ;;  %v2064_v23 = vunpack.c.h.bf16 %v1321_v14  ;;  %v1967_v25 = vunpack.c.l.bf16 %v1257_v48  ;;  %v2060_v39 = vunpack.c.l.bf16 %v1319_v21 }
 0x1c8   :  { %2661 = vmatprep.subr.mxu1 %v2082_v57  ;;  %2719 = vmatprep.mubr.f32.mxu1 %v4713_v31  ;;  %v1317_v57 = vld [vmem:[#allocation10 + $0xab0] sm:$0xff] }
 0x1c9   :  { %2591 = vmatpush1.msra.mxu0 %v1985_v35  ;;  %2662 = vmatpush1.msra.mxu1 %v2081_v37  ;;  %v1965_v35 = vunpack.c.h.bf16 %v1255_v20  ;;  %v2061_v37 = vunpack.c.h.bf16 %v1319_v21  ;;  %v2057_v29 = vunpack.c.l.bf16 %v1317_v57 }
 0x1ca   :  { %2592 = vmatprep.subr.mxu0 %v1983_v41  ;;  %2663 = vmatprep.subr.mxu1 %v2079_v42  ;;  %v1251_v41 = vld [vmem:[#allocation10 + $0x924] sm:$0xff] }
 0x1cb   :  { %2593 = vmatpush1.msra.mxu0 %v1982_v45  ;;  %2664 = vmatpush1.msra.mxu1 %v2078_v47  ;;  %v1315_v42 = vld [vmem:[#allocation10 + $0xaa4] sm:$0xff]  ;;  %v1962_v45 = vunpack.c.h.bf16 %v1253_v34  ;;  %v2058_v47 = vunpack.c.h.bf16 %v1317_v57  ;;  %v1958_v59 = vunpack.c.l.bf16 %v1251_v41 }
 0x1cc   :  { %2594 = vmatprep.subr.mxu0 %v1980_v51  ;;  %2665 = vmatprep.subr.mxu1 %v2076_v53  ;;  %v1249_v51 = vld [vmem:[#allocation10 + $0x918] sm:$0xff]  ;;  %v2054_v61 = vunpack.c.l.bf16 %v1315_v42 }
 0x1cd   :  { %2595 = vmatpush1.msra.mxu0 %v1979_v54  ;;  %2666 = vmatpush1.msra.mxu1 %v2075_v56  ;;  %v1313_v53 = vld [vmem:[#allocation10 + $0xa98] sm:$0xff]  ;;  %v1959_v54 = vunpack.c.h.bf16 %v1251_v41  ;;  %v2055_v56 = vunpack.c.h.bf16 %v1315_v42  ;;  %v1955_v6 = vunpack.c.l.bf16 %v1249_v51 }
 0x1ce   :  { %2596 = vmatprep.subr.mxu0 %v1977_v62  ;;  %2667 = vmatprep.subr.mxu1 %v2073_v63  ;;  %v1247_v62 = vld [vmem:[#allocation10 + $0x90c] sm:$0xff]  ;;  %v2051_v7 = vunpack.c.l.bf16 %v1313_v53 }
 0x1cf   :  { %2597 = vmatpush1.msra.mxu0 %v1976_v1  ;;  %2668 = vmatpush1.msra.mxu1 %v2072_v5  ;;  %v1311_v63 = vld [vmem:[#allocation10 + $0xa8c] sm:$0xff]  ;;  %v1956_v1 = vunpack.c.h.bf16 %v1249_v51  ;;  %v2052_v5 = vunpack.c.h.bf16 %v1313_v53  ;;  %v1952_v48 = vunpack.c.l.bf16 %v1247_v62 }
 0x1d0   :  { %2598 = vmatprep.subr.mxu0 %v1974_v10  ;;  %2669 = vmatprep.subr.mxu1 %v2070_v11  ;;  %v1245_v10 = vld [vmem:[#allocation10 + $0x900] sm:$0xff]  ;;  %v2048_v14 = vunpack.c.l.bf16 %v1311_v63 }
 0x1d1   :  { %2599 = vmatpush1.msra.mxu0 %v1973_v12  ;;  %2670 = vmatpush1.msra.mxu1 %v2069_v13  ;;  %v1309_v11 = vld [vmem:[#allocation10 + $0xa80] sm:$0xff]  ;;  %v1953_v12 = vunpack.c.h.bf16 %v1247_v62  ;;  %v2049_v13 = vunpack.c.h.bf16 %v1311_v63  ;;  %v1949_v20 = vunpack.c.l.bf16 %v1245_v10 }
 0x1d2   :  { %2600 = vmatprep.subr.mxu0 %v1971_v9  ;;  %2671 = vmatprep.subr.mxu1 %v2067_v15  ;;  %v1307_v9 = vld [vmem:[#allocation10 + $0xa74] sm:$0xff]  ;;  %v2045_v21 = vunpack.c.l.bf16 %v1309_v11 }
 0x1d3   :  { %2601 = vmatpush1.msra.mxu0 %v1970_v18  ;;  %2672 = vmatpush1.msra.mxu1 %v2066_v19  ;;  %v1371_v15 = vld [vmem:[#allocation10 + $0xbf4] sm:$0xff]  ;;  %v1950_v18 = vunpack.c.h.bf16 %v1245_v10  ;;  %v2046_v19 = vunpack.c.h.bf16 %v1309_v11  ;;  %v2042_v34 = vunpack.c.l.bf16 %v1307_v9 }
 0x1d4   :  { %2602 = vmatprep.subr.mxu0 %v1968_v22  ;;  %2673 = vmatprep.subr.mxu1 %v2064_v23  ;;  %v1305_v22 = vld [vmem:[#allocation10 + $0xa68] sm:$0xff]  ;;  %v2138_v57 = vunpack.c.l.bf16 %v1371_v15 }
 0x1d5   :  { %2603 = vmatpush1.msra.mxu0 %v1967_v25  ;;  %2674 = vmatpush1.msra.mxu1 %v2063_v33  ;;  %v1369_v23 = vld [vmem:[#allocation10 + $0xbe8] sm:$0xff]  ;;  %v2043_v25 = vunpack.c.h.bf16 %v1307_v9  ;;  %v2139_v33 = vunpack.c.h.bf16 %v1371_v15  ;;  %v2039_v41 = vunpack.c.l.bf16 %v1305_v22 }
 0x1d6   :  { %2604 = vmatprep.subr.mxu0 %v1965_v35  ;;  %2675 = vmatprep.subr.mxu1 %v2061_v37  ;;  %v1303_v35 = vld [vmem:[#allocation10 + $0xa5c] sm:$0xff]  ;;  %v2135_v42 = vunpack.c.l.bf16 %v1369_v23 }
 0x1d7   :  { %2605 = vmatpush1.msra.mxu0 %v1964_v38  ;;  %2676 = vmatpush1.msra.mxu1 %v2060_v39  ;;  %v1367_v37 = vld [vmem:[#allocation10 + $0xbdc] sm:$0xff]  ;;  %v2040_v38 = vunpack.c.h.bf16 %v1305_v22  ;;  %v2136_v39 = vunpack.c.h.bf16 %v1369_v23  ;;  %v2036_v51 = vunpack.c.l.bf16 %v1303_v35 }
 0x1d8   :  { %2606 = vmatprep.subr.mxu0 %v1962_v45  ;;  %2677 = vmatprep.subr.mxu1 %v2058_v47  ;;  %v1301_v45 = vld [vmem:[#allocation10 + $0xa50] sm:$0xff]  ;;  %v2132_v53 = vunpack.c.l.bf16 %v1367_v37 }
 0x1d9   :  { %2607 = vmatpush1.msra.mxu0 %v1961_v50  ;;  %2678 = vmatpush1.msra.mxu1 %v2057_v29  ;;  %v1365_v47 = vld [vmem:[#allocation10 + $0xbd0] sm:$0xff]  ;;  %v2037_v50 = vunpack.c.h.bf16 %v1303_v35  ;;  %v2133_v29 = vunpack.c.h.bf16 %v1367_v37  ;;  %v2033_v62 = vunpack.c.l.bf16 %v1301_v45 }
 0x1da   :  { %2608 = vmatprep.subr.mxu0 %v1959_v54  ;;  %2679 = vmatprep.subr.mxu1 %v2055_v56  ;;  %v1299_v54 = vld [vmem:[#allocation10 + $0xa44] sm:$0xff]  ;;  %v2129_v63 = vunpack.c.l.bf16 %v1365_v47 }
 0x1db   :  { %2609 = vmatpush1.msra.mxu0 %v1958_v59  ;;  %2680 = vmatpush1.msra.mxu1 %v2054_v61  ;;  %v1363_v56 = vld [vmem:[#allocation10 + $0xbc4] sm:$0xff]  ;;  %v2034_v59 = vunpack.c.h.bf16 %v1301_v45  ;;  %v2130_v61 = vunpack.c.h.bf16 %v1365_v47  ;;  %v2030_v10 = vunpack.c.l.bf16 %v1299_v54 }
 0x1dc   :  { %2610 = vmatprep.subr.mxu0 %v1956_v1  ;;  %2681 = vmatprep.subr.mxu1 %v2052_v5  ;;  %v1297_v1 = vld [vmem:[#allocation10 + $0xa38] sm:$0xff]  ;;  %v2126_v11 = vunpack.c.l.bf16 %v1363_v56 }
 0x1dd   :  { %2611 = vmatpush1.msra.mxu0 %v1955_v6  ;;  %2682 = vmatpush1.msra.mxu1 %v2051_v7  ;;  %v1361_v5 = vld [vmem:[#allocation10 + $0xbb8] sm:$0xff]  ;;  %v2031_v6 = vunpack.c.h.bf16 %v1299_v54  ;;  %v2127_v7 = vunpack.c.h.bf16 %v1363_v56  ;;  %v2027_v9 = vunpack.c.l.bf16 %v1297_v1 }
 0x1de   :  { %2612 = vmatprep.subr.mxu0 %v1953_v12  ;;  %2683 = vmatprep.subr.mxu1 %v2049_v13  ;;  %v1295_v12 = vld [vmem:[#allocation10 + $0xa2c] sm:$0xff]  ;;  %v2123_v15 = vunpack.c.l.bf16 %v1361_v5 }
 0x1df   :  { %2613 = vmatpush1.msra.mxu0 %v1952_v48  ;;  %2684 = vmatpush1.msra.mxu1 %v2048_v14  ;;  %v1359_v13 = vld [vmem:[#allocation10 + $0xbac] sm:$0xff]  ;;  %v2028_v48 = vunpack.c.h.bf16 %v1297_v1  ;;  %v2124_v14 = vunpack.c.h.bf16 %v1361_v5  ;;  %v2024_v22 = vunpack.c.l.bf16 %v1295_v12 }
 0x1e0   :  { %2614 = vmatprep.subr.mxu0 %v1950_v18  ;;  %2685 = vmatprep.subr.mxu1 %v2046_v19  ;;  %v1293_v18 = vld [vmem:[#allocation10 + $0xa20] sm:$0xff]  ;;  %v2120_v23 = vunpack.c.l.bf16 %v1359_v13 }
 0x1e1   :  { %2615 = vmatpush1.msra.mxu0 %v1949_v20  ;;  %2686 = vmatpush1.msra.mxu1 %v2045_v21  ;;  %v1357_v19 = vld [vmem:[#allocation10 + $0xba0] sm:$0xff]  ;;  %v2025_v20 = vunpack.c.h.bf16 %v1295_v12  ;;  %v2121_v21 = vunpack.c.h.bf16 %v1359_v13  ;;  %v2021_v35 = vunpack.c.l.bf16 %v1293_v18 }
 0x1e2   :  { %2616 = vmatprep.subr.mxu0 %v2043_v25  ;;  %2687 = vmatprep.subr.mxu1 %v2139_v33  ;;  %v1291_v25 = vld [vmem:[#allocation10 + $0xa14] sm:$0xff]  ;;  %v2117_v37 = vunpack.c.l.bf16 %v1357_v19 }
 0x1e3   :  { %2617 = vmatpush2.msra.mxu0 %v2042_v34  ;;  %2688 = vmatpush2.msra.mxu1 %v2138_v57  ;;  %v1355_v33 = vld [vmem:[#allocation10 + $0xb94] sm:$0xff]  ;;  %v2022_v34 = vunpack.c.h.bf16 %v1293_v18  ;;  %v2118_v57 = vunpack.c.h.bf16 %v1357_v19  ;;  %v2018_v45 = vunpack.c.l.bf16 %v1291_v25 }
 0x1e4   :  { %2618 = vmatprep.subr.mxu0 %v2040_v38  ;;  %2689 = vmatprep.subr.mxu1 %v2136_v39  ;;  %v1289_v38 = vld [vmem:[#allocation10 + $0xa08] sm:$0xff]  ;;  %v2114_v47 = vunpack.c.l.bf16 %v1355_v33 }
 0x1e5   :  { %2619 = vmatpush2.msra.mxu0 %v2039_v41  ;;  %2690 = vmatpush2.msra.mxu1 %v2135_v42  ;;  %v1353_v39 = vld [vmem:[#allocation10 + $0xb88] sm:$0xff]  ;;  %v2019_v41 = vunpack.c.h.bf16 %v1291_v25  ;;  %v2115_v42 = vunpack.c.h.bf16 %v1355_v33  ;;  %v2015_v54 = vunpack.c.l.bf16 %v1289_v38 }
 0x1e6   :  { %2620 = vmatprep.subr.mxu0 %v2037_v50  ;;  %2691 = vmatprep.subr.mxu1 %v2133_v29  ;;  %v1287_v50 = vld [vmem:[#allocation10 + $0x9fc] sm:$0xff]  ;;  %v2111_v56 = vunpack.c.l.bf16 %v1353_v39 }
 0x1e7   :  { %2621 = vmatpush2.msra.mxu0 %v2036_v51  ;;  %2692 = vmatpush2.msra.mxu1 %v2132_v53  ;;  %v1351_v29 = vld [vmem:[#allocation10 + $0xb7c] sm:$0xff]  ;;  %v2016_v51 = vunpack.c.h.bf16 %v1289_v38  ;;  %v2112_v53 = vunpack.c.h.bf16 %v1353_v39  ;;  %v2012_v1 = vunpack.c.l.bf16 %v1287_v50 }
 0x1e8   :  { %2622 = vmatprep.subr.mxu0 %v2034_v59  ;;  %2693 = vmatprep.subr.mxu1 %v2130_v61  ;;  %v1285_v59 = vld [vmem:[#allocation10 + $0x9f0] sm:$0xff]  ;;  %v2108_v5 = vunpack.c.l.bf16 %v1351_v29 }
 0x1e9   :  { %2623 = vmatpush2.msra.mxu0 %v2033_v62  ;;  %2694 = vmatpush2.msra.mxu1 %v2129_v63  ;;  %v1349_v61 = vld [vmem:[#allocation10 + $0xb70] sm:$0xff]  ;;  %v2013_v62 = vunpack.c.h.bf16 %v1287_v50  ;;  %v2109_v63 = vunpack.c.h.bf16 %v1351_v29  ;;  %v2009_v12 = vunpack.c.l.bf16 %v1285_v59 }
 0x1ea   :  { %2624 = vmatprep.subr.mxu0 %v2031_v6  ;;  %2695 = vmatprep.subr.mxu1 %v2127_v7  ;;  %v1283_v6 = vld [vmem:[#allocation10 + $0x9e4] sm:$0xff]  ;;  %v2105_v13 = vunpack.c.l.bf16 %v1349_v61  ;;  %v924_v50 = vld [vmem:[#allocation10 + $0x170] ss:$12 sps:$4 sm:$0xff]  }
 0x1eb   :  { %2625 = vmatpush2.msra.mxu0 %v2030_v10  ;;  %2696 = vmatpush2.msra.mxu1 %v2126_v11  ;;  %v1347_v7 = vld [vmem:[#allocation10 + $0xb64] sm:$0xff]  ;;  %v2010_v10 = vunpack.c.h.bf16 %v1285_v59  ;;  %v2106_v11 = vunpack.c.h.bf16 %v1349_v61  ;;  %v2006_v18 = vunpack.c.l.bf16 %v1283_v6  ;;  %v988_v29 = vld [vmem:[#allocation10 + $0x2f0] ss:$12 sps:$4 sm:$0xff]  }
 0x1ec   :  { %2626 = vmatprep.subr.mxu0 %v2028_v48  ;;  %2697 = vmatprep.subr.mxu1 %v2124_v14  ;;  %v1281_v48 = vld [vmem:[#allocation10 + $0x9d8] sm:$0xff]  ;;  %v2102_v19 = vunpack.c.l.bf16 %v1347_v7  ;;  %v1564_v59 = vunpack.c.h.bf16 %v988_v29 }
 0x1ed   :  { %2627 = vmatpush2.msra.mxu0 %v2027_v9  ;;  %2698 = vmatpush2.msra.mxu1 %v2123_v15  ;;  %v1345_v14 = vld [vmem:[#allocation10 + $0xb58] sm:$0xff]  ;;  %v2007_v9 = vunpack.c.h.bf16 %v1283_v6  ;;  %v2103_v15 = vunpack.c.h.bf16 %v1347_v7  ;;  %v2003_v25 = vunpack.c.l.bf16 %v1281_v48  ;;  %v1561_v6 = vunpack.c.l.bf16 %v988_v29 }
 0x1ee   :  { %2628 = vmatprep.subr.mxu0 %v2025_v20  ;;  %2699 = vmatprep.subr.mxu1 %v2121_v21  ;;  %v1279_v20 = vld [vmem:[#allocation10 + $0x9cc] sm:$0xff]  ;;  %v2099_v33 = vunpack.c.l.bf16 %v1345_v14  ;;  %v888_v7 = vld [vmem:[#allocation10 + $0x98] ss:$12 sps:$4 sm:$0xff]  }
 0x1ef   :  { %2629 = vmatpush2.msra.mxu0 %v2024_v22  ;;  %2700 = vmatpush2.msra.mxu1 %v2120_v23  ;;  %v1343_v21 = vld [vmem:[#allocation10 + $0xb4c] sm:$0xff]  ;;  %v2004_v22 = vunpack.c.h.bf16 %v1281_v48  ;;  %v2100_v23 = vunpack.c.h.bf16 %v1345_v14  ;;  %v2000_v38 = vunpack.c.l.bf16 %v1279_v20 }
 0x1f0   :  { %2630 = vmatprep.subr.mxu0 %v2022_v34  ;;  %2701 = vmatprep.subr.mxu1 %v2118_v57  ;;  %v1277_v34 = vld [vmem:[#allocation10 + $0x9c0] sm:$0xff]  ;;  %v2096_v39 = vunpack.c.l.bf16 %v1343_v21  ;;  %v908_v29 = vld [vmem:[#allocation10 + $0x110] ss:$12 sps:$4 sm:$0xff]  }
 0x1f1   :  { %2631 = vmatpush2.msra.mxu0 %v2021_v35  ;;  %2702 = vmatpush2.msra.mxu1 %v2117_v37  ;;  %v1341_v57 = vld [vmem:[#allocation10 + $0xb40] sm:$0xff]  ;;  %v2001_v35 = vunpack.c.h.bf16 %v1279_v20  ;;  %v2097_v37 = vunpack.c.h.bf16 %v1343_v21  ;;  %v1411_v21 = vunpack.c.l.bf16 %v888_v7 }
 0x1f2   :  { %2632 = vmatprep.subr.mxu0 %v2019_v41  ;;  %2703 = vmatprep.subr.mxu1 %v2115_v42  ;;  %v211_v41 = vrot.slane %v4675_v8, %v178_v4  ;;  %v219_v42 = vrot.slane %v4675_v8, %v186_v60  ;;  %v1468_v4 = vunpack.c.h.bf16 %v924_v50  ;;  %v916_v14 = vld [vmem:[#allocation10 + $0x140] ss:$12 sps:$4 sm:$0xff]  }
 0x1f3   :  { %2633 = vmatpush2.msra.mxu0 %v2018_v45  ;;  %2704 = vmatpush2.msra.mxu1 %v2114_v47  ;;  %v1998_v45 = vunpack.c.h.bf16 %v1277_v34  ;;  %v2094_v47 = vunpack.c.h.bf16 %v1341_v57  ;;  %v948_v20 = vld [vmem:[#allocation10 + $0x200] ss:$12 sps:$4 sm:$0xff]  }
 0x1f4   :  { %2634 = vmatprep.subr.mxu0 %v2016_v51  ;;  %2705 = vmatprep.subr.mxu1 %v2112_v53  ;;  %v1997_v51 = vunpack.c.l.bf16 %v1277_v34  ;;  %v2093_v53 = vunpack.c.l.bf16 %v1341_v57  ;;  %v4724_v60 = vadd.f32 %v4690_v52, %v211_v41  ;;  %v4727_v8 = vadd.f32 %v4700_v2, %v219_v42  ;;  %v952_v52 = vld [vmem:[#allocation10 + $0x218] ss:$12 sps:$4 sm:$0xff]   ;;  %v976_v34 = vld [vmem:[#allocation10 + $0x2a8] ss:$12 sps:$4 sm:$0xff]  }
 0x1f5   :  { %2635 = vmatpush2.msra.mxu0 %v2015_v54  ;;  %2706 = vmatpush2.msra.mxu1 %v2111_v56  ;;  %v892_v54 = vld [vmem:[#allocation10 + $0xb0] ss:$12 sps:$4 sm:$0xff]   ;;  %v1510_v48 = vunpack.c.h.bf16 %v952_v52  ;;  %v1453_v57 = vunpack.c.l.bf16 %v916_v14  ;;  %v1501_v41 = vunpack.c.l.bf16 %v948_v20 }
 0x1f6   :  { %2636 = vmatprep.subr.mxu0 %v2013_v62  ;;  %2707 = vmatprep.subr.mxu1 %v2109_v63  ;;  %v956_v56 = vld [vmem:[#allocation10 + $0x230] ss:$12 sps:$4 sm:$0xff]   ;;  %v1420_v61 = vunpack.c.h.bf16 %v892_v54  ;;  %v920_v63 = vld [vmem:[#allocation10 + $0x158] ss:$12 sps:$4 sm:$0xff]   ;;  %v1417_v2 = vunpack.c.l.bf16 %v892_v54  ;;  %v1543_v54 = vunpack.c.l.bf16 %v976_v34 }
 0x1f7   :  { %2637 = vmatpush2.msra.mxu0 %v2012_v1  ;;  %2708 = vmatpush2.msra.mxu1 %v2108_v5  ;;  %v1516_v62 = vunpack.c.h.bf16 %v956_v56  ;;  %v984_v1 = vld [vmem:[#allocation10 + $0x2d8] ss:$12 sps:$4 sm:$0xff]   ;;  %v1465_v5 = vunpack.c.l.bf16 %v924_v50 }
 0x1f8   :  { %2638 = vmatprep.subr.mxu0 %v2010_v10  ;;  %2709 = vmatprep.subr.mxu1 %v2106_v11  ;;  %v1513_v10 = vunpack.c.l.bf16 %v956_v56  ;;  %v1462_v11 = vunpack.c.h.bf16 %v920_v63  ;;  %v876_v56 = vld [vmem:[#allocation10 + $0x50] ss:$12 sps:$4 sm:$0xff]  }
 0x1f9   :  { %2639 = vmatpush2.msra.mxu0 %v2009_v12  ;;  %2710 = vmatpush2.msra.mxu1 %v2105_v13  ;;  %v1558_v12 = vunpack.c.h.bf16 %v984_v1  ;;  %v1414_v13 = vunpack.c.h.bf16 %v888_v7  ;;  %v968_v7 = vld [vmem:[#allocation10 + $0x278] ss:$12 sps:$4 sm:$0xff]  }
 0x1fa   :  { %2640 = vmatprep.subr.mxu0 %v2007_v9  ;;  %2711 = vmatprep.subr.mxu1 %v2103_v15  ;;  %v980_v9 = vld [vmem:[#allocation10 + $0x2c0] ss:$12 sps:$4 sm:$0xff]   ;;  %v1459_v15 = vunpack.c.l.bf16 %v920_v63 }
 0x1fb   :  { %2641 = vmatpush2.msra.mxu0 %v2006_v18  ;;  %2712 = vmatpush2.msra.mxu1 %v2102_v19  ;;  %v1555_v18 = vunpack.c.l.bf16 %v984_v1  ;;  %v884_v19 = vld [vmem:[#allocation10 + $0x80] ss:$12 sps:$4 sm:$0xff]   ;;  %v1396_v1 = vunpack.c.h.bf16 %v876_v56 }
 0x1fc   :  { %2642 = vmatprep.subr.mxu0 %v2004_v22  ;;  %2713 = vmatprep.subr.mxu1 %v2100_v23  ;;  %v1507_v22 = vunpack.c.l.bf16 %v952_v52  ;;  %v1552_v23 = vunpack.c.h.bf16 %v980_v9  ;;  %v1441_v52 = vunpack.c.l.bf16 %v908_v29 }
 0x1fd   :  { %2643 = vmatpush2.msra.mxu0 %v2003_v25  ;;  %2714 = vmatpush2.msra.mxu1 %v2099_v33  ;;  %v1504_v25 = vunpack.c.h.bf16 %v948_v20  ;;  %v912_v33 = vld [vmem:[#allocation10 + $0x128] ss:$12 sps:$4 sm:$0xff]  }
 0x1fe   :  { %2644 = vmatprep.subr.mxu0 %v2001_v35  ;;  %2715 = vmatprep.subr.mxu1 %v2097_v37  ;;  %v1549_v35 = vunpack.c.l.bf16 %v980_v9  ;;  %v880_v37 = vld [vmem:[#allocation10 + $0x68] ss:$12 sps:$4 sm:$0xff]   ;;  %v1450_v42 = vunpack.c.h.bf16 %v912_v33 }
 0x1ff   :  { %2645 = vmatpush2.msra.mxu0 %v2000_v38  ;;  %2716 = vmatpush2.msra.mxu1 %v2096_v39  ;;  %v944_v38 = vld [vmem:[#allocation10 + $0x1e8] ss:$12 sps:$4 sm:$0xff]   ;;  %v1405_v39 = vunpack.c.l.bf16 %v884_v19 }
 0x200   :  { %2646 = vmatprep.subr.mxu0 %v1998_v45  ;;  %2717 = vmatprep.subr.mxu1 %v2094_v47  ;;  %v1546_v45 = vunpack.c.h.bf16 %v976_v34  ;;  %v1402_v47 = vunpack.c.h.bf16 %v880_v37  ;;  %v1498_v50 = vunpack.c.h.bf16 %v944_v38 }
 0x201   :  { %2647 = vmatpush2.msra.mxu0 %v1997_v51  ;;  %2718 = vmatpush2.msra.mxu1 %v2093_v53  ;;  %v972_v51 = vld [vmem:[#allocation10 + $0x290] ss:$12 sps:$4 sm:$0xff]   ;;  %v1447_v53 = vunpack.c.l.bf16 %v912_v33 }
 0x202   :  { %2649 = vmatmul.mubr.f32.vlgmr.msra.gmra.mxu0 %v4724_v60  ;;  %2720 = vmatmul.mubr.f32.vlgmr.msra.gmra.mxu1 %v4727_v8  ;;  %v1540_v63 = vunpack.c.h.bf16 %v972_v51 }
 0x203   :  { %3896 = vmatprep.subr.mxu0 %v1468_v4  ;;  %3931 = vmatprep.subr.mxu1 %v1564_v59  ;;  %v940_v4 = vld [vmem:[#allocation10 + $0x1d0] ss:$12 sps:$4 sm:$0xff]   ;;  %v1399_v59 = vunpack.c.l.bf16 %v880_v37  ;;  %v960_v37 = vld [vmem:[#allocation10 + $0x248] ss:$12 sps:$4 sm:$0xff]  }
 0x204   :  { %3897 = vmatpush3.msra.mxu0 %v1420_v61  ;;  %2790 = vmatprep.mubr.f32.mxu0 %v4634_v43  ;;  %v1456_v43 = vunpack.c.h.bf16 %v916_v14  ;;  %v1495_v61 = vunpack.c.l.bf16 %v944_v38  ;;  %v1534_v14 = vunpack.c.h.bf16 %v968_v7 }
 0x205   :  { %3932 = vmatpush3.msra.mxu1 %v1516_v62  ;;  %2860 = vmatprep.mubr.f32.mxu1 %v4636_v44  ;;  %v1408_v44 = vunpack.c.h.bf16 %v884_v19  ;;  %v1444_v62 = vunpack.c.h.bf16 %v908_v29  ;;  %v964_v19 = vld [vmem:[#allocation10 + $0x260] ss:$12 sps:$4 sm:$0xff]   ;;  %v1522_v29 = vunpack.c.h.bf16 %v960_v37 }
 0x206   :  { %3898 = vmatprep.subr.mxu0 %v1465_v5  ;;  %3933 = vmatprep.subr.mxu1 %v1561_v6  ;;  %v1492_v5 = vunpack.c.h.bf16 %v940_v4  ;;  %v904_v6 = vld [vmem:[#allocation10 + $0xf8] ss:$12 sps:$4 sm:$0xff]   ;;  %v1528_v33 = vunpack.c.h.bf16 %v964_v19 }
 0x207   :  { %3899 = vmatpush3.msra.mxu0 %v1417_v2  ;;  %3934 = vmatpush3.msra.mxu1 %v1513_v10  ;;  %v1537_v2 = vunpack.c.l.bf16 %v972_v51  ;;  %v872_v10 = vld [vmem:[#allocation10 + $0x38] ss:$12 sps:$4 sm:$0xff]   ;;  %v1435_v20 = vunpack.c.l.bf16 %v904_v6 }
 0x208   :  { %3900 = vmatprep.subr.mxu0 %v1462_v11  ;;  %3935 = vmatprep.subr.mxu1 %v1558_v12  ;;  %v936_v11 = vld [vmem:[#allocation10 + $0x1b8] ss:$12 sps:$4 sm:$0xff]   ;;  %v1393_v12 = vunpack.c.l.bf16 %v876_v56  ;;  %v1390_v9 = vunpack.c.h.bf16 %v872_v10  ;;  %v1519_v56 = vunpack.c.l.bf16 %v960_v37 }
 0x209   :  { %3901 = vmatpush3.msra.mxu0 %v1414_v13  ;;  %3936 = vmatpush3.msra.mxu1 %v1510_v48  ;;  %v1489_v13 = vunpack.c.l.bf16 %v940_v4  ;;  %v1438_v48 = vunpack.c.h.bf16 %v904_v6  ;;  %v1052_v4 = vld [vmem:[#allocation10 + $0x470] ss:$12 sps:$4 sm:$0xff]  }
 0x20a   :  { %3902 = vmatprep.subr.mxu0 %v1459_v15  ;;  %3937 = vmatprep.subr.mxu1 %v1555_v18  ;;  %v1486_v15 = vunpack.c.h.bf16 %v936_v11  ;;  %v900_v18 = vld [vmem:[#allocation10 + $0xe0] ss:$12 sps:$4 sm:$0xff]  }
 0x20b   :  { %3903 = vmatpush3.msra.mxu0 %v1411_v21  ;;  %3938 = vmatpush3.msra.mxu1 %v1507_v22  ;;  %v1531_v21 = vunpack.c.l.bf16 %v968_v7  ;;  %v868_v22 = vld [vmem:[#allocation10 + $0x20] ss:$12 sps:$4 sm:$0xff]   ;;  %v1429_v38 = vunpack.c.l.bf16 %v900_v18 }
 0x20c   :  { %3904 = vmatprep.subr.mxu0 %v1456_v43  ;;  %3939 = vmatprep.subr.mxu1 %v1552_v23  ;;  %v932_v43 = vld [vmem:[#allocation10 + $0x1a0] ss:$12 sps:$4 sm:$0xff]   ;;  %v1387_v23 = vunpack.c.l.bf16 %v872_v10  ;;  %v1384_v34 = vunpack.c.h.bf16 %v868_v22  ;;  %v1112_v10 = vld [vmem:[#allocation10 + $0x5d8] ss:$12 sps:$4 sm:$0xff]  }
 0x20d   :  { %3905 = vmatpush3.msra.mxu0 %v1408_v44  ;;  %3940 = vmatpush3.msra.mxu1 %v1504_v25  ;;  %v1483_v44 = vunpack.c.l.bf16 %v936_v11  ;;  %v1432_v25 = vunpack.c.h.bf16 %v900_v18  ;;  %v1657_v11 = vunpack.c.l.bf16 %v1052_v4  ;;  %v1750_v18 = vunpack.c.h.bf16 %v1112_v10 }
 0x20e   :  { %3906 = vmatprep.subr.mxu0 %v1453_v57  ;;  %3941 = vmatprep.subr.mxu1 %v1549_v35  ;;  %v1480_v57 = vunpack.c.h.bf16 %v932_v43  ;;  %v896_v35 = vld [vmem:[#allocation10 + $0xc8] ss:$12 sps:$4 sm:$0xff]  }
 0x20f   :  { %3907 = vmatpush3.msra.mxu0 %v1405_v39  ;;  %3942 = vmatpush3.msra.mxu1 %v1501_v41  ;;  %v1525_v39 = vunpack.c.l.bf16 %v964_v19  ;;  %v864_v41 = vld [vmem:[#allocation10 + $0x8] ss:$12 sps:$4 sm:$0xff]  }
 0x210   :  { %3908 = vmatprep.subr.mxu0 %v1450_v42  ;;  %3943 = vmatprep.subr.mxu1 %v1546_v45  ;;  %v928_v42 = vld [vmem:[#allocation10 + $0x188] ss:$12 sps:$4 sm:$0xff]   ;;  %v1381_v45 = vunpack.c.l.bf16 %v868_v22  ;;  %v1378_v51 = vunpack.c.h.bf16 %v864_v41  ;;  %v1747_v22 = vunpack.c.l.bf16 %v1112_v10 }
 0x211   :  { %3909 = vmatpush3.msra.mxu0 %v1402_v47  ;;  %3944 = vmatpush3.msra.mxu1 %v1498_v50  ;;  %v1477_v47 = vunpack.c.l.bf16 %v932_v43  ;;  %v1426_v50 = vunpack.c.h.bf16 %v896_v35  ;;  %v1012_v43 = vld [vmem:[#allocation10 + $0x380] ss:$12 sps:$4 sm:$0xff]  }
 0x212   :  { %3910 = vmatprep.subr.mxu0 %v1447_v53  ;;  %3945 = vmatprep.subr.mxu1 %v1543_v54  ;;  %v1474_v53 = vunpack.c.h.bf16 %v928_v42  ;;  %v1423_v54 = vunpack.c.l.bf16 %v896_v35  ;;  %v1104_v35 = vld [vmem:[#allocation10 + $0x5a8] ss:$12 sps:$4 sm:$0xff]  }
 0x213   :  { %3911 = vmatpush3.msra.mxu0 %v1399_v59  ;;  %3946 = vmatpush3.msra.mxu1 %v1495_v61  ;;  %v1116_v59 = vld [vmem:[#allocation10 + $0x5f0] ss:$12 sps:$4 sm:$0xff]   ;;  %v1375_v61 = vunpack.c.l.bf16 %v864_v41  ;;  %v1072_v41 = vld [vmem:[#allocation10 + $0x4e8] ss:$12 sps:$4 sm:$0xff]  }
 0x214   :  { %3912 = vmatprep.subr.mxu0 %v1444_v62  ;;  %3947 = vmatprep.subr.mxu1 %v1540_v63  ;;  %v1471_v62 = vunpack.c.l.bf16 %v928_v42  ;;  %v1020_v63 = vld [vmem:[#allocation10 + $0x3b0] ss:$12 sps:$4 sm:$0xff]   ;;  %v1756_v6 = vunpack.c.h.bf16 %v1116_v59  ;;  %v1597_v42 = vunpack.c.l.bf16 %v1012_v43 }
 0x215   :  { %3913 = vmatpush3.msra.mxu0 %v1396_v1  ;;  %3948 = vmatpush3.msra.mxu1 %v1492_v5  ;;  %v1084_v1 = vld [vmem:[#allocation10 + $0x530] ss:$12 sps:$4 sm:$0xff]   ;;  %v1660_v5 = vunpack.c.h.bf16 %v1052_v4  ;;  %v1612_v7 = vunpack.c.h.bf16 %v1020_v63  ;;  %v1735_v4 = vunpack.c.l.bf16 %v1104_v35 }
 0x216   :  { %3914 = vmatprep.subr.mxu0 %v1441_v52  ;;  %3949 = vmatprep.subr.mxu1 %v1537_v2  ;;  %v1708_v52 = vunpack.c.h.bf16 %v1084_v1  ;;  %v1048_v2 = vld [vmem:[#allocation10 + $0x458] ss:$12 sps:$4 sm:$0xff]  }
 0x217   :  { %3915 = vmatpush3.msra.mxu0 %v1393_v12  ;;  %3950 = vmatpush3.msra.mxu1 %v1489_v13  ;;  %v1753_v12 = vunpack.c.l.bf16 %v1116_v59  ;;  %v1016_v13 = vld [vmem:[#allocation10 + $0x398] ss:$12 sps:$4 sm:$0xff]   ;;  %v1004_v59 = vld [vmem:[#allocation10 + $0x350] ss:$12 sps:$4 sm:$0xff]  }
 0x218   :  { %3916 = vmatprep.subr.mxu0 %v1438_v48  ;;  %3951 = vmatprep.subr.mxu1 %v1534_v14  ;;  %v1080_v48 = vld [vmem:[#allocation10 + $0x518] ss:$12 sps:$4 sm:$0xff]   ;;  %v1609_v14 = vunpack.c.l.bf16 %v1020_v63  ;;  %v1606_v19 = vunpack.c.h.bf16 %v1016_v13  ;;  %v1687_v63 = vunpack.c.l.bf16 %v1072_v41 }
 0x219   :  { %3917 = vmatpush3.msra.mxu0 %v1390_v9  ;;  %3952 = vmatpush3.msra.mxu1 %v1486_v15  ;;  %v1705_v9 = vunpack.c.l.bf16 %v1084_v1  ;;  %v1654_v15 = vunpack.c.h.bf16 %v1048_v2 }
 0x21a   :  { %3918 = vmatprep.subr.mxu0 %v1435_v20  ;;  %3953 = vmatprep.subr.mxu1 %v1531_v21  ;;  %v1044_v20 = vld [vmem:[#allocation10 + $0x440] ss:$12 sps:$4 sm:$0xff]   ;;  %v1651_v21 = vunpack.c.l.bf16 %v1048_v2  ;;  %v1096_v2 = vld [vmem:[#allocation10 + $0x578] ss:$12 sps:$4 sm:$0xff]  }
 0x21b   :  { %3919 = vmatpush3.msra.mxu0 %v1387_v23  ;;  %3954 = vmatpush3.msra.mxu1 %v1483_v44  ;;  %v1076_v23 = vld [vmem:[#allocation10 + $0x500] ss:$12 sps:$4 sm:$0xff]   ;;  %v1603_v44 = vunpack.c.l.bf16 %v1016_v13  ;;  %v1645_v37 = vunpack.c.l.bf16 %v1044_v20  ;;  %v1064_v13 = vld [vmem:[#allocation10 + $0x4b8] ss:$12 sps:$4 sm:$0xff]  }
 0x21c   :  { %3920 = vmatprep.subr.mxu0 %v1432_v25  ;;  %3955 = vmatprep.subr.mxu1 %v1528_v33  ;;  %v1699_v25 = vunpack.c.l.bf16 %v1080_v48 }
 0x21d   :  { %3921 = vmatpush3.msra.mxu0 %v1384_v34  ;;  %3956 = vmatpush3.msra.mxu1 %v1480_v57  ;;  %v1696_v34 = vunpack.c.h.bf16 %v1076_v23  ;;  %v1040_v57 = vld [vmem:[#allocation10 + $0x428] ss:$12 sps:$4 sm:$0xff]  }
 0x21e   :  { %3922 = vmatprep.subr.mxu0 %v1429_v38  ;;  %3957 = vmatprep.subr.mxu1 %v1525_v39  ;;  %v1008_v39 = vld [vmem:[#allocation10 + $0x368] ss:$12 sps:$4 sm:$0xff]  }
 0x21f   :  { %3923 = vmatpush3.msra.mxu0 %v1381_v45  ;;  %3958 = vmatpush3.msra.mxu1 %v1477_v47  ;;  %v1693_v45 = vunpack.c.l.bf16 %v1076_v23  ;;  %v1642_v47 = vunpack.c.h.bf16 %v1040_v57 }
 0x220   :  { %3924 = vmatprep.subr.mxu0 %v1426_v50  ;;  %3959 = vmatprep.subr.mxu1 %v1522_v29  ;;  %v1738_v50 = vunpack.c.h.bf16 %v1104_v35  ;;  %v1594_v29 = vunpack.c.h.bf16 %v1008_v39 }
 0x221   :  { %3925 = vmatpush3.msra.mxu0 %v1378_v51  ;;  %3960 = vmatpush3.msra.mxu1 %v1474_v53  ;;  %v1690_v51 = vunpack.c.h.bf16 %v1072_v41  ;;  %v1036_v53 = vld [vmem:[#allocation10 + $0x410] ss:$12 sps:$4 sm:$0xff]  }
 0x222   :  { %3926 = vmatprep.subr.mxu0 %v1423_v54  ;;  %3961 = vmatprep.subr.mxu1 %v1519_v56  ;;  %v1100_v54 = vld [vmem:[#allocation10 + $0x590] ss:$12 sps:$4 sm:$0xff]   ;;  %v1639_v56 = vunpack.c.l.bf16 %v1040_v57  ;;  %v1636_v1 = vunpack.c.h.bf16 %v1036_v53  ;;  %v1633_v10 = vunpack.c.l.bf16 %v1036_v53  ;;  %v1088_v57 = vld [vmem:[#allocation10 + $0x548] ss:$12 sps:$4 sm:$0xff]  }
 0x223   :  { %3927 = vmatpush3.msra.mxu0 %v1375_v61  ;;  %3962 = vmatpush3.msra.mxu1 %v1471_v62  ;;  %v1068_v61 = vld [vmem:[#allocation10 + $0x4d0] ss:$12 sps:$4 sm:$0xff]   ;;  %v1591_v62 = vunpack.c.l.bf16 %v1008_v39  ;;  %v1056_v39 = vld [vmem:[#allocation10 + $0x488] ss:$12 sps:$4 sm:$0xff]   ;;  %v1711_v53 = vunpack.c.l.bf16 %v1088_v57 }
 0x224   :  { %2791 = vmatmul.mubr.f32.vlgmr.msra.gmra.mxu0 %v4638_v49  ;;  %2861 = vmatmul.mubr.f32.vlgmr.msra.gmra.mxu1 %v4632_v40  ;;  %v1702_v49 = vunpack.c.h.bf16 %v1080_v48  ;;  %v1108_v40 = vld [vmem:[#allocation10 + $0x5c0] ss:$12 sps:$4 sm:$0xff]   ;;  %v1585_v48 = vunpack.c.l.bf16 %v1004_v59 }
 0x225   :  { %3966 = vmatprep.subr.mxu0 %v1660_v5  ;;  %4001 = vmatprep.subr.mxu1 %v1756_v6  ;;  %v1744_v33 = vunpack.c.h.bf16 %v1108_v40  ;;  %v1741_v38 = vunpack.c.l.bf16 %v1108_v40  ;;  %v1732_v5 = vunpack.c.h.bf16 %v1100_v54  ;;  %v1588_v6 = vunpack.c.h.bf16 %v1004_v59 }
 0x226   :  { %3967 = vmatpush3.msra.mxu0 %v1612_v7  ;;  %2930 = vmatprep.mubr.f32.mxu0 %v4659_v17  ;;  %v1648_v17 = vunpack.c.h.bf16 %v1044_v20  ;;  %v1684_v7 = vunpack.c.h.bf16 %v1068_v61  ;;  %v1092_v20 = vld [vmem:[#allocation10 + $0x560] ss:$12 sps:$4 sm:$0xff]   ;;  %v1663_v59 = vunpack.c.l.bf16 %v1056_v39 }
 0x227   :  { %4002 = vmatpush3.msra.mxu1 %v1708_v52  ;;  %3000 = vmatprep.mubr.f32.mxu1 %v4664_v24  ;;  %v1600_v24 = vunpack.c.h.bf16 %v1012_v43  ;;  %v1032_v52 = vld [vmem:[#allocation10 + $0x3f8] ss:$12 sps:$4 sm:$0xff]   ;;  %v1060_v43 = vld [vmem:[#allocation10 + $0x4a0] ss:$12 sps:$4 sm:$0xff]  }
 0x228   :  { %3968 = vmatprep.subr.mxu0 %v1657_v11  ;;  %4003 = vmatprep.subr.mxu1 %v1753_v12  ;;  %v1729_v11 = vunpack.c.l.bf16 %v1100_v54  ;;  %v1000_v12 = vld [vmem:[#allocation10 + $0x338] ss:$12 sps:$4 sm:$0xff]   ;;  %v1627_v40 = vunpack.c.l.bf16 %v1032_v52  ;;  %v1180_v54 = vld [vmem:[#allocation10 + $0x770] ss:$12 sps:$4 sm:$0xff]  }
 0x229   :  { %3969 = vmatpush3.msra.mxu0 %v1609_v14  ;;  %4004 = vmatpush3.msra.mxu1 %v1705_v9  ;;  %v1681_v14 = vunpack.c.l.bf16 %v1068_v61  ;;  %v1630_v9 = vunpack.c.h.bf16 %v1032_v52  ;;  %v1579_v23 = vunpack.c.l.bf16 %v1000_v12  ;;  %v1148_v61 = vld [vmem:[#allocation10 + $0x6b0] ss:$12 sps:$4 sm:$0xff]   ;;  %v1240_v52 = vld [vmem:[#allocation10 + $0x8d8] ss:$12 sps:$4 sm:$0xff]  }
 0x22a   :  { %3970 = vmatprep.subr.mxu0 %v1654_v15  ;;  %4005 = vmatprep.subr.mxu1 %v1750_v18  ;;  %v1726_v15 = vunpack.c.h.bf16 %v1096_v2  ;;  %v1582_v18 = vunpack.c.h.bf16 %v1000_v12  ;;  %v1208_v12 = vld [vmem:[#allocation10 + $0x818] ss:$12 sps:$4 sm:$0xff]  }
 0x22b   :  { %3971 = vmatpush3.msra.mxu0 %v1606_v19  ;;  %4006 = vmatpush3.msra.mxu1 %v1702_v49  ;;  %v1678_v19 = vunpack.c.h.bf16 %v1064_v13  ;;  %v1028_v49 = vld [vmem:[#allocation10 + $0x3e0] ss:$12 sps:$4 sm:$0xff]  }
 0x22c   :  { %3972 = vmatprep.subr.mxu0 %v1651_v21  ;;  %4007 = vmatprep.subr.mxu1 %v1747_v22  ;;  %v1723_v21 = vunpack.c.l.bf16 %v1096_v2  ;;  %v996_v22 = vld [vmem:[#allocation10 + $0x320] ss:$12 sps:$4 sm:$0xff]   ;;  %v1621_v35 = vunpack.c.l.bf16 %v1028_v49  ;;  %v1849_v2 = vunpack.c.l.bf16 %v1180_v54 }
 0x22d   :  { %3973 = vmatpush3.msra.mxu0 %v1603_v44  ;;  %4008 = vmatpush3.msra.mxu1 %v1699_v25  ;;  %v1675_v44 = vunpack.c.l.bf16 %v1064_v13  ;;  %v1624_v25 = vunpack.c.h.bf16 %v1028_v49  ;;  %v1573_v41 = vunpack.c.l.bf16 %v996_v22  ;;  %v1801_v13 = vunpack.c.l.bf16 %v1148_v61 }
 0x22e   :  { %3974 = vmatprep.subr.mxu0 %v1648_v17  ;;  %4009 = vmatprep.subr.mxu1 %v1744_v33  ;;  %v1720_v17 = vunpack.c.h.bf16 %v1092_v20  ;;  %v1576_v33 = vunpack.c.h.bf16 %v996_v22  ;;  %v1939_v49 = vunpack.c.l.bf16 %v1240_v52  ;;  %v1891_v22 = vunpack.c.l.bf16 %v1208_v12 }
 0x22f   :  { %3975 = vmatpush3.msra.mxu0 %v1600_v24  ;;  %4010 = vmatpush3.msra.mxu1 %v1696_v34  ;;  %v1672_v24 = vunpack.c.h.bf16 %v1060_v43  ;;  %v1024_v34 = vld [vmem:[#allocation10 + $0x3c8] ss:$12 sps:$4 sm:$0xff]  }
 0x230   :  { %3976 = vmatprep.subr.mxu0 %v1645_v37  ;;  %4011 = vmatprep.subr.mxu1 %v1741_v38  ;;  %v1717_v37 = vunpack.c.l.bf16 %v1092_v20  ;;  %v992_v38 = vld [vmem:[#allocation10 + $0x308] ss:$12 sps:$4 sm:$0xff]   ;;  %v1140_v20 = vld [vmem:[#allocation10 + $0x680] ss:$12 sps:$4 sm:$0xff]  }
 0x231   :  { %3977 = vmatpush3.msra.mxu0 %v1597_v42  ;;  %4012 = vmatpush3.msra.mxu1 %v1693_v45  ;;  %v1669_v42 = vunpack.c.l.bf16 %v1060_v43  ;;  %v1618_v45 = vunpack.c.h.bf16 %v1024_v34 }
 0x232   :  { %3978 = vmatprep.subr.mxu0 %v1642_v47  ;;  %4013 = vmatprep.subr.mxu1 %v1738_v50  ;;  %v1714_v47 = vunpack.c.h.bf16 %v1088_v57  ;;  %v1570_v50 = vunpack.c.h.bf16 %v992_v38  ;;  %v1789_v57 = vunpack.c.l.bf16 %v1140_v20 }
 0x233   :  { %3979 = vmatpush3.msra.mxu0 %v1594_v29  ;;  %4014 = vmatpush3.msra.mxu1 %v1690_v51  ;;  %v1666_v29 = vunpack.c.h.bf16 %v1056_v39  ;;  %v1615_v51 = vunpack.c.l.bf16 %v1024_v34  ;;  %v1200_v34 = vld [vmem:[#allocation10 + $0x7e8] ss:$12 sps:$4 sm:$0xff]  }
 0x234   :  { %3980 = vmatprep.subr.mxu0 %v1639_v56  ;;  %4015 = vmatprep.subr.mxu1 %v1735_v4  ;;  %v1244_v56 = vld [vmem:[#allocation10 + $0x8f0] ss:$12 sps:$4 sm:$0xff]   ;;  %v1567_v4 = vunpack.c.l.bf16 %v992_v38 }
 0x235   :  { %3981 = vmatpush3.msra.mxu0 %v1591_v62  ;;  %4016 = vmatpush3.msra.mxu1 %v1687_v63  ;;  %v1212_v62 = vld [vmem:[#allocation10 + $0x830] ss:$12 sps:$4 sm:$0xff]   ;;  %v1852_v63 = vunpack.c.h.bf16 %v1180_v54  ;;  %v1879_v54 = vunpack.c.l.bf16 %v1200_v34 }
 0x236   :  { %3982 = vmatprep.subr.mxu0 %v1636_v1  ;;  %4017 = vmatprep.subr.mxu1 %v1732_v5  ;;  %v1948_v1 = vunpack.c.h.bf16 %v1244_v56  ;;  %v1804_v5 = vunpack.c.h.bf16 %v1148_v61 }
 0x237   :  { %3983 = vmatpush3.msra.mxu0 %v1588_v6  ;;  %4018 = vmatpush3.msra.mxu1 %v1684_v7  ;;  %v1900_v6 = vunpack.c.h.bf16 %v1212_v62  ;;  %v1176_v7 = vld [vmem:[#allocation10 + $0x758] ss:$12 sps:$4 sm:$0xff]  }
 0x238   :  { %3984 = vmatprep.subr.mxu0 %v1633_v10  ;;  %4019 = vmatprep.subr.mxu1 %v1729_v11  ;;  %v1945_v10 = vunpack.c.l.bf16 %v1244_v56  ;;  %v1144_v11 = vld [vmem:[#allocation10 + $0x698] ss:$12 sps:$4 sm:$0xff]  }
 0x239   :  { %3985 = vmatpush3.msra.mxu0 %v1585_v48  ;;  %4020 = vmatpush3.msra.mxu1 %v1681_v14  ;;  %v1897_v48 = vunpack.c.l.bf16 %v1212_v62  ;;  %v1846_v14 = vunpack.c.h.bf16 %v1176_v7  ;;  %v1160_v62 = vld [vmem:[#allocation10 + $0x6f8] ss:$12 sps:$4 sm:$0xff]  }
 0x23a   :  { %3986 = vmatprep.subr.mxu0 %v1630_v9  ;;  %4021 = vmatprep.subr.mxu1 %v1726_v15  ;;  %v1942_v9 = vunpack.c.h.bf16 %v1240_v52  ;;  %v1798_v15 = vunpack.c.h.bf16 %v1144_v11 }
 0x23b   :  { %3987 = vmatpush3.msra.mxu0 %v1582_v18  ;;  %4022 = vmatpush3.msra.mxu1 %v1678_v19  ;;  %v1172_v18 = vld [vmem:[#allocation10 + $0x740] ss:$12 sps:$4 sm:$0xff]   ;;  %v1843_v19 = vunpack.c.l.bf16 %v1176_v7  ;;  %v1192_v7 = vld [vmem:[#allocation10 + $0x7b8] ss:$12 sps:$4 sm:$0xff]  }
 0x23c   :  { %3988 = vmatprep.subr.mxu0 %v1627_v40  ;;  %4023 = vmatprep.subr.mxu1 %v1723_v21  ;;  %v1204_v40 = vld [vmem:[#allocation10 + $0x800] ss:$12 sps:$4 sm:$0xff]   ;;  %v1795_v21 = vunpack.c.l.bf16 %v1144_v11 }
 0x23d   :  { %3989 = vmatpush3.msra.mxu0 %v1579_v23  ;;  %4024 = vmatpush3.msra.mxu1 %v1675_v44  ;;  %v1888_v23 = vunpack.c.h.bf16 %v1204_v40  ;;  %v1168_v44 = vld [vmem:[#allocation10 + $0x728] ss:$12 sps:$4 sm:$0xff]  }
 0x23e   :  { %3990 = vmatprep.subr.mxu0 %v1624_v25  ;;  %4025 = vmatprep.subr.mxu1 %v1720_v17  ;;  %v1232_v25 = vld [vmem:[#allocation10 + $0x8a8] ss:$12 sps:$4 sm:$0xff]   ;;  %v1837_v17 = vunpack.c.l.bf16 %v1172_v18 }
 0x23f   :  { %3991 = vmatpush3.msra.mxu0 %v1576_v33  ;;  %4026 = vmatpush3.msra.mxu1 %v1672_v24  ;;  %v1136_v24 = vld [vmem:[#allocation10 + $0x668] ss:$12 sps:$4 sm:$0xff]   ;;  %v1930_v38 = vunpack.c.h.bf16 %v1232_v25 }
 0x240   :  { %3992 = vmatprep.subr.mxu0 %v1621_v35  ;;  %4027 = vmatprep.subr.mxu1 %v1717_v37  ;;  %v1885_v35 = vunpack.c.l.bf16 %v1204_v40  ;;  %v1834_v37 = vunpack.c.h.bf16 %v1168_v44  ;;  %v1786_v39 = vunpack.c.h.bf16 %v1136_v24 }
 0x241   :  { %3993 = vmatpush3.msra.mxu0 %v1573_v41  ;;  %4028 = vmatpush3.msra.mxu1 %v1669_v42  ;;  %v1882_v41 = vunpack.c.h.bf16 %v1200_v34  ;;  %v1164_v42 = vld [vmem:[#allocation10 + $0x710] ss:$12 sps:$4 sm:$0xff]  }
 0x242   :  { %3994 = vmatprep.subr.mxu0 %v1618_v45  ;;  %4029 = vmatprep.subr.mxu1 %v1714_v47  ;;  %v1228_v45 = vld [vmem:[#allocation10 + $0x890] ss:$12 sps:$4 sm:$0xff]   ;;  %v1831_v47 = vunpack.c.l.bf16 %v1168_v44  ;;  %v1828_v56 = vunpack.c.h.bf16 %v1164_v42  ;;  %v1184_v44 = vld [vmem:[#allocation10 + $0x788] ss:$12 sps:$4 sm:$0xff]  }
 0x243   :  { %3995 = vmatpush3.msra.mxu0 %v1570_v50  ;;  %4030 = vmatpush3.msra.mxu1 %v1666_v29  ;;  %v1927_v50 = vunpack.c.l.bf16 %v1232_v25  ;;  %v1132_v29 = vld [vmem:[#allocation10 + $0x650] ss:$12 sps:$4 sm:$0xff]  }
 0x244   :  { %3996 = vmatprep.subr.mxu0 %v1615_v51  ;;  %4031 = vmatprep.subr.mxu1 %v1711_v53  ;;  %v1196_v51 = vld [vmem:[#allocation10 + $0x7d0] ss:$12 sps:$4 sm:$0xff]   ;;  %v1783_v53 = vunpack.c.l.bf16 %v1136_v24  ;;  %v1777_v52 = vunpack.c.l.bf16 %v1132_v29 }
 0x245   :  { %3997 = vmatpush3.msra.mxu0 %v1567_v4  ;;  %4032 = vmatpush3.msra.mxu1 %v1663_v59  ;;  %v1924_v4 = vunpack.c.h.bf16 %v1228_v45  ;;  %v1780_v59 = vunpack.c.h.bf16 %v1132_v29  ;;  %v1876_v61 = vunpack.c.h.bf16 %v1196_v51 }
 0x246   :  { %2931 = vmatmul.mubr.f32.vlgmr.msra.gmra.mxu0 %v4670_v36  ;;  %3001 = vmatmul.mubr.f32.vlgmr.msra.gmra.mxu1 %v4666_v32  ;;  %v1894_v36 = vunpack.c.h.bf16 %v1208_v12  ;;  %v1236_v32 = vld [vmem:[#allocation10 + $0x8c0] ss:$12 sps:$4 sm:$0xff]  }
 0x247   :  { %4036 = vmatprep.subr.mxu0 %v1852_v63  ;;  %4071 = vmatprep.subr.mxu1 %v1948_v1  ;;  %v1936_v43 = vunpack.c.h.bf16 %v1236_v32  ;;  %v1933_v33 = vunpack.c.l.bf16 %v1236_v32  ;;  %v1224_v63 = vld [vmem:[#allocation10 + $0x878] ss:$12 sps:$4 sm:$0xff]   ;;  %v1825_v1 = vunpack.c.l.bf16 %v1164_v42  ;;  %v1855_v42 = vunpack.c.l.bf16 %v1184_v44 }
 0x248   :  { %4037 = vmatpush3.msra.mxu0 %v1804_v5  ;;  %3070 = vmatprep.mubr.f32.mxu0 %v4686_v46  ;;  %v1840_v46 = vunpack.c.h.bf16 %v1172_v18  ;;  %v1921_v5 = vunpack.c.l.bf16 %v1228_v45  ;;  %v1918_v11 = vunpack.c.h.bf16 %v1224_v63  ;;  %v1188_v18 = vld [vmem:[#allocation10 + $0x7a0] ss:$12 sps:$4 sm:$0xff]   ;;  %v1276_v45 = vld [vmem:[#allocation10 + $0x9b0] ss:$12 sps:$4 sm:$0xff]  }
 0x249   :  { %4072 = vmatpush3.msra.mxu1 %v1900_v6  ;;  %3140 = vmatprep.mubr.f32.mxu1 %v4692_v55  ;;  %v1792_v55 = vunpack.c.h.bf16 %v1140_v20  ;;  %v1128_v6 = vld [vmem:[#allocation10 + $0x638] ss:$12 sps:$4 sm:$0xff]  }
 0x24a   :  { %4038 = vmatprep.subr.mxu0 %v1849_v2  ;;  %4073 = vmatprep.subr.mxu1 %v1945_v10  ;;  %v1873_v2 = vunpack.c.l.bf16 %v1196_v51  ;;  %v1822_v10 = vunpack.c.h.bf16 %v1160_v62  ;;  %v1774_v12 = vunpack.c.h.bf16 %v1128_v6  ;;  %v1771_v32 = vunpack.c.l.bf16 %v1128_v6 }
 0x24b   :  { %4039 = vmatpush3.msra.mxu0 %v1801_v13  ;;  %4074 = vmatpush3.msra.mxu1 %v1897_v48  ;;  %v1870_v13 = vunpack.c.h.bf16 %v1192_v7  ;;  %v1156_v48 = vld [vmem:[#allocation10 + $0x6e0] ss:$12 sps:$4 sm:$0xff]   ;;  %v1996_v51 = vunpack.c.h.bf16 %v1276_v45 }
 0x24c   :  { %4040 = vmatprep.subr.mxu0 %v1846_v14  ;;  %4075 = vmatprep.subr.mxu1 %v1942_v9  ;;  %v1220_v14 = vld [vmem:[#allocation10 + $0x860] ss:$12 sps:$4 sm:$0xff]   ;;  %v1819_v9 = vunpack.c.l.bf16 %v1160_v62  ;;  %v1336_v62 = vld [vmem:[#allocation10 + $0xb18] ss:$12 sps:$4 sm:$0xff]  }
 0x24d   :  { %4041 = vmatpush3.msra.mxu0 %v1798_v15  ;;  %4076 = vmatpush3.msra.mxu1 %v1894_v36  ;;  %v1915_v15 = vunpack.c.l.bf16 %v1224_v63  ;;  %v1124_v36 = vld [vmem:[#allocation10 + $0x620] ss:$12 sps:$4 sm:$0xff]   ;;  %v1912_v20 = vunpack.c.h.bf16 %v1220_v14  ;;  %v1993_v63 = vunpack.c.l.bf16 %v1276_v45 }
 0x24e   :  { %4042 = vmatprep.subr.mxu0 %v1843_v19  ;;  %4077 = vmatprep.subr.mxu1 %v1939_v49  ;;  %v1867_v19 = vunpack.c.l.bf16 %v1192_v7  ;;  %v1816_v49 = vunpack.c.h.bf16 %v1156_v48  ;;  %v1768_v40 = vunpack.c.h.bf16 %v1124_v36  ;;  %v1765_v25 = vunpack.c.l.bf16 %v1124_v36  ;;  %v1360_v36 = vld [vmem:[#allocation10 + $0xba8] ss:$12 sps:$4 sm:$0xff]  }
 0x24f   :  { %4043 = vmatpush3.msra.mxu0 %v1795_v21  ;;  %4078 = vmatpush3.msra.mxu1 %v1891_v22  ;;  %v1864_v21 = vunpack.c.h.bf16 %v1188_v18  ;;  %v1152_v22 = vld [vmem:[#allocation10 + $0x6c8] ss:$12 sps:$4 sm:$0xff]  }
 0x250   :  { %4044 = vmatprep.subr.mxu0 %v1840_v46  ;;  %4079 = vmatprep.subr.mxu1 %v1936_v43  ;;  %v1216_v46 = vld [vmem:[#allocation10 + $0x848] ss:$12 sps:$4 sm:$0xff]   ;;  %v1813_v43 = vunpack.c.l.bf16 %v1156_v48  ;;  %v2083_v48 = vunpack.c.l.bf16 %v1336_v62 }
 0x251   :  { %4045 = vmatpush3.msra.mxu0 %v1792_v55  ;;  %4080 = vmatpush3.msra.mxu1 %v1888_v23  ;;  %v1909_v55 = vunpack.c.l.bf16 %v1220_v14  ;;  %v1120_v23 = vld [vmem:[#allocation10 + $0x608] ss:$12 sps:$4 sm:$0xff]   ;;  %v1906_v24 = vunpack.c.h.bf16 %v1216_v46 }
 0x252   :  { %4046 = vmatprep.subr.mxu0 %v1837_v17  ;;  %4081 = vmatprep.subr.mxu1 %v1933_v33  ;;  %v1861_v17 = vunpack.c.l.bf16 %v1188_v18  ;;  %v1810_v33 = vunpack.c.h.bf16 %v1152_v22  ;;  %v1762_v34 = vunpack.c.h.bf16 %v1120_v23 }
 0x253   :  { %4047 = vmatpush3.msra.mxu0 %v1789_v57  ;;  %4082 = vmatpush3.msra.mxu1 %v1885_v35  ;;  %v1858_v57 = vunpack.c.h.bf16 %v1184_v44  ;;  %v1807_v35 = vunpack.c.l.bf16 %v1152_v22  ;;  %v2122_v22 = vunpack.c.h.bf16 %v1360_v36 }
 0x254   :  { %4048 = vmatprep.subr.mxu0 %v1834_v37  ;;  %4083 = vmatprep.subr.mxu1 %v1930_v38  ;;  %v1903_v37 = vunpack.c.l.bf16 %v1216_v46  ;;  %v1308_v38 = vld [vmem:[#allocation10 + $0xa70] ss:$12 sps:$4 sm:$0xff]  }
 0x255   :  { %4049 = vmatpush3.msra.mxu0 %v1786_v39  ;;  %4084 = vmatpush3.msra.mxu1 %v1882_v41  ;;  %v1372_v39 = vld [vmem:[#allocation10 + $0xbf0] ss:$12 sps:$4 sm:$0xff]   ;;  %v1759_v41 = vunpack.c.l.bf16 %v1120_v23 }
 0x256   :  { %4050 = vmatprep.subr.mxu0 %v1831_v47  ;;  %4085 = vmatprep.subr.mxu1 %v1927_v50  ;;  %v1340_v47 = vld [vmem:[#allocation10 + $0xb30] ss:$12 sps:$4 sm:$0xff]   ;;  %v2044_v50 = vunpack.c.h.bf16 %v1308_v38  ;;  %v2140_v29 = vunpack.c.h.bf16 %v1372_v39 }
 0x257   :  { %4051 = vmatpush3.msra.mxu0 %v1783_v53  ;;  %4086 = vmatpush3.msra.mxu1 %v1879_v54  ;;  %v2092_v53 = vunpack.c.h.bf16 %v1340_v47  ;;  %v1304_v54 = vld [vmem:[#allocation10 + $0xa58] ss:$12 sps:$4 sm:$0xff]   ;;  %v1356_v23 = vld [vmem:[#allocation10 + $0xb90] ss:$12 sps:$4 sm:$0xff]  }
 0x258   :  { %4052 = vmatprep.subr.mxu0 %v1828_v56  ;;  %4087 = vmatprep.subr.mxu1 %v1924_v4  ;;  %v1368_v56 = vld [vmem:[#allocation10 + $0xbd8] ss:$12 sps:$4 sm:$0xff]   ;;  %v2041_v4 = vunpack.c.l.bf16 %v1308_v38  ;;  %v2113_v45 = vunpack.c.l.bf16 %v1356_v23 }
 0x259   :  { %4053 = vmatpush3.msra.mxu0 %v1780_v59  ;;  %4088 = vmatpush3.msra.mxu1 %v1876_v61  ;;  %v2137_v59 = vunpack.c.l.bf16 %v1372_v39  ;;  %v1272_v61 = vld [vmem:[#allocation10 + $0x998] ss:$12 sps:$4 sm:$0xff]   ;;  %v2134_v6 = vunpack.c.h.bf16 %v1368_v56 }
 0x25a   :  { %4054 = vmatprep.subr.mxu0 %v1825_v1  ;;  %4089 = vmatprep.subr.mxu1 %v1921_v5  ;;  %v2089_v1 = vunpack.c.l.bf16 %v1340_v47  ;;  %v2038_v5 = vunpack.c.h.bf16 %v1304_v54  ;;  %v1990_v7 = vunpack.c.h.bf16 %v1272_v61  ;;  %v1288_v39 = vld [vmem:[#allocation10 + $0x9f8] ss:$12 sps:$4 sm:$0xff]  }
 0x25b   :  { %4055 = vmatpush3.msra.mxu0 %v1777_v52  ;;  %4090 = vmatpush3.msra.mxu1 %v1873_v2  ;;  %v1300_v52 = vld [vmem:[#allocation10 + $0xa40] ss:$12 sps:$4 sm:$0xff]   ;;  %v2035_v2 = vunpack.c.l.bf16 %v1304_v54  ;;  %v1256_v47 = vld [vmem:[#allocation10 + $0x938] ss:$12 sps:$4 sm:$0xff]  }
 0x25c   :  { %4056 = vmatprep.subr.mxu0 %v1822_v10  ;;  %4091 = vmatprep.subr.mxu1 %v1918_v11  ;;  %v2131_v10 = vunpack.c.l.bf16 %v1368_v56  ;;  %v1268_v11 = vld [vmem:[#allocation10 + $0x980] ss:$12 sps:$4 sm:$0xff]   ;;  %v2029_v18 = vunpack.c.l.bf16 %v1300_v52  ;;  %v1966_v56 = vunpack.c.h.bf16 %v1256_v47 }
 0x25d   :  { %4057 = vmatpush3.msra.mxu0 %v1774_v12  ;;  %4092 = vmatpush3.msra.mxu1 %v1870_v13  ;;  %v1332_v12 = vld [vmem:[#allocation10 + $0xb00] ss:$12 sps:$4 sm:$0xff]   ;;  %v1987_v13 = vunpack.c.l.bf16 %v1272_v61 }
 0x25e   :  { %4058 = vmatprep.subr.mxu0 %v1819_v9  ;;  %4093 = vmatprep.subr.mxu1 %v1915_v15  ;;  %v2080_v9 = vunpack.c.h.bf16 %v1332_v12  ;;  %v1296_v15 = vld [vmem:[#allocation10 + $0xa28] ss:$12 sps:$4 sm:$0xff]   ;;  %v1348_v61 = vld [vmem:[#allocation10 + $0xb60] ss:$12 sps:$4 sm:$0xff]  }
 0x25f   :  { %4059 = vmatpush3.msra.mxu0 %v1771_v32  ;;  %4094 = vmatpush3.msra.mxu1 %v1867_v19  ;;  %v1264_v19 = vld [vmem:[#allocation10 + $0x968] ss:$12 sps:$4 sm:$0xff]   ;;  %v2023_v44 = vunpack.c.l.bf16 %v1296_v15 }
 0x260   :  { %4060 = vmatprep.subr.mxu0 %v1816_v49  ;;  %4095 = vmatprep.subr.mxu1 %v1912_v20  ;;  %v1328_v49 = vld [vmem:[#allocation10 + $0xae8] ss:$12 sps:$4 sm:$0xff]   ;;  %v1981_v20 = vunpack.c.l.bf16 %v1268_v11  ;;  %v1978_v46 = vunpack.c.h.bf16 %v1264_v19 }
 0x261   :  { %4061 = vmatpush3.msra.mxu0 %v1768_v40  ;;  %4096 = vmatpush3.msra.mxu1 %v1864_v21  ;;  %v2077_v40 = vunpack.c.l.bf16 %v1332_v12  ;;  %v2026_v21 = vunpack.c.h.bf16 %v1296_v15 }
 0x262   :  { %4062 = vmatprep.subr.mxu0 %v1813_v43  ;;  %4097 = vmatprep.subr.mxu1 %v1909_v55  ;;  %v2074_v43 = vunpack.c.h.bf16 %v1328_v49  ;;  %v1292_v55 = vld [vmem:[#allocation10 + $0xa10] ss:$12 sps:$4 sm:$0xff]  }
 0x263   :  { %4063 = vmatpush3.msra.mxu0 %v1765_v25  ;;  %4098 = vmatpush3.msra.mxu1 %v1861_v17  ;;  %v2119_v25 = vunpack.c.l.bf16 %v1360_v36  ;;  %v1260_v17 = vld [vmem:[#allocation10 + $0x950] ss:$12 sps:$4 sm:$0xff]  }
 0x264   :  { %4064 = vmatprep.subr.mxu0 %v1810_v33  ;;  %4099 = vmatprep.subr.mxu1 %v1906_v24  ;;  %v1324_v33 = vld [vmem:[#allocation10 + $0xad0] ss:$12 sps:$4 sm:$0xff]   ;;  %v1975_v24 = vunpack.c.l.bf16 %v1264_v19 }
 0x265   :  { %4065 = vmatpush3.msra.mxu0 %v1762_v34  ;;  %4100 = vmatpush3.msra.mxu1 %v1858_v57  ;;  %v2071_v34 = vunpack.c.l.bf16 %v1328_v49  ;;  %v2020_v57 = vunpack.c.h.bf16 %v1292_v55  ;;  %v2068_v38 = vunpack.c.h.bf16 %v1324_v33 }
 0x266   :  { %4066 = vmatprep.subr.mxu0 %v1807_v35  ;;  %4101 = vmatprep.subr.mxu1 %v1903_v37  ;;  %v2116_v35 = vunpack.c.h.bf16 %v1356_v23  ;;  %v1972_v37 = vunpack.c.h.bf16 %v1260_v17  ;;  %v4770_v23 = vld [vmem:[#allocation13 + $0xb8] sm:$0xff] }
 0x267   :  { %4067 = vmatpush3.msra.mxu0 %v1759_v41  ;;  %4102 = vmatpush3.msra.mxu1 %v1855_v42  ;;  %v1352_v41 = vld [vmem:[#allocation10 + $0xb78] ss:$12 sps:$4 sm:$0xff]   ;;  %v2017_v42 = vunpack.c.l.bf16 %v1292_v55 }
 0x268   :  { %3071 = vmatmul.mubr.f32.vlgmr.msra.gmra.mxu0 %v4703_v3  ;;  %3141 = vmatmul.mubr.f32.vlgmr.msra.gmra.mxu1 %v4694_v58  ;;  %v2086_v3 = vunpack.c.h.bf16 %v1336_v62  ;;  %v1364_v58 = vld [vmem:[#allocation10 + $0xbc0] ss:$12 sps:$4 sm:$0xff]   ;;  %v2110_v54 = vunpack.c.h.bf16 %v1352_v41  ;;  %v2011_v62 = vunpack.c.l.bf16 %v1288_v39  ;;  %v4761_v55 = vld [vmem:[#allocation13 + $0xd0] sm:$0xff] }
 0x269   :  { %4106 = vmatprep.subr.mxu0 %v2044_v50  ;;  %4141 = vmatprep.subr.mxu1 %v2140_v29  ;;  %v2128_v14 = vunpack.c.h.bf16 %v1364_v58  ;;  %v2125_v32 = vunpack.c.l.bf16 %v1364_v58  ;;  %v1320_v50 = vld [vmem:[#allocation10 + $0xab8] ss:$12 sps:$4 sm:$0xff]   ;;  %v1969_v29 = vunpack.c.l.bf16 %v1260_v17 }
 0x26a   :  { %4107 = vmatpush3.msra.mxu0 %v1996_v51  ;;  %3210 = vmatprep.mubr.f32.mxu0 %v4711_v16  ;;  %v2032_v16 = vunpack.c.h.bf16 %v1300_v52  ;;  %v2065_v51 = vunpack.c.l.bf16 %v1324_v33  ;;  %v2104_v52 = vunpack.c.h.bf16 %v1348_v61  ;;  %v4779_v17 = vld [vmem:[#allocation13 + $0xa0] sm:$0xff]  ;;  %v4782_v33 = vld [vmem:[#allocation13 + $0x98] sm:$0xff] }
 0x26b   :  { %4142 = vmatpush3.msra.mxu1 %v2092_v53  ;;  %3280 = vmatprep.mubr.f32.mxu1 %v4713_v31  ;;  %v1984_v31 = vunpack.c.h.bf16 %v1268_v11  ;;  %v2014_v53 = vunpack.c.h.bf16 %v1288_v39  ;;  %v1344_v11 = vld [vmem:[#allocation10 + $0xb48] ss:$12 sps:$4 sm:$0xff]  }
 0x26c   :  { %4108 = vmatprep.subr.mxu0 %v2041_v4  ;;  %4143 = vmatprep.subr.mxu1 %v2137_v59  ;;  %v2062_v4 = vunpack.c.h.bf16 %v1320_v50  ;;  %v1284_v59 = vld [vmem:[#allocation10 + $0x9e0] ss:$12 sps:$4 sm:$0xff]   ;;  %v2098_v15 = vunpack.c.h.bf16 %v1344_v11  ;;  %v2095_v19 = vunpack.c.l.bf16 %v1344_v11  ;;  %v4803_v39 = vld [vmem:[#allocation13 + $0x60] sm:$0xff] }
 0x26d   :  { %4109 = vmatpush3.msra.mxu0 %v1993_v63  ;;  %4144 = vmatpush3.msra.mxu1 %v2089_v1  ;;  %v2107_v63 = vunpack.c.l.bf16 %v1352_v41  ;;  %v1252_v1 = vld [vmem:[#allocation10 + $0x920] ss:$12 sps:$4 sm:$0xff]   ;;  %v2005_v12 = vunpack.c.l.bf16 %v1284_v59 }
 0x26e   :  { %4110 = vmatprep.subr.mxu0 %v2038_v5  ;;  %4145 = vmatprep.subr.mxu1 %v2134_v6  ;;  %v1316_v5 = vld [vmem:[#allocation10 + $0xaa0] ss:$12 sps:$4 sm:$0xff]   ;;  %v1963_v6 = vunpack.c.l.bf16 %v1256_v47  ;;  %v1960_v58 = vunpack.c.h.bf16 %v1252_v1  ;;  %v4815_v47 = vld [vmem:[#allocation13 + $0x40] sm:$0xff] }
 0x26f   :  { %4111 = vmatpush3.msra.mxu0 %v1990_v7  ;;  %4146 = vmatpush3.msra.mxu1 %v2086_v3  ;;  %v2059_v7 = vunpack.c.l.bf16 %v1320_v50  ;;  %v2008_v3 = vunpack.c.h.bf16 %v1284_v59  ;;  %v4806_v41 = vld [vmem:[#allocation13 + $0x58] sm:$0xff]  ;;  %5190 = vst [vmem:[#allocation31_spill] sm:$0xff] %v4815_v47  ;;  %v4839_v59 = vld [vmem:[#allocation13] sm:$0xff] }
 0x270   :  { %4112 = vmatprep.subr.mxu0 %v2035_v2  ;;  %4147 = vmatprep.subr.mxu1 %v2131_v10  ;;  %v2056_v2 = vunpack.c.h.bf16 %v1316_v5  ;;  %v1280_v10 = vld [vmem:[#allocation10 + $0x9c8] ss:$12 sps:$4 sm:$0xff]   ;;  %v4818_v50 = vld [vmem:[#allocation13 + $0x38] sm:$0xff]  ;;  %5198 = vst [vmem:[#allocation39_spill] sm:$0xff] %v4839_v59 }
 0x271   :  { %4113 = vmatpush3.msra.mxu0 %v1987_v13  ;;  %4148 = vmatpush3.msra.mxu1 %v2083_v48  ;;  %v2101_v13 = vunpack.c.l.bf16 %v1348_v61  ;;  %v1248_v48 = vld [vmem:[#allocation10 + $0x908] ss:$12 sps:$4 sm:$0xff]   ;;  %5191 = vst [vmem:[#allocation32_spill] sm:$0xff] %v4818_v50  ;;  %v4842_v61 = vld [vmem:[#allocation13 + $0x1f8] sm:$0xff] }
 0x272   :  { %4114 = vmatprep.subr.mxu0 %v2032_v16  ;;  %4149 = vmatprep.subr.mxu1 %v2128_v14  ;;  %v1312_v16 = vld [vmem:[#allocation10 + $0xa88] ss:$12 sps:$4 sm:$0xff]   ;;  %v1957_v14 = vunpack.c.l.bf16 %v1252_v1  ;;  %v1954_v36 = vunpack.c.h.bf16 %v1248_v48  ;;  %v1951_v49 = vunpack.c.l.bf16 %v1248_v48  ;;  %5199 = vst [vmem:[#allocation40_spill] sm:$0xff] %v4842_v61  ;;  %v4871_v11 = vld [vmem:[#allocation13 + $0x2f8] sm:$0xff]  ;;  %v2295_v48 = vpop.f32.mrf.mxu1 }
 0x273   :  { %4115 = vmatpush3.msra.mxu0 %v1984_v31  ;;  %4150 = vmatpush3.msra.mxu1 %v2080_v9  ;;  %v2053_v31 = vunpack.c.l.bf16 %v1316_v5  ;;  %v2002_v9 = vunpack.c.h.bf16 %v1280_v10  ;;  %v4851_v1 = vld [vmem:[#allocation13 + $0x1e0] sm:$0xff]  ;;  %v4853_v5 = vld [vmem:[#allocation11] sm:$0x7] }
 0x274   :  { %4116 = vmatprep.subr.mxu0 %v2029_v18  ;;  %4151 = vmatprep.subr.mxu1 %v2125_v32  ;;  %v2050_v18 = vunpack.c.h.bf16 %v1312_v16  ;;  %v1999_v32 = vunpack.c.l.bf16 %v1280_v10  ;;  %5202 = vst [vmem:[#allocation43_spill] sm:$0xff] %v4851_v1  ;;  %v2150_v10 = vrot.slane %v4853_v5, %v4615_v28  ;;  %v4884_v28 = vld [vmem:[#allocation13 + $0x1b0] sm:$0xff] }
 0x275   :  { %4117 = vmatpush3.msra.mxu0 %v1981_v20  ;;  %4152 = vmatpush3.msra.mxu1 %v2077_v40  ;;  %v2047_v20 = vunpack.c.l.bf16 %v1312_v16  ;;  %v4745_v40 = vld [vmem:[#allocation13 + $0xf8] sm:$0xff]  ;;  %5208 = vst [vmem:[#allocation49_spill] sm:$0xff] %v4884_v28 }
 0x276   :  { %4118 = vmatprep.subr.mxu0 %v2026_v21  ;;  %4153 = vmatprep.subr.mxu1 %v2122_v22  ;;  %v4747_v21 = vld [vmem:[#allocation13 + $0xf0] sm:$0xff]  ;;  %v4751_v22 = vld [vmem:[#allocation13 + $0xe8] sm:$0xff] }
 0x277   :  { %4119 = vmatpush3.msra.mxu0 %v1978_v46  ;;  %4154 = vmatpush3.msra.mxu1 %v2074_v43  ;;  %v4754_v46 = vld [vmem:[#allocation13 + $0xe0] sm:$0xff]  ;;  %v4758_v43 = vld [vmem:[#allocation13 + $0xd8] sm:$0xff] }
 0x278   :  { %4120 = vmatprep.subr.mxu0 %v2023_v44  ;;  %4155 = vmatprep.subr.mxu1 %v2119_v25  ;;  %v4773_v44 = vld [vmem:[#allocation13 + $0xb0] sm:$0xff]  ;;  %v4776_v25 = vld [vmem:[#allocation13 + $0xa8] sm:$0xff] }
 0x279   :  { %4121 = vmatpush3.msra.mxu0 %v1975_v24  ;;  %4156 = vmatpush3.msra.mxu1 %v2071_v34  ;;  %v4785_v24 = vld [vmem:[#allocation13 + $0x90] sm:$0xff]  ;;  %v4788_v34 = vld [vmem:[#allocation13 + $0x88] sm:$0xff] }
 0x27a   :  { %4122 = vmatprep.subr.mxu0 %v2020_v57  ;;  %4157 = vmatprep.subr.mxu1 %v2116_v35  ;;  %v4791_v57 = vld [vmem:[#allocation13 + $0x80] sm:$0xff]  ;;  %v4794_v35 = vld [vmem:[#allocation13 + $0x78] sm:$0xff] }
 0x27b   :  { %4123 = vmatpush3.msra.mxu0 %v1972_v37  ;;  %4158 = vmatpush3.msra.mxu1 %v2068_v38  ;;  %v4797_v37 = vld [vmem:[#allocation13 + $0x70] sm:$0xff]  ;;  %v4800_v38 = vld [vmem:[#allocation13 + $0x68] sm:$0xff] }
 0x27c   :  { %4124 = vmatprep.subr.mxu0 %v2017_v42  ;;  %4159 = vmatprep.subr.mxu1 %v2113_v45  ;;  %v4809_v42 = vld [vmem:[#allocation13 + $0x50] sm:$0xff]  ;;  %v4812_v45 = vld [vmem:[#allocation13 + $0x48] sm:$0xff] }
 0x27d   :  { %4125 = vmatpush3.msra.mxu0 %v1969_v29  ;;  %4160 = vmatpush3.msra.mxu1 %v2065_v51  ;;  %5189 = vst [vmem:[#allocation30_spill] sm:$0xff] %v4812_v45  ;;  %v4821_v29 = vld [vmem:[#allocation13 + $0x30] sm:$0xff]  ;;  %v4824_v51 = vld [vmem:[#allocation13 + $0x28] sm:$0xff] }
 0x27e   :  { %4126 = vmatprep.subr.mxu0 %v2014_v53  ;;  %4161 = vmatprep.subr.mxu1 %v2110_v54  ;;  %5192 = vst [vmem:[#allocation33_spill] sm:$0xff] %v4821_v29  ;;  %5193 = vst [vmem:[#allocation34_spill] sm:$0xff] %v4824_v51  ;;  %v4827_v53 = vld [vmem:[#allocation13 + $0x20] sm:$0xff]  ;;  %v4830_v54 = vld [vmem:[#allocation13 + $0x18] sm:$0xff] }
 0x27f   :  { %4127 = vmatpush3.msra.mxu0 %v1966_v56  ;;  %4162 = vmatpush3.msra.mxu1 %v2062_v4  ;;  %5194 = vst [vmem:[#allocation35_spill] sm:$0xff] %v4827_v53  ;;  %5195 = vst [vmem:[#allocation36_spill] sm:$0xff] %v4830_v54  ;;  %v4833_v56 = vld [vmem:[#allocation13 + $0x10] sm:$0xff]  ;;  %v4836_v4 = vld [vmem:[#allocation13 + $0x8] sm:$0xff] }
 0x280   :  { %4128 = vmatprep.subr.mxu0 %v2011_v62  ;;  %4163 = vmatprep.subr.mxu1 %v2107_v63  ;;  %5196 = vst [vmem:[#allocation37_spill] sm:$0xff] %v4833_v56  ;;  %5197 = vst [vmem:[#allocation38_spill] sm:$0xff] %v4836_v4  ;;  %v4845_v62 = vld [vmem:[#allocation13 + $0x1f0] sm:$0xff]  ;;  %v4848_v63 = vld [vmem:[#allocation13 + $0x1e8] sm:$0xff] }
 0x281   :  { %4129 = vmatpush3.msra.mxu0 %v1963_v6  ;;  %4164 = vmatpush3.msra.mxu1 %v2059_v7  ;;  %5200 = vst [vmem:[#allocation41_spill] sm:$0xff] %v4845_v62  ;;  %5201 = vst [vmem:[#allocation42_spill] sm:$0xff] %v4848_v63  ;;  %v2224_v6 = vpop.f32.mrf.mxu0  ;;  %v4856_v7 = vld [vmem:[#allocation13 + $0x1d8] sm:$0xff] }
 0x282   :  { %4130 = vmatprep.subr.mxu0 %v2008_v3  ;;  %4165 = vmatprep.subr.mxu1 %v2104_v52  ;;  %5203 = vst [vmem:[#allocation44_spill] sm:$0xff] %v4856_v7  ;;  %v4859_v3 = vld [vmem:[#allocation13 + $0x1d0] sm:$0xff]  ;;  %v4862_v52 = vld [vmem:[#allocation13 + $0x1c8] sm:$0xff] }
 0x283   :  { %4131 = vmatpush3.msra.mxu0 %v1960_v58  ;;  %4166 = vmatpush3.msra.mxu1 %v2056_v2  ;;  %5204 = vst [vmem:[#allocation45_spill] sm:$0xff] %v4859_v3  ;;  %5205 = vst [vmem:[#allocation46_spill] sm:$0xff] %v4862_v52  ;;  %v4864_v58 = vld [vmem:[#allocation13 + $0x1c0] sm:$0xff]  ;;  %v2146_v2 = vrot.slane %v4853_v5, %v4619_v30  ;;  %v2226_v16 = vpop.f32.mrf.mxu0 }
 0x284   :  { %4132 = vmatprep.subr.mxu0 %v2005_v12  ;;  %4167 = vmatprep.subr.mxu1 %v2101_v13  ;;  %5206 = vst [vmem:[#allocation47_spill] sm:$0xff] %v4864_v58  ;;  %v4873_v12 = vld [vmem:[#allocation13 + $0x2f0] sm:$0xff]  ;;  %v4875_v13 = vld [vmem:[#allocation13 + $0x2e8] sm:$0xff]  ;;  %v4905_v30 = vld [vmem:[#allocation13 + $0x2c0] sm:$0xff] }
 0x285   :  { %4133 = vmatpush3.msra.mxu0 %v1957_v14  ;;  %4168 = vmatpush3.msra.mxu1 %v2053_v31  ;;  %v4878_v14 = vld [vmem:[#allocation13 + $0x1b8] sm:$0xff]  ;;  %v4881_v31 = vld [vmem:[#allocation13 + $0x2e0] sm:$0xff] }
 0x286   :  { %4134 = vmatprep.subr.mxu0 %v2002_v9  ;;  %4169 = vmatprep.subr.mxu1 %v2098_v15  ;;  %5207 = vst [vmem:[#allocation48_spill] sm:$0xff] %v4878_v14  ;;  %v4887_v9 = vld [vmem:[#allocation13 + $0x2d8] sm:$0xff]  ;;  %v2366_v15 = vpop.f32.mrf.mxu0 }
 0x287   :  { %4135 = vmatpush3.msra.mxu0 %v1954_v36  ;;  %4170 = vmatpush3.msra.mxu1 %v2050_v18  ;;  %v4890_v36 = vld [vmem:[#allocation13 + $0x1a8] sm:$0xff]  ;;  %v4893_v18 = vld [vmem:[#allocation13 + $0x2d0] sm:$0xff] }
 0x288   :  { %4136 = vmatprep.subr.mxu0 %v1999_v32  ;;  %4171 = vmatprep.subr.mxu1 %v2095_v19  ;;  %5209 = vst [vmem:[#allocation50_spill] sm:$0xff] %v4890_v36  ;;  %v2225_v32 = vadd.f32 %v2224_v6, %v2146_v2  ;;  %v2227_v19 = vadd.f32 %v2226_v16, %v2150_v10  ;;  %v4908_v6 = vld [vmem:[#allocation13 + $0x190] sm:$0xff]  ;;  %v4911_v2 = vld [vmem:[#allocation13 + $0x2b8] sm:$0xff]  ;;  %v2368_v16 = vpop.f32.mrf.mxu0 }
 0x289   :  { %4137 = vmatpush3.msra.mxu0 %v1951_v49  ;;  %4172 = vmatpush3.msra.mxu1 %v2047_v20  ;;  %v4896_v49 = vld [vmem:[#allocation13 + $0x1a0] sm:$0xff]  ;;  %v4899_v20 = vld [vmem:[#allocation13 + $0x2c8] sm:$0xff]  ;;  %5212 = vst [vmem:[#allocation53_spill] sm:$0xff] %v4908_v6 }
 0x28a   :  { %3211 = vmatmul.mubr.f32.vlgmr.msra.gmra.mxu0 %v4724_v60  ;;  %3281 = vmatmul.mubr.f32.vlgmr.msra.gmra.mxu1 %v4727_v8  ;;  %v4764_v60 = vld [vmem:[#allocation13 + $0xc8] sm:$0xff]  ;;  %v4767_v8 = vld [vmem:[#allocation13 + $0xc0] sm:$0xff]  ;;  %5210 = vst [vmem:[#allocation51_spill] sm:$0xff] %v4896_v49 }
 0x28b   :  { %3382 = vmatprep.subr.mxu0 %v4745_v40  ;;  %3517 = vmatprep.mubr.f32.mxu1 %v5147_v0  ;;  %v2297_v0 = vpop.f32.mrf.mxu1 }
 0x28c   :  { %3383 = vmatpush1.msra.mxu0 %v4747_v21  ;;  %3453 = vmatprep.subr.mxu1 %v4871_v11 }
 0x28d   :  { %3384 = vmatprep.subr.mxu0 %v4751_v22  ;;  %3454 = vmatpush1.msra.mxu1 %v4873_v12  ;;  %v2437_v10 = vpop.f32.mrf.mxu1 }
 0x28e   :  { %3385 = vmatpush1.msra.mxu0 %v4754_v46  ;;  %3455 = vmatprep.subr.mxu1 %v4875_v13 }
 0x28f   :  { %3386 = vmatprep.subr.mxu0 %v4758_v43  ;;  %3456 = vmatpush1.msra.mxu1 %v4881_v31 }
 0x290   :  { %3387 = vmatpush1.msra.mxu0 %v4761_v55  ;;  %3457 = vmatprep.subr.mxu1 %v4887_v9 }
 0x291   :  { %3388 = vmatprep.subr.mxu0 %v4764_v60  ;;  %3458 = vmatpush1.msra.mxu1 %v4893_v18 }
 0x292   :  { %3389 = vmatpush1.msra.mxu0 %v4767_v8  ;;  %3459 = vmatprep.subr.mxu1 %v4899_v20 }
 0x293   :  { %3390 = vmatprep.subr.mxu0 %v4770_v23  ;;  %3460 = vmatpush1.msra.mxu1 %v4905_v30 }
 0x294   :  { %3391 = vmatpush1.msra.mxu0 %v4773_v44  ;;  %3461 = vmatprep.subr.mxu1 %v4911_v2 }
 0x295   :  { %3392 = vmatprep.subr.mxu0 %v4776_v25 }
 0x296   :  { %3393 = vmatpush1.msra.mxu0 %v4779_v17 }
 0x297   :  { %3394 = vmatprep.subr.mxu0 %v4782_v33 }
 0x298   :  { %3395 = vmatpush1.msra.mxu0 %v4785_v24 }
 0x299   :  { %3396 = vmatprep.subr.mxu0 %v4788_v34 }
 0x29a   :  { %3397 = vmatpush1.msra.mxu0 %v4791_v57 }
 0x29b   :  { %3398 = vmatprep.subr.mxu0 %v4794_v35 }
 0x29c   :  { %3399 = vmatpush1.msra.mxu0 %v4797_v37 }
 0x29d   :  { %3400 = vmatprep.subr.mxu0 %v4800_v38 }
 0x29e   :  { %3401 = vmatpush1.msra.mxu0 %v4803_v39 }
 0x29f   :  { %3402 = vmatprep.subr.mxu0 %v4806_v41 }
 0x2a0   :  { %3403 = vmatpush1.msra.mxu0 %v4809_v42 }
 0x2a1   :  { %3404 = vmatprep.subr.mxu0 %v4812_v45 }
 0x2a2   :  { %3405 = vmatpush1.msra.mxu0 %v4815_v47 }
 0x2a3   :  { %3406 = vmatprep.subr.mxu0 %v4818_v50  ;;  %v3358_v50 = vld [vmem:[#allocation13 + $0x240] sm:$0xff] }
 0x2a4   :  { %3407 = vmatpush1.msra.mxu0 %v4821_v29  ;;  %v4998_v29 = vld [vmem:[#allocation13 + $0x118] sm:$0xff] }
 0x2a5   :  { %3408 = vmatprep.subr.mxu0 %v4824_v51  ;;  %v4995_v51 = vld [vmem:[#allocation13 + $0x248] sm:$0xff] }
 0x2a6   :  { %3409 = vmatpush1.msra.mxu0 %v4827_v53 }
 0x2a7   :  { %3410 = vmatprep.subr.mxu0 %v4830_v54 }
 0x2a8   :  { %3411 = vmatpush1.msra.mxu0 %v4833_v56 }
 0x2a9   :  { %3412 = vmatprep.subr.mxu0 %v4836_v4  ;;  %v4962_v4 = vld [vmem:[#allocation13 + $0x148] sm:$0xff] }
 0x2aa   :  { %3413 = vmatpush1.msra.mxu0 %v4839_v59  ;;  %v4959_v59 = vld [vmem:[#allocation13 + $0x278] sm:$0xff]  ;;  %5221 = vst [vmem:[#allocation62_spill] sm:$0xff] %v4962_v4 }
 0x2ab   :  { %3414 = vmatprep.subr.mxu0 %v4842_v61 }
 0x2ac   :  { %3415 = vmatpush2.msra.mxu0 %v4845_v62 }
 0x2ad   :  { %3416 = vmatprep.subr.mxu0 %v4848_v63 }
 0x2ae   :  { %3417 = vmatpush2.msra.mxu0 %v4851_v1  ;;  %v4929_v1 = vld [vmem:[#allocation13 + $0x2a0] sm:$0xff] }
 0x2af   :  { %3418 = vmatprep.subr.mxu0 %v4856_v7  ;;  %v2508_v7 = vpop.f32.mrf.mxu0 }
 0x2b0   :  { %3419 = vmatpush2.msra.mxu0 %v4859_v3  ;;  %v4923_v3 = vld [vmem:[#allocation13 + $0x2a8] sm:$0xff] }
 0x2b1   :  { %3420 = vmatprep.subr.mxu0 %v4862_v52  ;;  %v2298_v52 = vadd.f32 %v2297_v0, %v2227_v19  ;;  %v4932_v0 = vld [vmem:[#allocation13 + $0x170] sm:$0xff]  ;;  %v2439_v19 = vpop.f32.mrf.mxu1 }
 0x2b2   :  { %3421 = vmatpush2.msra.mxu0 %v4864_v58  ;;  %v2296_v58 = vadd.f32 %v2295_v48, %v2225_v32  ;;  %5216 = vst [vmem:[#allocation57_spill] sm:$0xff] %v4932_v0  ;;  %v4935_v32 = vld [vmem:[#allocation13 + $0x298] sm:$0xff] }
 0x2b3   :  { %3422 = vmatprep.subr.mxu0 %v4878_v14  ;;  %v4914_v14 = vld [vmem:[#allocation13 + $0x188] sm:$0xff]  ;;  %v2369_v48 = vadd.f32 %v2368_v16, %v2298_v52  ;;  %v4944_v52 = vld [vmem:[#allocation13 + $0x160] sm:$0xff]  ;;  %v2510_v16 = vpop.f32.mrf.mxu0 }
 0x2b4   :  { %3423 = vmatpush2.msra.mxu0 %v4884_v28  ;;  %5213 = vst [vmem:[#allocation54_spill] sm:$0xff] %v4914_v14  ;;  %v4917_v28 = vld [vmem:[#allocation13 + $0x2b0] sm:$0xff]  ;;  %v2367_v63 = vadd.f32 %v2366_v15, %v2296_v58  ;;  %5218 = vst [vmem:[#allocation59_spill] sm:$0xff] %v4944_v52  ;;  %v4947_v58 = vld [vmem:[#allocation13 + $0x288] sm:$0xff]  ;;  %v2579_v15 = vpop.f32.mrf.mxu1 }
 0x2b5   :  { %3424 = vmatprep.subr.mxu0 %v4890_v36  ;;  %v4920_v36 = vld [vmem:[#allocation13 + $0x180] sm:$0xff]  ;;  %3462 = vmatpush1.msra.mxu1 %v4917_v28  ;;  %v2440_v61 = vadd.f32 %v2439_v19, %v2369_v48  ;;  %v4974_v19 = vld [vmem:[#allocation13 + $0x138] sm:$0xff] }
 0x2b6   :  { %3425 = vmatpush2.msra.mxu0 %v4896_v49  ;;  %5214 = vst [vmem:[#allocation55_spill] sm:$0xff] %v4920_v36  ;;  %v4926_v49 = vld [vmem:[#allocation13 + $0x178] sm:$0xff]  ;;  %3463 = vmatprep.subr.mxu1 %v4923_v3  ;;  %v2438_v62 = vadd.f32 %v2437_v10, %v2367_v63  ;;  %v4968_v63 = vld [vmem:[#allocation13 + $0x140] sm:$0xff]  ;;  %v4971_v10 = vld [vmem:[#allocation13 + $0x268] sm:$0xff]  ;;  %v2581_v48 = vpop.f32.mrf.mxu1 }
 0x2b7   :  { %3426 = vmatprep.subr.mxu0 %v4902_v26  ;;  %5215 = vst [vmem:[#allocation56_spill] sm:$0xff] %v4926_v49  ;;  %v4941_v26 = vld [vmem:[#allocation13 + $0x290] sm:$0xff]  ;;  %3464 = vmatpush1.msra.mxu1 %v4929_v1  ;;  %v2511_v54 = vadd.f32 %v2510_v16, %v2440_v61  ;;  %5222 = vst [vmem:[#allocation63_spill] sm:$0xff] %v4968_v63 }
 0x2b8   :  { %3427 = vmatpush2.msra.mxu0 %v4908_v6  ;;  %v4938_v6 = vld [vmem:[#allocation13 + $0x168] sm:$0xff]  ;;  %3465 = vmatprep.subr.mxu1 %v4935_v32  ;;  %v2509_v56 = vadd.f32 %v2508_v7, %v2438_v62  ;;  %v4980_v61 = vld [vmem:[#allocation13 + $0x130] sm:$0xff]  ;;  %v4983_v62 = vld [vmem:[#allocation13 + $0x258] sm:$0xff] }
 0x2b9   :  { %3428 = vmatprep.subr.mxu0 %v4914_v14  ;;  %5217 = vst [vmem:[#allocation58_spill] sm:$0xff] %v4938_v6  ;;  %v4950_v14 = vld [vmem:[#allocation13 + $0x158] sm:$0xff]  ;;  %3466 = vmatpush1.msra.mxu1 %v4941_v26  ;;  %5223 = vst [vmem:[#allocation64_spill] sm:$0xff] %v4980_v61  ;;  %v2582_v53 = vadd.f32 %v2581_v48, %v2511_v54  ;;  %v5002_v54 = vld [vmem:[#allocation13 + $0x110] sm:$0xff] }
 0x2ba   :  { %3429 = vmatpush2.msra.mxu0 %v4920_v36  ;;  %5219 = vst [vmem:[#allocation60_spill] sm:$0xff] %v4950_v14  ;;  %v4953_v36 = vld [vmem:[#allocation13 + $0x280] sm:$0xff]  ;;  %3467 = vmatprep.subr.mxu1 %v4947_v58 }
 0x2bb   :  { %3430 = vmatprep.subr.mxu0 %v4926_v49  ;;  %v4956_v49 = vld [vmem:[#allocation13 + $0x150] sm:$0xff]  ;;  %3468 = vmatpush1.msra.mxu1 %v4953_v36 }
 0x2bc   :  { %3431 = vmatpush2.msra.mxu0 %v4932_v0  ;;  %5220 = vst [vmem:[#allocation61_spill] sm:$0xff] %v4956_v49  ;;  %v4965_v0 = vld [vmem:[#allocation13 + $0x270] sm:$0xff]  ;;  %3469 = vmatprep.subr.mxu1 %v4959_v59 }
 0x2bd   :  { %3432 = vmatprep.subr.mxu0 %v4938_v6  ;;  %3470 = vmatpush1.msra.mxu1 %v4965_v0  ;;  %v2580_v6 = vadd.f32 %v2579_v15, %v2509_v56  ;;  %v5006_v15 = vld [vmem:[#allocation13 + $0x108] sm:$0xff] }
 0x2be   :  { %3433 = vmatpush2.msra.mxu0 %v4944_v52  ;;  %v4977_v52 = vld [vmem:[#allocation13 + $0x260] sm:$0xff]  ;;  %3471 = vmatprep.subr.mxu1 %v4971_v10 }
 0x2bf   :  { %3434 = vmatprep.subr.mxu0 %v4950_v14  ;;  %v4986_v14 = vld [vmem:[#allocation13 + $0x128] sm:$0xff]  ;;  %3472 = vmatpush1.msra.mxu1 %v4977_v52 }
 0x2c0   :  { %3435 = vmatpush2.msra.mxu0 %v4956_v49  ;;  %v4989_v49 = vld [vmem:[#allocation13 + $0x250] sm:$0xff]  ;;  %3473 = vmatprep.subr.mxu1 %v4983_v62 }
 0x2c1   :  { %3436 = vmatprep.subr.mxu0 %v4962_v4  ;;  %v4992_v4 = vld [vmem:[#allocation13 + $0x120] sm:$0xff]  ;;  %3474 = vmatpush1.msra.mxu1 %v4989_v49 }
 0x2c2   :  { %3437 = vmatpush2.msra.mxu0 %v4968_v63  ;;  %v2650_v7 = vpop.f32.mrf.mxu0  ;;  %v2721_v16 = vpop.f32.mrf.mxu1  ;;  %3475 = vmatprep.subr.mxu1 %v4995_v51 }
 0x2c3   :  { %3438 = vmatprep.subr.mxu0 %v4974_v19  ;;  %v2651_v47 = vadd.f32 %v2650_v7, %v2580_v6  ;;  %3476 = vmatpush1.msra.mxu1 %v3358_v50  ;;  %v3357_v6 = vld [vmem:[#allocation13 + $0x238] sm:$0xff]  ;;  %v3355_v7 = vld [vmem:[#allocation13 + $0x228] sm:$0xff] }
 0x2c4   :  { %3439 = vmatpush2.msra.mxu0 %v4980_v61  ;;  %v2652_v63 = vpop.f32.mrf.mxu0  ;;  %v2723_v56 = vpop.f32.mrf.mxu1  ;;  %v5010_v61 = vld [vmem:[#allocation13 + $0x100] sm:$0xff]  ;;  %3477 = vmatprep.subr.mxu1 %v3357_v6 }
 0x2c5   :  { %v2653_v45 = vadd.f32 %v2652_v63, %v2582_v53  ;;  %3440 = vmatprep.subr.mxu0 %v4986_v14  ;;  %v2722_v53 = vadd.f32 %v2721_v16, %v2651_v47  ;;  %v3356_v63 = vld [vmem:[#allocation13 + $0x230] sm:$0xff]  ;;  %v3351_v16 = vld [vmem:[#allocation13 + $0x208] sm:$0xff] }
 0x2c6   :  { %3441 = vmatpush2.msra.mxu0 %v4992_v4  ;;  %3478 = vmatpush1.msra.mxu1 %v3356_v63  ;;  %v3352_v47 = vld [vmem:[#allocation13 + $0x210] sm:$0xff] }
 0x2c7   :  { %v2724_v48 = vadd.f32 %v2723_v56, %v2653_v45  ;;  %3442 = vmatprep.subr.mxu0 %v4998_v29  ;;  %3479 = vmatprep.subr.mxu1 %v3355_v7  ;;  %v3354_v45 = vld [vmem:[#allocation13 + $0x220] sm:$0xff]  ;;  %v3353_v56 = vld [vmem:[#allocation13 + $0x218] sm:$0xff] }
 0x2c8   :  { %3443 = vmatpush2.msra.mxu0 %v5002_v54  ;;  %3480 = vmatpush1.msra.mxu1 %v3354_v45 }
 0x2c9   :  { %3444 = vmatprep.subr.mxu0 %v5006_v15  ;;  %3446 = vmatprep.mubr.f32.mxu0 %v2724_v48  ;;  %v3350_v48 = vld [vmem:[#allocation13 + $0x200] sm:$0xff] }
 0x2ca   :  { %3445 = vmatpush2.msra.mxu0 %v5010_v61  ;;  %3481 = vmatprep.subr.mxu1 %v3353_v56 }
 0x2cb   :  { %3447 = vmatmul.mubr.f32.vlgmr.msra.gmra.mxu0 %v2722_v53  ;;  %3607 = vmatprep.subr.mxu0 %v4871_v11  ;;  %v5224_v11 = vmov 0.0  }
 0x2cc   :  { %3608 = vmatpush1.msra.mxu0 %v4873_v12  ;;  %3482 = vmatpush1.msra.mxu1 %v3352_v47 }
 0x2cd   :  { %3609 = vmatprep.subr.mxu0 %v4875_v13  ;;  %3483 = vmatprep.subr.mxu1 %v3351_v16 }
 0x2ce   :  { %3610 = vmatpush1.msra.mxu0 %v4881_v31  ;;  %3484 = vmatpush1.msra.mxu1 %v3350_v48 }
 0x2cf   :  { %3611 = vmatprep.subr.mxu0 %v4887_v9  ;;  %3530 = vmatprep.subr.mxu1 %v4745_v40 }
 0x2d0   :  { %3612 = vmatpush1.msra.mxu0 %v4893_v18  ;;  %3671 = vmatprep.mubr.f32.mxu0 %v5224_v11 }
 0x2d1   :  { %3613 = vmatprep.subr.mxu0 %v4899_v20 }
 0x2d2   :  { %3614 = vmatpush1.msra.mxu0 %v4905_v30  ;;  %v3529_v30 = vld [vmem:[#allocation5 + $0x28] sm:$0xff] }
 0x2d3   :  { %3615 = vmatprep.subr.mxu0 %v4911_v2 }
 0x2d4   :  { %3616 = vmatpush1.msra.mxu0 %v4917_v28 }
 0x2d5   :  { %3617 = vmatprep.subr.mxu0 %v4923_v3 }
 0x2d6   :  { %3618 = vmatpush1.msra.mxu0 %v4929_v1 }
 0x2d7   :  { %3619 = vmatprep.subr.mxu0 %v4935_v32 }
 0x2d8   :  { %3620 = vmatpush1.msra.mxu0 %v4941_v26  ;;  %v3526_v26 = vld [vmem:[#allocation5 + $0x10] sm:$0xff] }
 0x2d9   :  { %3621 = vmatprep.subr.mxu0 %v4947_v58 }
 0x2da   :  { %3622 = vmatpush1.msra.mxu0 %v4953_v36 }
 0x2db   :  { %3623 = vmatprep.subr.mxu0 %v4959_v59 }
 0x2dc   :  { %3624 = vmatpush1.msra.mxu0 %v4965_v0 }
 0x2dd   :  { %3625 = vmatprep.subr.mxu0 %v4971_v10 }
 0x2de   :  { %3626 = vmatpush1.msra.mxu0 %v4977_v52 }
 0x2df   :  { %3627 = vmatprep.subr.mxu0 %v4983_v62 }
 0x2e0   :  { %3628 = vmatpush1.msra.mxu0 %v4989_v49 }
 0x2e1   :  { %3629 = vmatprep.subr.mxu0 %v4995_v51 }
 0x2e2   :  { %3630 = vmatpush1.msra.mxu0 %v3358_v50  ;;  %v2154_v50 = vrot.slane %v4853_v5, %v4612_v27 }
 0x2e3   :  { %3631 = vmatprep.subr.mxu0 %v3357_v6 }
 0x2e4   :  { %3632 = vmatpush1.msra.mxu0 %v3356_v63  ;;  %v3928_v40 = vpop.f32.mrf.mxu0  ;;  %v3963_v1 = vpop.f32.mrf.mxu1 }
 0x2e5   :  { %3633 = vmatprep.subr.mxu0 %v3355_v7 }
 0x2e6   :  { %3634 = vmatpush1.msra.mxu0 %v3354_v45  ;;  %v3929_v59 = vpop.f32.mrf.mxu0  ;;  %v3964_v12 = vpop.f32.mrf.mxu1 }
 0x2e7   :  { %3635 = vmatprep.subr.mxu0 %v3353_v56  ;;  %v3930_v51 = vadd.f32 %v3929_v59, %v3928_v40  ;;  %v3965_v36 = vadd.f32 %v3964_v12, %v3963_v1  ;;  %v5248_v40 = vld [vmem:[#allocation53_spill] sm:$0xff]  ;;  %v5249_v59 = vld [vmem:[#allocation54_spill] sm:$0xff]  ;;  %v5250_v1 = vld [vmem:[#allocation55_spill] sm:$0xff] }
 0x2e8   :  { %3636 = vmatpush1.msra.mxu0 %v3352_v47  ;;  %v5254_v12 = vld [vmem:[#allocation59_spill] sm:$0xff] }
 0x2e9   :  { %3637 = vmatprep.subr.mxu0 %v3351_v16  ;;  %v2793_v31 = vadd.f32 %v3930_v51, %v2154_v50  ;;  %v5252_v50 = vld [vmem:[#allocation57_spill] sm:$0xff]  ;;  %v5253_v51 = vld [vmem:[#allocation58_spill] sm:$0xff] }
 0x2ea   :  { %3638 = vmatpush1.msra.mxu0 %v3350_v48 }
 0x2eb   :  { %3672 = vmatmul.mubr.f32.vlgmr.msra.gmra.mxu0 %v3526_v26  ;;  %v2863_v49 = vadd.f32 %v3965_v36, %v2793_v31  ;;  %v5246_v26 = vld [vmem:[#allocation51_spill] sm:$0xff]  ;;  %v5256_v31 = vld [vmem:[#allocation61_spill] sm:$0xff]  ;;  %v5259_v36 = vld [vmem:[#allocation64_spill] sm:$0xff] }
 0x2ec   :  { %3677 = vmatprep.mubr.f32.mxu0 %v5224_v11  ;;  %v3525_v11 = vld [vmem:[#allocation5 + $0x8] sm:$0xff] }
 0x2ef   :  { %3678 = vmatmul.mubr.f32.gmra.mxu0 %v3529_v30  ;;  %v5247_v30 = vld [vmem:[#allocation52_spill] sm:$0xff] }
 0x306   :  { %v3998_v3 = vpop.f32.mrf.mxu0  ;;  %v4033_v28 = vpop.f32.mrf.mxu1 }
 0x308   :  { %v3999_v13 = vpop.f32.mrf.mxu0  ;;  %v4034_v20 = vpop.f32.mrf.mxu1 }
 0x309   :  { %v4000_v18 = vadd.f32 %v3999_v13, %v3998_v3  ;;  %v4035_v52 = vadd.f32 %v4034_v20, %v4033_v28  ;;  %v5251_v3 = vld [vmem:[#allocation56_spill] sm:$0xff]  ;;  %v5257_v28 = vld [vmem:[#allocation62_spill] sm:$0xff] }
 0x30a   :  { %v5255_v13 = vld [vmem:[#allocation60_spill] sm:$0xff] }
 0x30b   :  { %v2933_v0 = vadd.f32 %v4000_v18, %v2863_v49  ;;  %v3524_v18 = vld [vmem:[#allocation5] sm:$0xff]  ;;  %v3527_v20 = vld [vmem:[#allocation5 + $0x18] sm:$0xff] }
 0x30c   :  { %v3528_v49 = vld [vmem:[#allocation5 + $0x20] sm:$0xff] }
 0x30d   :  { %v3003_v10 = vadd.f32 %v4035_v52, %v2933_v0  ;;  %v3894_v52 = vld [vmem:[#allocation14] ss:$0 sm:$0xff] }
 0x328   :  { %v4068_v9 = vpop.f32.mrf.mxu0  ;;  %v4103_v32 = vpop.f32.mrf.mxu1 }
 0x32a   :  { %v4069_v2 = vpop.f32.mrf.mxu0  ;;  %v4104_v62 = vpop.f32.mrf.mxu1 }
 0x32b   :  { %v4070_v58 = vadd.f32 %v4069_v2, %v4068_v9  ;;  %v4105_v5 = vadd.f32 %v4104_v62, %v4103_v32  ;;  %v5258_v9 = vld [vmem:[#allocation63_spill] sm:$0xff] }
 0x32d   :  { %v3073_v53 = vadd.f32 %v4070_v58, %v3003_v10 }
 0x32f   :  { %v3143_v45 = vadd.f32 %v4105_v5, %v3073_v53 }
 0x34a   :  { %v4138_v6 = vpop.f32.mrf.mxu0  ;;  %v4173_v27 = vpop.f32.mrf.mxu1 }
 0x34c   :  { %v4139_v63 = vpop.f32.mrf.mxu0  ;;  %v4174_v7 = vpop.f32.mrf.mxu1 }
 0x34d   :  { %v4140_v56 = vadd.f32 %v4139_v63, %v4138_v6  ;;  %v4175_v16 = vadd.f32 %v4174_v7, %v4173_v27 }
 0x34f   :  { %v3213_v47 = vadd.f32 %v4140_v56, %v3143_v45 }
 0x351   :  { %v3283_v48 = vadd.f32 %v4175_v16, %v3213_v47 }
 0x353   :  { %3518 = vmatmul.mubr.f32.vlgmr.msra.gmra.mxu1 %v3283_v48 }
 0x354   :  { %3531 = vmatpush1.msra.mxu1 %v4747_v21  ;;  %3594 = vmatprep.mubr.f32.mxu1 %v3525_v11  ;;  %v5225_v21 = vld [vmem:[#allocation30_spill] sm:$0xff] }
 0x355   :  { %3532 = vmatprep.subr.mxu1 %v4751_v22  ;;  %v5226_v22 = vld [vmem:[#allocation31_spill] sm:$0xff] }
 0x356   :  { %3533 = vmatpush1.msra.mxu1 %v4754_v46  ;;  %v5227_v46 = vld [vmem:[#allocation32_spill] sm:$0xff] }
 0x357   :  { %3534 = vmatprep.subr.mxu1 %v4758_v43  ;;  %v5228_v43 = vld [vmem:[#allocation33_spill] sm:$0xff] }
 0x358   :  { %3535 = vmatpush1.msra.mxu1 %v4761_v55  ;;  %v5229_v55 = vld [vmem:[#allocation34_spill] sm:$0xff] }
 0x359   :  { %3536 = vmatprep.subr.mxu1 %v4764_v60  ;;  %v5230_v60 = vld [vmem:[#allocation35_spill] sm:$0xff] }
 0x35a   :  { %3537 = vmatpush1.msra.mxu1 %v4767_v8  ;;  %v5231_v8 = vld [vmem:[#allocation36_spill] sm:$0xff] }
 0x35b   :  { %3538 = vmatprep.subr.mxu1 %v4770_v23  ;;  %v5232_v23 = vld [vmem:[#allocation37_spill] sm:$0xff] }
 0x35c   :  { %3539 = vmatpush1.msra.mxu1 %v4773_v44  ;;  %v5233_v44 = vld [vmem:[#allocation38_spill] sm:$0xff] }
 0x35d   :  { %3540 = vmatprep.subr.mxu1 %v4776_v25  ;;  %v5234_v25 = vld [vmem:[#allocation39_spill] sm:$0xff] }
 0x35e   :  { %3541 = vmatpush1.msra.mxu1 %v4779_v17  ;;  %v5235_v17 = vld [vmem:[#allocation40_spill] sm:$0xff] }
 0x35f   :  { %3542 = vmatprep.subr.mxu1 %v4782_v33  ;;  %v5236_v33 = vld [vmem:[#allocation41_spill] sm:$0xff] }
 0x360   :  { %3543 = vmatpush1.msra.mxu1 %v4785_v24  ;;  %v5237_v24 = vld [vmem:[#allocation42_spill] sm:$0xff] }
 0x361   :  { %3544 = vmatprep.subr.mxu1 %v4788_v34  ;;  %v5238_v34 = vld [vmem:[#allocation43_spill] sm:$0xff] }
 0x362   :  { %3545 = vmatpush1.msra.mxu1 %v4791_v57  ;;  %v5239_v57 = vld [vmem:[#allocation44_spill] sm:$0xff] }
 0x363   :  { %3546 = vmatprep.subr.mxu1 %v4794_v35  ;;  %v5240_v35 = vld [vmem:[#allocation45_spill] sm:$0xff] }
 0x364   :  { %3547 = vmatpush1.msra.mxu1 %v4797_v37  ;;  %v5241_v37 = vld [vmem:[#allocation46_spill] sm:$0xff] }
 0x365   :  { %3548 = vmatprep.subr.mxu1 %v4800_v38  ;;  %v5242_v38 = vld [vmem:[#allocation47_spill] sm:$0xff] }
 0x366   :  { %3549 = vmatpush1.msra.mxu1 %v4803_v39  ;;  %v5243_v39 = vld [vmem:[#allocation48_spill] sm:$0xff] }
 0x367   :  { %3550 = vmatprep.subr.mxu1 %v4806_v41  ;;  %v5244_v41 = vld [vmem:[#allocation49_spill] sm:$0xff] }
 0x368   :  { %3551 = vmatpush1.msra.mxu1 %v4809_v42  ;;  %v5245_v42 = vld [vmem:[#allocation50_spill] sm:$0xff] }
 0x369   :  { %3552 = vmatprep.subr.mxu1 %v5225_v21 }
 0x36a   :  { %3553 = vmatpush1.msra.mxu1 %v5226_v22 }
 0x36b   :  { %3554 = vmatprep.subr.mxu1 %v5227_v46 }
 0x36c   :  { %3555 = vmatpush1.msra.mxu1 %v5228_v43 }
 0x36d   :  { %3556 = vmatprep.subr.mxu1 %v5229_v55  ;;  %v5260_v55 = vld [vmem:[#allocation29_spill] sm:$0xff] }
 0x36e   :  { %3557 = vmatpush1.msra.mxu1 %v5230_v60 }
 0x36f   :  { %3558 = vmatprep.subr.mxu1 %v5231_v8 }
 0x370   :  { %3559 = vmatpush1.msra.mxu1 %v5232_v23 }
 0x371   :  { %3560 = vmatprep.subr.mxu1 %v5233_v44 }
 0x372   :  { %3561 = vmatpush1.msra.mxu1 %v5234_v25 }
 0x373   :  { %3562 = vmatprep.subr.mxu1 %v5235_v17 }
 0x374   :  { %3563 = vmatpush2.msra.mxu1 %v5236_v33 }
 0x375   :  { %3564 = vmatprep.subr.mxu1 %v5237_v24 }
 0x376   :  { %3565 = vmatpush2.msra.mxu1 %v5238_v34 }
 0x377   :  { %3566 = vmatprep.subr.mxu1 %v5239_v57 }
 0x378   :  { %3567 = vmatpush2.msra.mxu1 %v5240_v35 }
 0x379   :  { %3568 = vmatprep.subr.mxu1 %v5241_v37 }
 0x37a   :  { %3569 = vmatpush2.msra.mxu1 %v5242_v38 }
 0x37b   :  { %3570 = vmatprep.subr.mxu1 %v5243_v39 }
 0x37c   :  { %3571 = vmatpush2.msra.mxu1 %v5244_v41 }
 0x37d   :  { %3572 = vmatprep.subr.mxu1 %v5245_v42 }
 0x37e   :  { %3573 = vmatpush2.msra.mxu1 %v5246_v26 }
 0x37f   :  { %3574 = vmatprep.subr.mxu1 %v5247_v30 }
 0x380   :  { %3575 = vmatpush2.msra.mxu1 %v5248_v40 }
 0x381   :  { %3576 = vmatprep.subr.mxu1 %v5249_v59 }
 0x382   :  { %3577 = vmatpush2.msra.mxu1 %v5250_v1 }
 0x383   :  { %3578 = vmatprep.subr.mxu1 %v5251_v3 }
 0x384   :  { %3579 = vmatpush2.msra.mxu1 %v5252_v50 }
 0x385   :  { %3580 = vmatprep.subr.mxu1 %v5253_v51 }
 0x386   :  { %3581 = vmatpush2.msra.mxu1 %v5254_v12 }
 0x387   :  { %3582 = vmatprep.subr.mxu1 %v5255_v13 }
 0x388   :  { %3583 = vmatpush2.msra.mxu1 %v5256_v31 }
 0x389   :  { %3584 = vmatprep.subr.mxu1 %v5257_v28 }
 0x38a   :  { %3585 = vmatpush2.msra.mxu1 %v5258_v9 }
 0x38b   :  { %3586 = vmatprep.subr.mxu1 %v4974_v19  ;;  %v3448_v19 = vpop.f32.mrf.mxu0 }
 0x38c   :  { %3587 = vmatpush2.msra.mxu1 %v5259_v36  ;;  %v4484_v36 = vmov 1966171168  }
 0x38d   :  { %3588 = vmatprep.subr.mxu1 %v4986_v14  ;;  %v5106_v2 = vpop.f32.mrf.mxu0 }
 0x38e   :  { %3589 = vmatpush2.msra.mxu1 %v4992_v4 }
 0x38f   :  { %3590 = vmatprep.subr.mxu1 %v4998_v29 }
 0x390   :  { %3591 = vmatpush2.msra.mxu1 %v5002_v54 }
 0x391   :  { %3592 = vmatprep.subr.mxu1 %v5006_v15 }
 0x392   :  { %3593 = vmatpush2.msra.mxu1 %v5010_v61 }
 0x393   :  { %3595 = vmatmul.mubr.f32.vlgmr.msra.gmra.mxu1 %v3524_v18  ;;  %v3757_v18 = vunpack.c.l.s4 %v4484_v36 }
 0x394   :  { %3600 = vmatprep.mubr.f32.mxu1 %v3528_v49 }
 0x395   :  { %v3758_v49 = vunpack.c.0.s8 %v3757_v18 }
 0x397   :  { %3601 = vmatmul.mubr.f32.gmra.mxu1 %v3527_v20  ;;  %v5261_v20 = vld [vmem:[#allocation28_spill] sm:$0xff] }
 0x3ab   :  { %v3673_v0 = vpop.f32.mrf.mxu0 }
 0x3ad   :  { %v5110_v32 = vpop.f32.mrf.mxu0 }
 0x3af   :  { %v3679_v61 = vpop.f32.mrf.mxu0 }
 0x413   :  { %v3519_v14 = vpop.f32.mrf.mxu1 }
 0x414   :  { %v3520_v7 = vadd.f32 %v3519_v14, %v3448_v19  ;;  %v3761_v19 = vsub.s32 %v3758_v49, %v5261_v20 }
 0x415   :  { %v5108_v4 = vpop.f32.mrf.mxu1 }
 0x416   :  { %v3691_v48 = vadd.f32 %v3894_v52, %v3520_v7 }
 0x418   :  { %v3707_v43 = vrot.slane %v3691_v48, 1 }
 0x453   :  { %v3596_v29 = vpop.f32.mrf.mxu1 }
 0x454   :  { %v3674_v54 = vadd.f32 %v3673_v0, %v3596_v29 }
 0x455   :  { %v5112_v15 = vpop.f32.mrf.mxu1 }
 0x456   :  { %v3692_v58 = vadd.f32 %v3894_v52, %v3674_v54 }
 0x457   :  { %v3602_v10 = vpop.f32.mrf.mxu1 }
 0x458   :  { %v3694_v62 = vrot.slane %v3692_v58, 4  ;;  %v3680_v53 = vadd.f32 %v3679_v61, %v3602_v10 }
 0x45a   :  { %v3695_v6 = vmax.f32 %v3692_v58, %v3694_v62  ;;  %v3693_v27 = vadd.f32 %v3894_v52, %v3680_v53 }
 0x45c   :  { %v3696_v5 = vrot.slane %v3695_v6, 2  ;;  %v3700_v63 = vrot.slane %v3693_v27, 4 }
 0x45e   :  { %v3697_v45 = vmax.f32 %v3695_v6, %v3696_v5  ;;  %v3701_v56 = vmax.f32 %v3693_v27, %v3700_v63 }
 0x460   :  { %v3698_v47 = vrot.slane %v3697_v45, 1  ;;  %v3702_v16 = vrot.slane %v3701_v56, 2 }
 0x462   :  { %v3699_v11 = vmax.f32 %v3697_v45, %v3698_v47  ;;  %v3703_v21 = vmax.f32 %v3701_v56, %v3702_v16 }
 0x464   :  { %v3710_v22 = vmax.f32 %v3699_v11, %v3691_v48  ;;  %v3704_v46 = vrot.slane %v3703_v21, 1 }
 0x466   :  { %v3724_v60 = vrot.slane %v3710_v22, %v5260_v55  ;;  %v3705_v8 = vmax.f32 %v3703_v21, %v3704_v46 }
 0x468   :  { %v3729_v23 = vsub.f32 %v3692_v58, %v3724_v60  ;;  %v3711_v44 = vmax.f32 %v3705_v8, %v3707_v43 }
 0x46a   :  { %v3731_v25 = vmul.f32 1.442695, %v3729_v23  ;;  %v3728_v17 = vrot.slane %v3711_v44, %v5260_v55  ;;  %v3714_v24 = vrot.slane %v3711_v44, 7 }
 0x46c   :  { %4206 = vpow2.f32 %v3731_v25  ;;  %v3730_v33 = vsub.f32 %v3693_v27, %v3728_v17  ;;  %v3716_v57 = vsel %vm3715_vm2, %v3714_v24, %v3710_v22 }
 0x46d   :  { %v3718_v35 = vsub.f32 %v3691_v48, %v3716_v57 }
 0x46e   :  { %v3733_v34 = vmul.f32 1.442695, %v3730_v33 }
 0x46f   :  { %v3719_v38 = vmul.f32 1.442695, %v3718_v35 }
 0x470   :  { %4208 = vpow2.f32 %v3733_v34 }
 0x471   :  { %4210 = vpow2.f32 %v3719_v38 }
 0x479   :  { %v4207_v37 = vpop.eup %4206 }
 0x47a   :  { %v3735_v39 = vrot.slane %v4207_v37, 4 }
 0x47c   :  { %v3736_v41 = vadd.f32 %v4207_v37, %v3735_v39 }
 0x47d   :  { %v4209_v42 = vpop.eup %4208 }
 0x47e   :  { %v3737_v26 = vrot.slane %v3736_v41, 2  ;;  %v3741_v30 = vrot.slane %v4209_v42, 4  ;;  %v4211_v31 = vpop.eup %4210 }
 0x480   :  { %v3738_v40 = vadd.f32 %v3737_v26, %v3736_v41  ;;  %v3742_v59 = vadd.f32 %v4209_v42, %v3741_v30 }
 0x482   :  { %v3743_v1 = vrot.slane %v3742_v59, 2  ;;  %v3739_v3 = vrot.slane %v3738_v40, 1 }
 0x484   :  { %v3744_v50 = vadd.f32 %v3743_v1, %v3742_v59  ;;  %v3740_v12 = vadd.f32 %v3739_v3, %v3738_v40 }
 0x486   :  { %v3745_v51 = vrot.slane %v3744_v50, 1 }
 0x488   :  { %v3746_v13 = vadd.f32 %v3745_v51, %v3744_v50 }
 0x48a   :  { %v3749_v28 = vsel %vm3715_vm2, %v3746_v13, %v3740_v12 }
 0x48b   :  { %v3751_v9 = vadd.f32 %v4211_v31, %v3749_v28 }
 0x48d   :  { %4212 = vrcp.f32 %v3751_v9 }
 0x49a   :  { %v4213_v14 = vpop.eup %4212 }
 0x49b   :  { %v3762_v0 = vrot.slane %v4213_v14, %v3761_v19  ;;  %v3754_v29 = vmul.f32 %v4213_v14, %v4211_v31 }
 0x49d   :  { %v3763_v54 = vcombine.high %v3762_v0, %v3762_v0  ;;  %v3770_v52 = vrot.slane %v3762_v0, %v3761_v19  ;;  %3819 = vst [vmem:[#allocation18] sm:$0x3] %v3754_v29 }
 0x49e   :  { %4405 = shalt.err (!%p4402_p7)
}
 0x49f   :  { %3841 = dma.vmem_to_hbm [thread:$0]  %s3839_s8, 32, %s5145_s10, [#allocation19]   ;;  %v3777_v58 = vrot.slane %v3763_v54, %v3761_v19  ;;  %v3781_v61 = vrot.slane %v3770_v52, %v5260_v55  ;;  %v3604_v10 = vpop.f32.mrf.mxu1  ;;  %v3676_v62 = vadd.f32 %v5110_v32, %v5112_v15  ;;  %v3681_v27 = vpop.f32.mrf.mxu0 }
 0x4a0   :  { %s4486_s26 = smov [#allocation20]   ;;  %v3682_v5 = vadd.f32 %v3681_v27, %v3604_v10 }
 0x4a1   :  { %s3847_s27 = sshll.u32 %s4486_s26, 4  ;;  %v3785_v53 = vrot.slane %v3777_v58, %v5260_v55  ;;  %v3788_v6 = vmul.f32 %v4207_v37, %v3781_v61  ;;  %s3848_s27 = int_to_ptr.vmem [resolvable:$true] %s3847_s27 }
 0x4a2   :  { %s4414_s10 = scalar_lea.vmem %s3848_s27, 256  ;;  %p4419_p9 = scmp.lt.s32.totalorder %s3848_s27, %s3848_s27 }
 0x4a3   :  { %v3789_v63 = vmul.f32 %v4209_v42, %v3785_v53  ;;  %3820 = vst [vmem:[#allocation20] sm:$0xff] %v3788_v6  ;;  %v3791_v7 = vmul.f32 %v3788_v6, %v3676_v62  ;;  %p4415_p8 = scmp.ne.s32.totalorder %s3848_s27, %s4414_s10  ;;  %p4420_p10 = scmp.lt.s32.totalorder %s4414_s10, %s4414_s10 }
 0x4a5   :  { %v3792_v45 = vmul.f32 %v3789_v63, %v3682_v5  ;;  %3821 = vst [vmem:[#allocation20 + $0x8] sm:$0xff] %v3789_v63  ;;  %v3793_v56 = vrot.slane %v3791_v7, 4  ;;  %p4421_p11 = por %p4420_p10, %p4419_p9 }
 0x4a7   :  { %p4422_p12 = pnand %p4421_p11, %p4415_p8 }
 0x4a9   :  { %4425 = shalt.err (!%p4422_p12)
}
 0x4aa   :  { %s4487_s28 = smov 128   ;;  %s4488_s7 = smov 8   ;;  %v3799_v32 = vrot.slane %v3792_v45, 4  ;;  %v3794_v15 = vadd.f32 %v3793_v56, %v3791_v7  ;;  %v3522_v43 = vadd.f32 %v5108_v4, %v5106_v2  ;;  %v3895_v44 = vld [vmem:[#allocation16] ss:$0 sm:$0xff] }
 0x4ab   :  { %3853 = dma.vmem_to_hbm [thread:$0]  %s3848_s27, 256, %s5146_s11, [#allocation19], %s4487_s28, %s4487_s28, %s4488_s7  }
 0x4ac   :  { %v3800_v47 = vadd.f32 %v3799_v32, %v3792_v45  ;;  %v3795_v16 = vrot.slane %v3794_v15, 2  ;;  %v3790_v8 = vmul.f32 %v3754_v29, %v3522_v43  ;;  %s4489_s0 = smov [#allocation17]  }
 0x4ad   :  { %s3828_s11 = sshll.u32 %s4489_s0, 4  ;;  %s3829_s11 = int_to_ptr.vmem [resolvable:$true] %s3828_s11 }
 0x4ae   :  { %v3801_v48 = vrot.slane %v3800_v47, 2  ;;  %v3796_v11 = vadd.f32 %v3795_v16, %v3794_v15  ;;  %s4434_s12 = scalar_lea.vmem %s3829_s11, 32  ;;  %p4439_p0 = scmp.lt.s32.totalorder %s3829_s11, %s3829_s11 }
 0x4af   :  { %p4435_p13 = scmp.ne.s32.totalorder %s3829_s11, %s4434_s12  ;;  %p4440_p1 = scmp.lt.s32.totalorder %s4434_s12, %s4434_s12 }
 0x4b0   :  { %v3802_v21 = vadd.f32 %v3801_v48, %v3800_v47  ;;  %v3797_v22 = vrot.slane %v3796_v11, 1 }
 0x4b1   :  { %p4441_p2 = por %p4440_p1, %p4439_p0 }
 0x4b2   :  { %v3803_v46 = vrot.slane %v3802_v21, 1  ;;  %v3798_v60 = vadd.f32 %v3797_v22, %v3796_v11 }
 0x4b3   :  { %p4442_p3 = pnand %p4441_p2, %p4435_p13 }
 0x4b4   :  { %v3804_v55 = vadd.f32 %v3803_v46, %v3802_v21 }
 0x4b6   :  { %v3807_v23 = vsel %vm3715_vm2, %v3804_v55, %v3798_v60 }
 0x4b7   :  { %v3809_v25 = vadd.f32 %v3807_v23, %v3790_v8 }
 0x4b9   :  { %v3817_v17 = vadd.f32 %v3895_v44, %v3809_v25 }
 0x4bb   :  { %3818 = vst [vmem:[#allocation17] sm:$0x3] %v3817_v17 }
 0x4bc   :  { %4445 = shalt.err (!%p4442_p3)
}
 0x4bd   :  { %3831 = dma.vmem_to_hbm [thread:$0]  %s3829_s11, 32, %s5144_s9, [#allocation4]  }
 0x4be   :  { %4464 = dma.done.wait [#allocation4], 32  }
 0x4bf   :  { %4465 = vsyncadd [#allocation4], 4294967264 }
 0x4c0   :  { %4466 = dma.done.wait [#allocation19], 288  }
 0x4c1   :  { %4467 = vsyncadd [#allocation19], 4294967008 }
 0x4c2   :  { %3863 = vsyncpa [#allocation3], 1 }
 0x4c3   :  { %3864 = vsyncpa [#allocation6], 1 }
 0x4c4   :  { %3865 = vsyncpa [#allocation9], 1 }
 0x4c5   :  { %3866 = vsyncpa [#allocation12], 1 }
 0x4c6   :  { %3867 = vsyncpa [#allocation15], 1 }
 0x4c7   :  { %3868 = vsyncpa [#allocation4], 1 }
 0x4c8   :  { %3869 = vsyncpa [#allocation19], 1 }

</bundles_post_ra>
